<compile_context>
chip_gen: v7x
topology: tpu7x:2x2x1
jax: 0.10.0
libtpu: 0.0.40
codegen_flags: <defaults>
</compile_context>

<pallas_src>
import math

import jax
import jax.numpy as jnp
from jax import lax
from jax.experimental import pallas as pl
from jax.experimental.pallas import tpu as pltpu

# ---------------- config (small shapes, consistent with the module) ----------
IMAGE_SIZE = 16
PATCH_SIZE = 4
CHANNELS = 3
DIM = 32
DEPTH = 2
HEADS = 4
DIM_HEAD = 8
MLP_DIM = 64
NCONDITION = 4
BATCH = 2
TOKEN_CLASSIFICATION = True
POOL = "cls"
DROPOUT = 0.0  # nn.Dropout with p=0 (eval semantics) is the identity

NUM_PATCHES = (IMAGE_SIZE // PATCH_SIZE) ** 2          # 16
PATCH_DIM = CHANNELS * PATCH_SIZE * PATCH_SIZE         # 48
INNER_DIM = HEADS * DIM_HEAD                           # 32
SEQ = NUM_PATCHES + 2                                  # 18
SCALE = DIM_HEAD ** -0.5
LN_EPS = 1e-5

# ---- "vector bank" row layout (all DIM-wide parameter vectors in one array) ----
V_POS = 0                                  # pos_embedding rows [0, SEQ)
V_BPE = SEQ                                # patch-embed bias
V_CLS = SEQ + 1                            # cls token
V_CON = SEQ + 2                            # condition tokens [V_CON, V_CON+NCONDITION)
V_LAYER = SEQ + 2 + NCONDITION             # per-layer rows start
ROWS_PER_LAYER = 6                         # [g1, beta1, b_out, g2, beta2, b2]
V_GF = V_LAYER + ROWS_PER_LAYER * DEPTH    # final LN gamma
V_BF = V_GF + 1                            # final LN beta
NVEC = V_BF + 1                            # 38 rows total


# ---------------- in-kernel helpers ------------------------------------------
def _layernorm(x, g, b):
    """LayerNorm over the last dim (biased variance, eps=1e-5) — matches nn.LayerNorm."""
    mu = jnp.mean(x, axis=-1, keepdims=True)
    var = jnp.mean((x - mu) ** 2, axis=-1, keepdims=True)
    return (x - mu) * lax.rsqrt(var + LN_EPS) * g + b


def _erf_f32(x):
    """float32 erf via the Eigen/XLA rational polynomial (mul/add/div/clip only)."""
    x = jnp.clip(x, -4.0, 4.0)
    x2 = x * x
    a = jnp.float32(-2.72614225801306e-10)
    a = a * x2 + jnp.float32(2.77068142495902e-08)
    a = a * x2 + jnp.float32(-2.10102402082508e-06)
    a = a * x2 + jnp.float32(-5.69250639462346e-05)
    a = a * x2 + jnp.float32(-7.34990630326855e-04)
    a = a * x2 + jnp.float32(-2.95459980854025e-03)
    a = a * x2 + jnp.float32(-1.60960333262415e-02)
    a = a * x
    b = jnp.float32(-1.45660718464996e-05)
    b = b * x2 + jnp.float32(-2.13374055278905e-04)
    b = b * x2 + jnp.float32(-1.68282697438203e-03)
    b = b * x2 + jnp.float32(-7.37332916720468e-03)
    b = b * x2 + jnp.float32(-1.42647390514189e-02)
    return a / b


def _gelu_exact(x):
    # PyTorch nn.GELU() default = exact erf-based GELU.
    return 0.5 * x * (1.0 + _erf_f32(x * jnp.float32(1.0 / math.sqrt(2.0))))


def _bf16(x):
    return x.astype(jnp.bfloat16)


# ---------------- fused ViT kernel (whole batch in one grid step) -------------
def vit_fused_kernel(
    c_ref,                                   # scalar-prefetch: (B,) int32 in SMEM
    patches_ref,                             # (B*NUM_PATCHES, PATCH_DIM)
    w_pe_ref,                                # (PATCH_DIM, DIM)
    vec_ref,                                 # (NVEC, DIM) packed vector bank
    wqkv_ref,                                # (DEPTH, DIM, 3*INNER)
    wo_ref,                                  # (DEPTH, INNER, DIM)
    w1b_ref,                                 # (DEPTH, DIM+1, MLP)  (w1 with b1 in last row)
    w2_ref,                                  # (DEPTH, MLP, DIM)
    out_ref,                                 # (2*B, DIM): rows [0,B)=class, [B,2B)=condition
):
    nb = c_ref.shape[0]
    bs = nb * SEQ
    f32 = jnp.float32

    vec = vec_ref[...]                                    # (NVEC, DIM) — one load
    pos = vec[V_POS:V_POS + SEQ]
    b_pe = vec[V_BPE:V_BPE + 1]
    cls_tok = vec[V_CLS:V_CLS + 1]
    g_f = vec[V_GF:V_GF + 1]
    b_f = vec[V_BF:V_BF + 1]

    # --- patch embedding for all batch elements at once (bf16 MXU, f32 acc) ----
    pe = jnp.dot(_bf16(patches_ref[...]), _bf16(w_pe_ref[...]),
                 preferred_element_type=f32) + b_pe        # (nb*NUM_PATCHES, DIM)

    # --- stack tokens: per batch [condition, cls, patches], then +pos embedding
    rows = []
    for bb in range(nb):
        idx = c_ref[bb]
        con_row = vec_ref[pl.ds(V_CON + idx, 1), :]        # (1, DIM) dynamic sublane slice
        rows.append(con_row)
        rows.append(cls_tok)
        rows.append(pe[bb * NUM_PATCHES:(bb + 1) * NUM_PATCHES])
    x = jnp.concatenate(rows, axis=0) + jnp.concatenate([pos] * nb, axis=0)   # (bs, DIM)

    # --- block-diagonal additive mask (keeps batch elements independent) -------
    r_id = lax.broadcasted_iota(jnp.int32, (bs, bs), 0)
    c_id = lax.broadcasted_iota(jnp.int32, (bs, bs), 1)
    same = None
    for bb in range(nb):
        lo, hi = bb * SEQ, (bb + 1) * SEQ
        blk = (r_id >= lo) & (r_id < hi) & (c_id >= lo) & (c_id < hi)
        same = blk if same is None else (same | blk)
    mask = jnp.where(same, f32(0.0), f32(-1e30))           # (bs, bs)

    # --- transformer: static loop over DEPTH, weights resident in VMEM ---------
    for l in range(DEPTH):
        base = V_LAYER + ROWS_PER_LAYER * l
        g1, beta1 = vec[base + 0:base + 1], vec[base + 1:base + 2]
        b_out = vec[base + 2:base + 3]
        g2, beta2 = vec[base + 3:base + 4], vec[base + 4:base + 5]
        b2 = vec[base + 5:base + 6]

        # PreNorm(Attention) + residual
        h = _layernorm(x, g1, beta1)
        qkv = jnp.dot(_bf16(h), _bf16(wqkv_ref[l]), preferred_element_type=f32)  # (bs, 3*INNER)
        head_outs = []
        for hh in range(HEADS):
            q = qkv[:, hh * DIM_HEAD:(hh + 1) * DIM_HEAD]
            k = qkv[:, INNER_DIM + hh * DIM_HEAD:INNER_DIM + (hh + 1) * DIM_HEAD]
            v = qkv[:, 2 * INNER_DIM + hh * DIM_HEAD:2 * INNER_DIM + (hh + 1) * DIM_HEAD]
            # q @ k^T over the stacked batch; cross-batch blocks masked out.
            dots = lax.dot_general(_bf16(q), _bf16(k), (((1,), (1,)), ((), ())),
                                   preferred_element_type=f32) * f32(SCALE) + mask
            m = jnp.max(dots, axis=-1, keepdims=True)
            p = jnp.exp(dots - m)
            attn = p / jnp.sum(p, axis=-1, keepdims=True)   # exact softmax division
            head_outs.append(jnp.dot(_bf16(attn), _bf16(v), preferred_element_type=f32))
        out_h = jnp.concatenate(head_outs, axis=-1)         # (bs, INNER) — one out-proj matmul
        x = x + jnp.dot(_bf16(out_h), _bf16(wo_ref[l]), preferred_element_type=f32) + b_out

        # PreNorm(FeedForward) + residual
        h = _layernorm(x, g2, beta2)
        w1b = w1b_ref[l]                                    # (DIM+1, MLP)
        h1 = jnp.dot(_bf16(h), _bf16(w1b[0:DIM]), preferred_element_type=f32) + w1b[DIM:DIM + 1]
        h1 = _gelu_exact(h1)
        x = x + jnp.dot(_bf16(h1), _bf16(w2_ref[l]), preferred_element_type=f32) + b2

    # --- merged tail: pooling + single final LayerNorm over stacked rows -------
    if POOL == "mean":
        cls_rows = [jnp.mean(x[bb * SEQ + 1:(bb + 1) * SEQ], axis=0, keepdims=True)
                    for bb in range(nb)]
    else:
        cls_rows = [x[bb * SEQ + 1:bb * SEQ + 2] for bb in range(nb)]
    con_rows = [x[bb * SEQ:bb * SEQ + 1] for bb in range(nb)]
    tail = jnp.concatenate(cls_rows + con_rows, axis=0)     # (2*nb, DIM)
    out_ref[...] = _layernorm(tail, g_f, b_f)


# ---------------- pallas_call wrapper ------------------------------------------
def _full_spec(a):
    zeros = (0,) * a.ndim
    return pl.BlockSpec(a.shape, lambda i, c, z=zeros: z)


def vit_forward(img, c, params):
    B, C, H, W = img.shape
    p = PATCH_SIZE
    hn, wn = H // p, W // p

    # einops: 'b c (h p1) (w p2) -> b (h w) (p1 p2 c)', stacked over batch (layout glue)
    patches = img.reshape(B, C, hn, p, wn, p).transpose(0, 2, 4, 3, 5, 1)
    patches = patches.reshape(B * hn * wn, p * p * C)               # (B*NP, PATCH_DIM)

    # pack every (DIM,)-wide parameter vector into one bank (see V_* layout constants)
    per_layer = [
        jnp.stack([params["g1"][l], params["beta1"][l], params["b_out"][l],
                   params["g2"][l], params["beta2"][l], params["b2"][l]], axis=0)
        for l in range(DEPTH)
    ]
    vec_bank = jnp.concatenate(
        [params["pos_embedding"], params["b_pe"][None, :], params["cls_token"][None, :],
         params["con_token"]] + per_layer
        + [params["g_f"][None, :], params["b_f"][None, :]],
        axis=0)                                                     # (NVEC, DIM)

    w1b = jnp.concatenate([params["w1"], params["b1"][:, None, :]], axis=1)  # (DEPTH, DIM+1, MLP)

    weight_args = [params["w_pe"], vec_bank, params["w_qkv"], params["w_out"], w1b, params["w2"]]

    grid_spec = pltpu.PrefetchScalarGridSpec(
        num_scalar_prefetch=1,
        grid=(1,),                                   # batch folded into one grid step
        in_specs=[_full_spec(patches)] + [_full_spec(w) for w in weight_args],
        out_specs=pl.BlockSpec((2 * B, DIM), lambda i, c: (0, 0)),
    )

    out = pl.pallas_call(
        vit_fused_kernel,
        out_shape=jax.ShapeDtypeStruct((2 * B, DIM), jnp.float32),
        grid_spec=grid_spec,
        compiler_params=pltpu.CompilerParams(dimension_semantics=("arbitrary",)),
    )(c.astype(jnp.int32), patches, *weight_args)

    class_emb, condition_emb = out[:B], out[B:]
    if TOKEN_CLASSIFICATION:
        return class_emb, condition_emb
    return class_emb


# ---------------- pure-JAX fp32 reference (mirrors the PyTorch forward) --------
def _ln_ref(x, g, b):
    mu = jnp.mean(x, axis=-1, keepdims=True)
    var = jnp.mean((x - mu) ** 2, axis=-1, keepdims=True)
    return (x - mu) / jnp.sqrt(var + LN_EPS) * g + b


def vit_reference(img, c, params):
    B, C, H, W = img.shape
    p = PATCH_SIZE
    hn, wn = H // p, W // p
    patches = img.reshape(B, C, hn, p, wn, p).transpose(0, 2, 4, 3, 5, 1)
    patches = patches.reshape(B, hn * wn, p * p * C)

    x = patches @ params["w_pe"] + params["b_pe"]
    con = params["con_token"][c][:, None, :]
    cls = jnp.broadcast_to(params["cls_token"][None, None, :], (B, 1, DIM))
    x = jnp.concatenate([con, cls, x], axis=1) + params["pos_embedding"][None]

    for l in range(DEPTH):
        h = _ln_ref(x, params["g1"][l], params["beta1"][l])
        qkv = h @ params["w_qkv"][l]
        q, k, v = jnp.split(qkv, 3, axis=-1)

        def split_heads(t):
            return t.reshape(B, SEQ, HEADS, DIM_HEAD).transpose(0, 2, 1, 3)

        q, k, v = split_heads(q), split_heads(k), split_heads(v)
        dots = jnp.einsum("bhqd,bhkd->bhqk", q, k) * SCALE
        attn = jax.nn.softmax(dots, axis=-1)
        o = jnp.einsum("bhqk,bhkd->bhqd", attn, v)
        o = o.transpose(0, 2, 1, 3).reshape(B, SEQ, INNER_DIM)
        x = x + o @ params["w_out"][l] + params["b_out"][l]

        h = _ln_ref(x, params["g2"][l], params["beta2"][l])
        h1 = jax.nn.gelu(h @ params["w1"][l] + params["b1"][l], approximate=False)
        x = x + h1 @ params["w2"][l] + params["b2"][l]

    if POOL == "mean":
        class_emb = jnp.mean(x[:, 1:, :], axis=1)
    else:
        class_emb = x[:, 1]
    class_emb = _ln_ref(class_emb, params["g_f"], params["b_f"])
    condition_emb = _ln_ref(x[:, 0], params["g_f"], params["b_f"])
    return class_emb, condition_emb


# ---------------- deterministic parameter init --------------------------------
def init_params(key):
    ks = jax.random.split(key, 18)

    def norm(k, shape, scale=0.02):
        return scale * jax.random.normal(k, shape, jnp.float32)

    return {
        "w_pe": norm(ks[0], (PATCH_DIM, DIM)),
        "b_pe": norm(ks[1], (DIM,), 0.1),
        "pos_embedding": jax.random.normal(ks[2], (SEQ, DIM), jnp.float32),
        "cls_token": jax.random.normal(ks[3], (DIM,), jnp.float32),
        "con_token": jax.random.normal(ks[4], (NCONDITION, DIM), jnp.float32),
        "g_f": 1.0 + norm(ks[5], (DIM,), 0.1),
        "b_f": norm(ks[6], (DIM,), 0.1),
        # per-layer weights stacked along a leading DEPTH axis
        "g1": 1.0 + norm(ks[7], (DEPTH, DIM), 0.1),
        "beta1": norm(ks[8], (DEPTH, DIM), 0.1),
        "w_qkv": norm(ks[9], (DEPTH, DIM, 3 * INNER_DIM)),
        "w_out": norm(ks[10], (DEPTH, INNER_DIM, DIM)),
        "b_out": norm(ks[11], (DEPTH, DIM), 0.1),
        "g2": 1.0 + norm(ks[12], (DEPTH, DIM), 0.1),
        "beta2": norm(ks[13], (DEPTH, DIM), 0.1),
        "w1": norm(ks[14], (DEPTH, DIM, MLP_DIM)),
        "b1": norm(ks[15], (DEPTH, MLP_DIM), 0.1),
        "w2": norm(ks[16], (DEPTH, MLP_DIM, DIM)),
        "b2": norm(ks[17], (DEPTH, DIM), 0.1),
    }


# ---------------- main ---------------------------------------------------------
if __name__ == "__main__":
    key = jax.random.PRNGKey(0)
    k_img, k_c, k_p = jax.random.split(key, 3)

    img = jax.random.normal(k_img, (BATCH, CHANNELS, IMAGE_SIZE, IMAGE_SIZE), jnp.float32)
    c = jax.random.randint(k_c, (BATCH,), 0, NCONDITION)
    params = init_params(k_p)

    class_emb, condition_emb = jax.block_until_ready(jax.jit(vit_forward)(img, c, params))
    ref_class, ref_cond = jax.block_until_ready(jax.jit(vit_reference)(img, c, params))

    assert class_emb.shape == (BATCH, DIM)
    assert condition_emb.shape == (BATCH, DIM)
    assert bool(jnp.all(jnp.isfinite(class_emb)))
    assert bool(jnp.all(jnp.isfinite(condition_emb)))
    # bf16 MXU operands with f32 accumulation -> loose but meaningful tolerance vs fp32 ref
    assert bool(jnp.allclose(class_emb, ref_class, rtol=5e-2, atol=5e-2)), "class_emb mismatch"
    assert bool(jnp.allclose(condition_emb, ref_cond, rtol=5e-2, atol=5e-2)), "condition_emb mismatch"
    print("KERNEL_OK")
</pallas_src>

<mosaic_0001>
module attributes {stable_mosaic.version = 11 : i64} {
  func.func @vit_fused_kernel(%arg0: i32, %arg1: memref<2xi32, #tpu.memory_space<smem>>, %arg2: memref<32x48xf32, #tpu.memory_space<vmem>>, %arg3: memref<48x32xf32, #tpu.memory_space<vmem>>, %arg4: memref<38x32xf32, #tpu.memory_space<vmem>>, %arg5: memref<2x32x96xf32, #tpu.memory_space<vmem>>, %arg6: memref<2x32x32xf32, #tpu.memory_space<vmem>>, %arg7: memref<2x33x64xf32, #tpu.memory_space<vmem>>, %arg8: memref<2x64x32xf32, #tpu.memory_space<vmem>>, %arg9: memref<4x32xf32, #tpu.memory_space<vmem>>) attributes {dimension_semantics = [#tpu.dimension_semantics<arbitrary>], iteration_bounds = array<i64: 1>, scalar_prefetch = 1 : i64, scratch_operands = 0 : i64, tpu.core_type = #tpu.core_type<tc>, window_params = [{pipeline_mode = #tpu.pipeline_mode<synchronous>, transform_indices = @transform_0, window_bounds = array<i64: 32, 48>}, {pipeline_mode = #tpu.pipeline_mode<synchronous>, transform_indices = @transform_1, window_bounds = array<i64: 48, 32>}, {pipeline_mode = #tpu.pipeline_mode<synchronous>, transform_indices = @transform_2, window_bounds = array<i64: 38, 32>}, {pipeline_mode = #tpu.pipeline_mode<synchronous>, transform_indices = @transform_3, window_bounds = array<i64: 2, 32, 96>}, {pipeline_mode = #tpu.pipeline_mode<synchronous>, transform_indices = @transform_4, window_bounds = array<i64: 2, 32, 32>}, {pipeline_mode = #tpu.pipeline_mode<synchronous>, transform_indices = @transform_5, window_bounds = array<i64: 2, 33, 64>}, {pipeline_mode = #tpu.pipeline_mode<synchronous>, transform_indices = @transform_6, window_bounds = array<i64: 2, 64, 32>}, {pipeline_mode = #tpu.pipeline_mode<synchronous>, transform_indices = @transform_7, window_bounds = array<i64: 4, 32>}]} {
    %c0 = arith.constant 0 : index
    %c0_0 = arith.constant 0 : index
    %0 = vector.load %arg4[%c0, %c0_0] : memref<38x32xf32, #tpu.memory_space<vmem>>, vector<38x32xf32>
    %1 = vector.extract_strided_slice %0 {offsets = [0, 0], sizes = [18, 32], strides = [1, 1]} : vector<38x32xf32> to vector<18x32xf32>
    %2 = vector.extract_strided_slice %0 {offsets = [18, 0], sizes = [1, 32], strides = [1, 1]} : vector<38x32xf32> to vector<1x32xf32>
    %3 = vector.extract_strided_slice %0 {offsets = [19, 0], sizes = [1, 32], strides = [1, 1]} : vector<38x32xf32> to vector<1x32xf32>
    %4 = vector.extract_strided_slice %0 {offsets = [36, 0], sizes = [1, 32], strides = [1, 1]} : vector<38x32xf32> to vector<1x32xf32>
    %5 = vector.extract_strided_slice %0 {offsets = [37, 0], sizes = [1, 32], strides = [1, 1]} : vector<38x32xf32> to vector<1x32xf32>
    %c0_1 = arith.constant 0 : index
    %c0_2 = arith.constant 0 : index
    %6 = vector.load %arg2[%c0_1, %c0_2] : memref<32x48xf32, #tpu.memory_space<vmem>>, vector<32x48xf32>
    %7 = arith.truncf %6 : vector<32x48xf32> to vector<32x48xbf16>
    %c0_3 = arith.constant 0 : index
    %c0_4 = arith.constant 0 : index
    %8 = vector.load %arg3[%c0_3, %c0_4] : memref<48x32xf32, #tpu.memory_space<vmem>>, vector<48x32xf32>
    %9 = arith.truncf %8 : vector<48x32xf32> to vector<48x32xbf16>
    %cst = arith.constant dense<0.000000e+00> : vector<32x32xf32>
    %10 = tpu.matmul %7, %9, %cst {dimension_numbers = #tpu.dot_dimension_numbers<[1], [0], [0], [1], [0, 0, 1, 1], [], []>} : vector<32x48xbf16>, vector<48x32xbf16>, vector<32x32xf32> -> vector<32x32xf32>
    %11 = vector.broadcast %2 : vector<1x32xf32> to vector<32x32xf32>
    %12 = arith.addf %10, %11 : vector<32x32xf32>
    %c0_5 = arith.constant 0 : index
    %13 = memref.load %arg1[%c0_5] : memref<2xi32, #tpu.memory_space<smem>>
    %c20_i32 = arith.constant 20 : i32
    %14 = arith.addi %c20_i32, %13 : i32
    %15 = arith.index_cast %14 : i32 to index
    %c0_6 = arith.constant 0 : index
    %16 = vector.load %arg4[%15, %c0_6] : memref<38x32xf32, #tpu.memory_space<vmem>>, vector<1x32xf32>
    %17 = vector.extract_strided_slice %12 {offsets = [0, 0], sizes = [16, 32], strides = [1, 1]} : vector<32x32xf32> to vector<16x32xf32>
    %c1 = arith.constant 1 : index
    %18 = memref.load %arg1[%c1] : memref<2xi32, #tpu.memory_space<smem>>
    %c20_i32_7 = arith.constant 20 : i32
    %19 = arith.addi %c20_i32_7, %18 : i32
    %20 = arith.index_cast %19 : i32 to index
    %c0_8 = arith.constant 0 : index
    %21 = vector.load %arg4[%20, %c0_8] : memref<38x32xf32, #tpu.memory_space<vmem>>, vector<1x32xf32>
    %22 = vector.extract_strided_slice %12 {offsets = [16, 0], sizes = [16, 32], strides = [1, 1]} : vector<32x32xf32> to vector<16x32xf32>
    %23 = tpu.concatenate %16, %3, %17, %21, %3, %22 in 0 : vector<1x32xf32>, vector<1x32xf32>, vector<16x32xf32>, vector<1x32xf32>, vector<1x32xf32>, vector<16x32xf32> -> vector<36x32xf32>
    %24 = tpu.concatenate %1, %1 in 0 : vector<18x32xf32>, vector<18x32xf32> -> vector<36x32xf32>
    %25 = arith.addf %23, %24 : vector<36x32xf32>
    %26 = tpu.iota {dimensions = array<i32: 0>} : vector<36x36xi32>
    %27 = tpu.iota {dimensions = array<i32: 1>} : vector<36x36xi32>
    %c0_i32 = arith.constant 0 : i32
    %28 = vector.broadcast %c0_i32 : i32 to vector<36x36xi32>
    %29 = arith.cmpi sge, %26, %28 : vector<36x36xi32>
    %c18_i32 = arith.constant 18 : i32
    %30 = vector.broadcast %c18_i32 : i32 to vector<36x36xi32>
    %31 = arith.cmpi slt, %26, %30 : vector<36x36xi32>
    %32 = arith.andi %29, %31 : vector<36x36xi1>
    %c0_i32_9 = arith.constant 0 : i32
    %33 = vector.broadcast %c0_i32_9 : i32 to vector<36x36xi32>
    %34 = arith.cmpi sge, %27, %33 : vector<36x36xi32>
    %35 = arith.andi %32, %34 : vector<36x36xi1>
    %c18_i32_10 = arith.constant 18 : i32
    %36 = vector.broadcast %c18_i32_10 : i32 to vector<36x36xi32>
    %37 = arith.cmpi slt, %27, %36 : vector<36x36xi32>
    %38 = arith.andi %35, %37 : vector<36x36xi1>
    %c18_i32_11 = arith.constant 18 : i32
    %39 = vector.broadcast %c18_i32_11 : i32 to vector<36x36xi32>
    %40 = arith.cmpi sge, %26, %39 : vector<36x36xi32>
    %c36_i32 = arith.constant 36 : i32
    %41 = vector.broadcast %c36_i32 : i32 to vector<36x36xi32>
    %42 = arith.cmpi slt, %26, %41 : vector<36x36xi32>
    %43 = arith.andi %40, %42 : vector<36x36xi1>
    %c18_i32_12 = arith.constant 18 : i32
    %44 = vector.broadcast %c18_i32_12 : i32 to vector<36x36xi32>
    %45 = arith.cmpi sge, %27, %44 : vector<36x36xi32>
    %46 = arith.andi %43, %45 : vector<36x36xi1>
    %c36_i32_13 = arith.constant 36 : i32
    %47 = vector.broadcast %c36_i32_13 : i32 to vector<36x36xi32>
    %48 = arith.cmpi slt, %27, %47 : vector<36x36xi32>
    %49 = arith.andi %46, %48 : vector<36x36xi1>
    %50 = arith.ori %38, %49 : vector<36x36xi1>
    %cst_14 = arith.constant 0.000000e+00 : f32
    %cst_15 = arith.constant -1.000000e+30 : f32
    %51 = vector.broadcast %cst_14 : f32 to vector<36x36xf32>
    %52 = vector.broadcast %cst_15 : f32 to vector<36x36xf32>
    %53 = arith.select %50, %51, %52 : vector<36x36xi1>, vector<36x36xf32>
    %54 = vector.extract_strided_slice %0 {offsets = [24, 0], sizes = [1, 32], strides = [1, 1]} : vector<38x32xf32> to vector<1x32xf32>
    %55 = vector.extract_strided_slice %0 {offsets = [25, 0], sizes = [1, 32], strides = [1, 1]} : vector<38x32xf32> to vector<1x32xf32>
    %56 = vector.extract_strided_slice %0 {offsets = [26, 0], sizes = [1, 32], strides = [1, 1]} : vector<38x32xf32> to vector<1x32xf32>
    %57 = vector.extract_strided_slice %0 {offsets = [27, 0], sizes = [1, 32], strides = [1, 1]} : vector<38x32xf32> to vector<1x32xf32>
    %58 = vector.extract_strided_slice %0 {offsets = [28, 0], sizes = [1, 32], strides = [1, 1]} : vector<38x32xf32> to vector<1x32xf32>
    %59 = vector.extract_strided_slice %0 {offsets = [29, 0], sizes = [1, 32], strides = [1, 1]} : vector<38x32xf32> to vector<1x32xf32>
    %cst_16 = arith.constant dense<0.000000e+00> : vector<36xf32>
    %60 = vector.multi_reduction <add>, %25, %cst_16 [1] : vector<36x32xf32> to vector<36xf32>
    %61 = vector.shape_cast %60 : vector<36xf32> to vector<36x1xf32>
    %cst_17 = arith.constant 3.200000e+01 : f32
    %62 = vector.broadcast %cst_17 : f32 to vector<36x1xf32>
    %63 = arith.divf %61, %62 : vector<36x1xf32>
    %64 = vector.broadcast %63 : vector<36x1xf32> to vector<36x32xf32>
    %65 = arith.subf %25, %64 : vector<36x32xf32>
    %66 = arith.mulf %65, %65 : vector<36x32xf32>
    %cst_18 = arith.constant dense<0.000000e+00> : vector<36xf32>
    %67 = vector.multi_reduction <add>, %66, %cst_18 [1] : vector<36x32xf32> to vector<36xf32>
    %68 = vector.shape_cast %67 : vector<36xf32> to vector<36x1xf32>
    %cst_19 = arith.constant 3.200000e+01 : f32
    %69 = vector.broadcast %cst_19 : f32 to vector<36x1xf32>
    %70 = arith.divf %68, %69 : vector<36x1xf32>
    %71 = vector.broadcast %63 : vector<36x1xf32> to vector<36x32xf32>
    %72 = arith.subf %25, %71 : vector<36x32xf32>
    %cst_20 = arith.constant 9.99999974E-6 : f32
    %73 = vector.broadcast %cst_20 : f32 to vector<36x1xf32>
    %74 = arith.addf %70, %73 : vector<36x1xf32>
    %75 = math.rsqrt %74 : vector<36x1xf32>
    %76 = vector.broadcast %75 : vector<36x1xf32> to vector<36x32xf32>
    %77 = arith.mulf %72, %76 : vector<36x32xf32>
    %78 = vector.broadcast %54 : vector<1x32xf32> to vector<36x32xf32>
    %79 = arith.mulf %77, %78 : vector<36x32xf32>
    %80 = vector.broadcast %55 : vector<1x32xf32> to vector<36x32xf32>
    %81 = arith.addf %79, %80 : vector<36x32xf32>
    %82 = arith.truncf %81 : vector<36x32xf32> to vector<36x32xbf16>
    %c0_21 = arith.constant 0 : index
    %c0_22 = arith.constant 0 : index
    %c0_23 = arith.constant 0 : index
    %83 = vector.load %arg5[%c0_21, %c0_22, %c0_23] : memref<2x32x96xf32, #tpu.memory_space<vmem>>, vector<1x32x96xf32>
    %84 = vector.shape_cast %83 : vector<1x32x96xf32> to vector<32x96xf32>
    %85 = arith.truncf %84 : vector<32x96xf32> to vector<32x96xbf16>
    %cst_24 = arith.constant dense<0.000000e+00> : vector<36x96xf32>
    %86 = tpu.matmul %82, %85, %cst_24 {dimension_numbers = #tpu.dot_dimension_numbers<[1], [0], [0], [1], [0, 0, 1, 1], [], []>} : vector<36x32xbf16>, vector<32x96xbf16>, vector<36x96xf32> -> vector<36x96xf32>
    %87 = vector.extract_strided_slice %86 {offsets = [0, 0], sizes = [36, 8], strides = [1, 1]} : vector<36x96xf32> to vector<36x8xf32>
    %88 = vector.extract_strided_slice %86 {offsets = [0, 32], sizes = [36, 8], strides = [1, 1]} : vector<36x96xf32> to vector<36x8xf32>
    %89 = vector.extract_strided_slice %86 {offsets = [0, 64], sizes = [36, 8], strides = [1, 1]} : vector<36x96xf32> to vector<36x8xf32>
    %90 = arith.truncf %87 : vector<36x8xf32> to vector<36x8xbf16>
    %91 = arith.truncf %88 : vector<36x8xf32> to vector<36x8xbf16>
    %cst_25 = arith.constant dense<0.000000e+00> : vector<36x36xf32>
    %92 = tpu.matmul %90, %91, %cst_25 {dimension_numbers = #tpu.dot_dimension_numbers<[1], [1], [0], [0], [0, 0, 1, 0], [], []>} : vector<36x8xbf16>, vector<36x8xbf16>, vector<36x36xf32> -> vector<36x36xf32>
    %cst_26 = arith.constant 0.353553385 : f32
    %93 = vector.broadcast %cst_26 : f32 to vector<36x36xf32>
    %94 = arith.mulf %92, %93 : vector<36x36xf32>
    %95 = arith.addf %94, %53 : vector<36x36xf32>
    %cst_27 = arith.constant dense<0xFF800000> : vector<36xf32>
    %96 = vector.multi_reduction <maximumf>, %95, %cst_27 [1] : vector<36x36xf32> to vector<36xf32>
    %97 = vector.shape_cast %96 : vector<36xf32> to vector<36x1xf32>
    %98 = vector.broadcast %97 : vector<36x1xf32> to vector<36x36xf32>
    %99 = arith.subf %95, %98 : vector<36x36xf32>
    %100 = math.exp %99 : vector<36x36xf32>
    %cst_28 = arith.constant dense<0.000000e+00> : vector<36xf32>
    %101 = vector.multi_reduction <add>, %100, %cst_28 [1] : vector<36x36xf32> to vector<36xf32>
    %102 = vector.shape_cast %101 : vector<36xf32> to vector<36x1xf32>
    %103 = vector.broadcast %102 : vector<36x1xf32> to vector<36x36xf32>
    %104 = arith.divf %100, %103 : vector<36x36xf32>
    %105 = arith.truncf %104 : vector<36x36xf32> to vector<36x36xbf16>
    %106 = arith.truncf %89 : vector<36x8xf32> to vector<36x8xbf16>
    %cst_29 = arith.constant dense<0.000000e+00> : vector<36x8xf32>
    %107 = tpu.matmul %105, %106, %cst_29 {dimension_numbers = #tpu.dot_dimension_numbers<[1], [0], [0], [1], [0, 0, 1, 1], [], []>} : vector<36x36xbf16>, vector<36x8xbf16>, vector<36x8xf32> -> vector<36x8xf32>
    %108 = vector.extract_strided_slice %86 {offsets = [0, 8], sizes = [36, 8], strides = [1, 1]} : vector<36x96xf32> to vector<36x8xf32>
    %109 = vector.extract_strided_slice %86 {offsets = [0, 40], sizes = [36, 8], strides = [1, 1]} : vector<36x96xf32> to vector<36x8xf32>
    %110 = vector.extract_strided_slice %86 {offsets = [0, 72], sizes = [36, 8], strides = [1, 1]} : vector<36x96xf32> to vector<36x8xf32>
    %111 = arith.truncf %108 : vector<36x8xf32> to vector<36x8xbf16>
    %112 = arith.truncf %109 : vector<36x8xf32> to vector<36x8xbf16>
    %cst_30 = arith.constant dense<0.000000e+00> : vector<36x36xf32>
    %113 = tpu.matmul %111, %112, %cst_30 {dimension_numbers = #tpu.dot_dimension_numbers<[1], [1], [0], [0], [0, 0, 1, 0], [], []>} : vector<36x8xbf16>, vector<36x8xbf16>, vector<36x36xf32> -> vector<36x36xf32>
    %cst_31 = arith.constant 0.353553385 : f32
    %114 = vector.broadcast %cst_31 : f32 to vector<36x36xf32>
    %115 = arith.mulf %113, %114 : vector<36x36xf32>
    %116 = arith.addf %115, %53 : vector<36x36xf32>
    %cst_32 = arith.constant dense<0xFF800000> : vector<36xf32>
    %117 = vector.multi_reduction <maximumf>, %116, %cst_32 [1] : vector<36x36xf32> to vector<36xf32>
    %118 = vector.shape_cast %117 : vector<36xf32> to vector<36x1xf32>
    %119 = vector.broadcast %118 : vector<36x1xf32> to vector<36x36xf32>
    %120 = arith.subf %116, %119 : vector<36x36xf32>
    %121 = math.exp %120 : vector<36x36xf32>
    %cst_33 = arith.constant dense<0.000000e+00> : vector<36xf32>
    %122 = vector.multi_reduction <add>, %121, %cst_33 [1] : vector<36x36xf32> to vector<36xf32>
    %123 = vector.shape_cast %122 : vector<36xf32> to vector<36x1xf32>
    %124 = vector.broadcast %123 : vector<36x1xf32> to vector<36x36xf32>
    %125 = arith.divf %121, %124 : vector<36x36xf32>
    %126 = arith.truncf %125 : vector<36x36xf32> to vector<36x36xbf16>
    %127 = arith.truncf %110 : vector<36x8xf32> to vector<36x8xbf16>
    %cst_34 = arith.constant dense<0.000000e+00> : vector<36x8xf32>
    %128 = tpu.matmul %126, %127, %cst_34 {dimension_numbers = #tpu.dot_dimension_numbers<[1], [0], [0], [1], [0, 0, 1, 1], [], []>} : vector<36x36xbf16>, vector<36x8xbf16>, vector<36x8xf32> -> vector<36x8xf32>
    %129 = vector.extract_strided_slice %86 {offsets = [0, 16], sizes = [36, 8], strides = [1, 1]} : vector<36x96xf32> to vector<36x8xf32>
    %130 = vector.extract_strided_slice %86 {offsets = [0, 48], sizes = [36, 8], strides = [1, 1]} : vector<36x96xf32> to vector<36x8xf32>
    %131 = vector.extract_strided_slice %86 {offsets = [0, 80], sizes = [36, 8], strides = [1, 1]} : vector<36x96xf32> to vector<36x8xf32>
    %132 = arith.truncf %129 : vector<36x8xf32> to vector<36x8xbf16>
    %133 = arith.truncf %130 : vector<36x8xf32> to vector<36x8xbf16>
    %cst_35 = arith.constant dense<0.000000e+00> : vector<36x36xf32>
    %134 = tpu.matmul %132, %133, %cst_35 {dimension_numbers = #tpu.dot_dimension_numbers<[1], [1], [0], [0], [0, 0, 1, 0], [], []>} : vector<36x8xbf16>, vector<36x8xbf16>, vector<36x36xf32> -> vector<36x36xf32>
    %cst_36 = arith.constant 0.353553385 : f32
    %135 = vector.broadcast %cst_36 : f32 to vector<36x36xf32>
    %136 = arith.mulf %134, %135 : vector<36x36xf32>
    %137 = arith.addf %136, %53 : vector<36x36xf32>
    %cst_37 = arith.constant dense<0xFF800000> : vector<36xf32>
    %138 = vector.multi_reduction <maximumf>, %137, %cst_37 [1] : vector<36x36xf32> to vector<36xf32>
    %139 = vector.shape_cast %138 : vector<36xf32> to vector<36x1xf32>
    %140 = vector.broadcast %139 : vector<36x1xf32> to vector<36x36xf32>
    %141 = arith.subf %137, %140 : vector<36x36xf32>
    %142 = math.exp %141 : vector<36x36xf32>
    %cst_38 = arith.constant dense<0.000000e+00> : vector<36xf32>
    %143 = vector.multi_reduction <add>, %142, %cst_38 [1] : vector<36x36xf32> to vector<36xf32>
    %144 = vector.shape_cast %143 : vector<36xf32> to vector<36x1xf32>
    %145 = vector.broadcast %144 : vector<36x1xf32> to vector<36x36xf32>
    %146 = arith.divf %142, %145 : vector<36x36xf32>
    %147 = arith.truncf %146 : vector<36x36xf32> to vector<36x36xbf16>
    %148 = arith.truncf %131 : vector<36x8xf32> to vector<36x8xbf16>
    %cst_39 = arith.constant dense<0.000000e+00> : vector<36x8xf32>
    %149 = tpu.matmul %147, %148, %cst_39 {dimension_numbers = #tpu.dot_dimension_numbers<[1], [0], [0], [1], [0, 0, 1, 1], [], []>} : vector<36x36xbf16>, vector<36x8xbf16>, vector<36x8xf32> -> vector<36x8xf32>
    %150 = vector.extract_strided_slice %86 {offsets = [0, 24], sizes = [36, 8], strides = [1, 1]} : vector<36x96xf32> to vector<36x8xf32>
    %151 = vector.extract_strided_slice %86 {offsets = [0, 56], sizes = [36, 8], strides = [1, 1]} : vector<36x96xf32> to vector<36x8xf32>
    %152 = vector.extract_strided_slice %86 {offsets = [0, 88], sizes = [36, 8], strides = [1, 1]} : vector<36x96xf32> to vector<36x8xf32>
    %153 = arith.truncf %150 : vector<36x8xf32> to vector<36x8xbf16>
    %154 = arith.truncf %151 : vector<36x8xf32> to vector<36x8xbf16>
    %cst_40 = arith.constant dense<0.000000e+00> : vector<36x36xf32>
    %155 = tpu.matmul %153, %154, %cst_40 {dimension_numbers = #tpu.dot_dimension_numbers<[1], [1], [0], [0], [0, 0, 1, 0], [], []>} : vector<36x8xbf16>, vector<36x8xbf16>, vector<36x36xf32> -> vector<36x36xf32>
    %cst_41 = arith.constant 0.353553385 : f32
    %156 = vector.broadcast %cst_41 : f32 to vector<36x36xf32>
    %157 = arith.mulf %155, %156 : vector<36x36xf32>
    %158 = arith.addf %157, %53 : vector<36x36xf32>
    %cst_42 = arith.constant dense<0xFF800000> : vector<36xf32>
    %159 = vector.multi_reduction <maximumf>, %158, %cst_42 [1] : vector<36x36xf32> to vector<36xf32>
    %160 = vector.shape_cast %159 : vector<36xf32> to vector<36x1xf32>
    %161 = vector.broadcast %160 : vector<36x1xf32> to vector<36x36xf32>
    %162 = arith.subf %158, %161 : vector<36x36xf32>
    %163 = math.exp %162 : vector<36x36xf32>
    %cst_43 = arith.constant dense<0.000000e+00> : vector<36xf32>
    %164 = vector.multi_reduction <add>, %163, %cst_43 [1] : vector<36x36xf32> to vector<36xf32>
    %165 = vector.shape_cast %164 : vector<36xf32> to vector<36x1xf32>
    %166 = vector.broadcast %165 : vector<36x1xf32> to vector<36x36xf32>
    %167 = arith.divf %163, %166 : vector<36x36xf32>
    %168 = arith.truncf %167 : vector<36x36xf32> to vector<36x36xbf16>
    %169 = arith.truncf %152 : vector<36x8xf32> to vector<36x8xbf16>
    %cst_44 = arith.constant dense<0.000000e+00> : vector<36x8xf32>
    %170 = tpu.matmul %168, %169, %cst_44 {dimension_numbers = #tpu.dot_dimension_numbers<[1], [0], [0], [1], [0, 0, 1, 1], [], []>} : vector<36x36xbf16>, vector<36x8xbf16>, vector<36x8xf32> -> vector<36x8xf32>
    %171 = tpu.concatenate %107, %128, %149, %170 in 1 : vector<36x8xf32>, vector<36x8xf32>, vector<36x8xf32>, vector<36x8xf32> -> vector<36x32xf32>
    %172 = arith.truncf %171 : vector<36x32xf32> to vector<36x32xbf16>
    %c0_45 = arith.constant 0 : index
    %c0_46 = arith.constant 0 : index
    %c0_47 = arith.constant 0 : index
    %173 = vector.load %arg6[%c0_45, %c0_46, %c0_47] : memref<2x32x32xf32, #tpu.memory_space<vmem>>, vector<1x32x32xf32>
    %174 = vector.shape_cast %173 : vector<1x32x32xf32> to vector<32x32xf32>
    %175 = arith.truncf %174 : vector<32x32xf32> to vector<32x32xbf16>
    %cst_48 = arith.constant dense<0.000000e+00> : vector<36x32xf32>
    %176 = tpu.matmul %172, %175, %cst_48 {dimension_numbers = #tpu.dot_dimension_numbers<[1], [0], [0], [1], [0, 0, 1, 1], [], []>} : vector<36x32xbf16>, vector<32x32xbf16>, vector<36x32xf32> -> vector<36x32xf32>
    %177 = arith.addf %25, %176 : vector<36x32xf32>
    %178 = vector.broadcast %56 : vector<1x32xf32> to vector<36x32xf32>
    %179 = arith.addf %177, %178 : vector<36x32xf32>
    %cst_49 = arith.constant dense<0.000000e+00> : vector<36xf32>
    %180 = vector.multi_reduction <add>, %179, %cst_49 [1] : vector<36x32xf32> to vector<36xf32>
    %181 = vector.shape_cast %180 : vector<36xf32> to vector<36x1xf32>
    %cst_50 = arith.constant 3.200000e+01 : f32
    %182 = vector.broadcast %cst_50 : f32 to vector<36x1xf32>
    %183 = arith.divf %181, %182 : vector<36x1xf32>
    %184 = vector.broadcast %183 : vector<36x1xf32> to vector<36x32xf32>
    %185 = arith.subf %179, %184 : vector<36x32xf32>
    %186 = arith.mulf %185, %185 : vector<36x32xf32>
    %cst_51 = arith.constant dense<0.000000e+00> : vector<36xf32>
    %187 = vector.multi_reduction <add>, %186, %cst_51 [1] : vector<36x32xf32> to vector<36xf32>
    %188 = vector.shape_cast %187 : vector<36xf32> to vector<36x1xf32>
    %cst_52 = arith.constant 3.200000e+01 : f32
    %189 = vector.broadcast %cst_52 : f32 to vector<36x1xf32>
    %190 = arith.divf %188, %189 : vector<36x1xf32>
    %191 = vector.broadcast %183 : vector<36x1xf32> to vector<36x32xf32>
    %192 = arith.subf %179, %191 : vector<36x32xf32>
    %cst_53 = arith.constant 9.99999974E-6 : f32
    %193 = vector.broadcast %cst_53 : f32 to vector<36x1xf32>
    %194 = arith.addf %190, %193 : vector<36x1xf32>
    %195 = math.rsqrt %194 : vector<36x1xf32>
    %196 = vector.broadcast %195 : vector<36x1xf32> to vector<36x32xf32>
    %197 = arith.mulf %192, %196 : vector<36x32xf32>
    %198 = vector.broadcast %57 : vector<1x32xf32> to vector<36x32xf32>
    %199 = arith.mulf %197, %198 : vector<36x32xf32>
    %200 = vector.broadcast %58 : vector<1x32xf32> to vector<36x32xf32>
    %201 = arith.addf %199, %200 : vector<36x32xf32>
    %c0_54 = arith.constant 0 : index
    %c0_55 = arith.constant 0 : index
    %c0_56 = arith.constant 0 : index
    %202 = vector.load %arg7[%c0_54, %c0_55, %c0_56] : memref<2x33x64xf32, #tpu.memory_space<vmem>>, vector<1x33x64xf32>
    %203 = vector.shape_cast %202 : vector<1x33x64xf32> to vector<33x64xf32>
    %204 = arith.truncf %201 : vector<36x32xf32> to vector<36x32xbf16>
    %205 = vector.extract_strided_slice %203 {offsets = [0, 0], sizes = [32, 64], strides = [1, 1]} : vector<33x64xf32> to vector<32x64xf32>
    %206 = arith.truncf %205 : vector<32x64xf32> to vector<32x64xbf16>
    %cst_57 = arith.constant dense<0.000000e+00> : vector<36x64xf32>
    %207 = tpu.matmul %204, %206, %cst_57 {dimension_numbers = #tpu.dot_dimension_numbers<[1], [0], [0], [1], [0, 0, 1, 1], [], []>} : vector<36x32xbf16>, vector<32x64xbf16>, vector<36x64xf32> -> vector<36x64xf32>
    %208 = vector.extract_strided_slice %203 {offsets = [32, 0], sizes = [1, 64], strides = [1, 1]} : vector<33x64xf32> to vector<1x64xf32>
    %209 = vector.broadcast %208 : vector<1x64xf32> to vector<36x64xf32>
    %210 = arith.addf %207, %209 : vector<36x64xf32>
    %cst_58 = arith.constant 5.000000e-01 : f32
    %211 = vector.broadcast %cst_58 : f32 to vector<36x64xf32>
    %212 = arith.mulf %211, %210 : vector<36x64xf32>
    %cst_59 = arith.constant 0.707106769 : f32
    %213 = vector.broadcast %cst_59 : f32 to vector<36x64xf32>
    %214 = arith.mulf %210, %213 : vector<36x64xf32>
    %cst_60 = arith.constant -4.000000e+00 : f32
    %cst_61 = arith.constant 4.000000e+00 : f32
    %215 = vector.broadcast %cst_60 : f32 to vector<36x64xf32>
    %216 = arith.maximumf %215, %214 : vector<36x64xf32>
    %217 = vector.broadcast %cst_61 : f32 to vector<36x64xf32>
    %218 = arith.minimumf %217, %216 : vector<36x64xf32>
    %219 = arith.mulf %218, %218 : vector<36x64xf32>
    %cst_62 = arith.constant -2.72614237E-10 : f32
    %220 = vector.broadcast %cst_62 : f32 to vector<36x64xf32>
    %221 = arith.mulf %220, %219 : vector<36x64xf32>
    %cst_63 = arith.constant 2.77068146E-8 : f32
    %222 = vector.broadcast %cst_63 : f32 to vector<36x64xf32>
    %223 = arith.addf %221, %222 : vector<36x64xf32>
    %224 = arith.mulf %223, %219 : vector<36x64xf32>
    %cst_64 = arith.constant -2.10102394E-6 : f32
    %225 = vector.broadcast %cst_64 : f32 to vector<36x64xf32>
    %226 = arith.addf %224, %225 : vector<36x64xf32>
    %227 = arith.mulf %226, %219 : vector<36x64xf32>
    %cst_65 = arith.constant -5.69250624E-5 : f32
    %228 = vector.broadcast %cst_65 : f32 to vector<36x64xf32>
    %229 = arith.addf %227, %228 : vector<36x64xf32>
    %230 = arith.mulf %229, %219 : vector<36x64xf32>
    %cst_66 = arith.constant -7.34990637E-4 : f32
    %231 = vector.broadcast %cst_66 : f32 to vector<36x64xf32>
    %232 = arith.addf %230, %231 : vector<36x64xf32>
    %233 = arith.mulf %232, %219 : vector<36x64xf32>
    %cst_67 = arith.constant -2.954600e-03 : f32
    %234 = vector.broadcast %cst_67 : f32 to vector<36x64xf32>
    %235 = arith.addf %233, %234 : vector<36x64xf32>
    %236 = arith.mulf %235, %219 : vector<36x64xf32>
    %cst_68 = arith.constant -0.0160960332 : f32
    %237 = vector.broadcast %cst_68 : f32 to vector<36x64xf32>
    %238 = arith.addf %236, %237 : vector<36x64xf32>
    %239 = arith.mulf %238, %218 : vector<36x64xf32>
    %cst_69 = arith.constant -1.45660715E-5 : f32
    %240 = vector.broadcast %cst_69 : f32 to vector<36x64xf32>
    %241 = arith.mulf %240, %219 : vector<36x64xf32>
    %cst_70 = arith.constant -2.13374049E-4 : f32
    %242 = vector.broadcast %cst_70 : f32 to vector<36x64xf32>
    %243 = arith.addf %241, %242 : vector<36x64xf32>
    %244 = arith.mulf %243, %219 : vector<36x64xf32>
    %cst_71 = arith.constant -0.00168282702 : f32
    %245 = vector.broadcast %cst_71 : f32 to vector<36x64xf32>
    %246 = arith.addf %244, %245 : vector<36x64xf32>
    %247 = arith.mulf %246, %219 : vector<36x64xf32>
    %cst_72 = arith.constant -0.00737332925 : f32
    %248 = vector.broadcast %cst_72 : f32 to vector<36x64xf32>
    %249 = arith.addf %247, %248 : vector<36x64xf32>
    %250 = arith.mulf %249, %219 : vector<36x64xf32>
    %cst_73 = arith.constant -0.0142647391 : f32
    %251 = vector.broadcast %cst_73 : f32 to vector<36x64xf32>
    %252 = arith.addf %250, %251 : vector<36x64xf32>
    %253 = arith.divf %239, %252 : vector<36x64xf32>
    %cst_74 = arith.constant 1.000000e+00 : f32
    %254 = vector.broadcast %cst_74 : f32 to vector<36x64xf32>
    %255 = arith.addf %254, %253 : vector<36x64xf32>
    %256 = arith.mulf %212, %255 : vector<36x64xf32>
    %257 = arith.truncf %256 : vector<36x64xf32> to vector<36x64xbf16>
    %c0_75 = arith.constant 0 : index
    %c0_76 = arith.constant 0 : index
    %c0_77 = arith.constant 0 : index
    %258 = vector.load %arg8[%c0_75, %c0_76, %c0_77] : memref<2x64x32xf32, #tpu.memory_space<vmem>>, vector<1x64x32xf32>
    %259 = vector.shape_cast %258 : vector<1x64x32xf32> to vector<64x32xf32>
    %260 = arith.truncf %259 : vector<64x32xf32> to vector<64x32xbf16>
    %cst_78 = arith.constant dense<0.000000e+00> : vector<36x32xf32>
    %261 = tpu.matmul %257, %260, %cst_78 {dimension_numbers = #tpu.dot_dimension_numbers<[1], [0], [0], [1], [0, 0, 1, 1], [], []>} : vector<36x64xbf16>, vector<64x32xbf16>, vector<36x32xf32> -> vector<36x32xf32>
    %262 = arith.addf %179, %261 : vector<36x32xf32>
    %263 = vector.broadcast %59 : vector<1x32xf32> to vector<36x32xf32>
    %264 = arith.addf %262, %263 : vector<36x32xf32>
    %265 = vector.extract_strided_slice %0 {offsets = [30, 0], sizes = [1, 32], strides = [1, 1]} : vector<38x32xf32> to vector<1x32xf32>
    %266 = vector.extract_strided_slice %0 {offsets = [31, 0], sizes = [1, 32], strides = [1, 1]} : vector<38x32xf32> to vector<1x32xf32>
    %267 = vector.extract_strided_slice %0 {offsets = [32, 0], sizes = [1, 32], strides = [1, 1]} : vector<38x32xf32> to vector<1x32xf32>
    %268 = vector.extract_strided_slice %0 {offsets = [33, 0], sizes = [1, 32], strides = [1, 1]} : vector<38x32xf32> to vector<1x32xf32>
    %269 = vector.extract_strided_slice %0 {offsets = [34, 0], sizes = [1, 32], strides = [1, 1]} : vector<38x32xf32> to vector<1x32xf32>
    %270 = vector.extract_strided_slice %0 {offsets = [35, 0], sizes = [1, 32], strides = [1, 1]} : vector<38x32xf32> to vector<1x32xf32>
    %cst_79 = arith.constant dense<0.000000e+00> : vector<36xf32>
    %271 = vector.multi_reduction <add>, %264, %cst_79 [1] : vector<36x32xf32> to vector<36xf32>
    %272 = vector.shape_cast %271 : vector<36xf32> to vector<36x1xf32>
    %cst_80 = arith.constant 3.200000e+01 : f32
    %273 = vector.broadcast %cst_80 : f32 to vector<36x1xf32>
    %274 = arith.divf %272, %273 : vector<36x1xf32>
    %275 = vector.broadcast %274 : vector<36x1xf32> to vector<36x32xf32>
    %276 = arith.subf %264, %275 : vector<36x32xf32>
    %277 = arith.mulf %276, %276 : vector<36x32xf32>
    %cst_81 = arith.constant dense<0.000000e+00> : vector<36xf32>
    %278 = vector.multi_reduction <add>, %277, %cst_81 [1] : vector<36x32xf32> to vector<36xf32>
    %279 = vector.shape_cast %278 : vector<36xf32> to vector<36x1xf32>
    %cst_82 = arith.constant 3.200000e+01 : f32
    %280 = vector.broadcast %cst_82 : f32 to vector<36x1xf32>
    %281 = arith.divf %279, %280 : vector<36x1xf32>
    %282 = vector.broadcast %274 : vector<36x1xf32> to vector<36x32xf32>
    %283 = arith.subf %264, %282 : vector<36x32xf32>
    %cst_83 = arith.constant 9.99999974E-6 : f32
    %284 = vector.broadcast %cst_83 : f32 to vector<36x1xf32>
    %285 = arith.addf %281, %284 : vector<36x1xf32>
    %286 = math.rsqrt %285 : vector<36x1xf32>
    %287 = vector.broadcast %286 : vector<36x1xf32> to vector<36x32xf32>
    %288 = arith.mulf %283, %287 : vector<36x32xf32>
    %289 = vector.broadcast %265 : vector<1x32xf32> to vector<36x32xf32>
    %290 = arith.mulf %288, %289 : vector<36x32xf32>
    %291 = vector.broadcast %266 : vector<1x32xf32> to vector<36x32xf32>
    %292 = arith.addf %290, %291 : vector<36x32xf32>
    %293 = arith.truncf %292 : vector<36x32xf32> to vector<36x32xbf16>
    %c1_84 = arith.constant 1 : index
    %c0_85 = arith.constant 0 : index
    %c0_86 = arith.constant 0 : index
    %294 = vector.load %arg5[%c1_84, %c0_85, %c0_86] : memref<2x32x96xf32, #tpu.memory_space<vmem>>, vector<1x32x96xf32>
    %295 = vector.shape_cast %294 : vector<1x32x96xf32> to vector<32x96xf32>
    %296 = arith.truncf %295 : vector<32x96xf32> to vector<32x96xbf16>
    %cst_87 = arith.constant dense<0.000000e+00> : vector<36x96xf32>
    %297 = tpu.matmul %293, %296, %cst_87 {dimension_numbers = #tpu.dot_dimension_numbers<[1], [0], [0], [1], [0, 0, 1, 1], [], []>} : vector<36x32xbf16>, vector<32x96xbf16>, vector<36x96xf32> -> vector<36x96xf32>
    %298 = vector.extract_strided_slice %297 {offsets = [0, 0], sizes = [36, 8], strides = [1, 1]} : vector<36x96xf32> to vector<36x8xf32>
    %299 = vector.extract_strided_slice %297 {offsets = [0, 32], sizes = [36, 8], strides = [1, 1]} : vector<36x96xf32> to vector<36x8xf32>
    %300 = vector.extract_strided_slice %297 {offsets = [0, 64], sizes = [36, 8], strides = [1, 1]} : vector<36x96xf32> to vector<36x8xf32>
    %301 = arith.truncf %298 : vector<36x8xf32> to vector<36x8xbf16>
    %302 = arith.truncf %299 : vector<36x8xf32> to vector<36x8xbf16>
    %cst_88 = arith.constant dense<0.000000e+00> : vector<36x36xf32>
    %303 = tpu.matmul %301, %302, %cst_88 {dimension_numbers = #tpu.dot_dimension_numbers<[1], [1], [0], [0], [0, 0, 1, 0], [], []>} : vector<36x8xbf16>, vector<36x8xbf16>, vector<36x36xf32> -> vector<36x36xf32>
    %cst_89 = arith.constant 0.353553385 : f32
    %304 = vector.broadcast %cst_89 : f32 to vector<36x36xf32>
    %305 = arith.mulf %303, %304 : vector<36x36xf32>
    %306 = arith.addf %305, %53 : vector<36x36xf32>
    %cst_90 = arith.constant dense<0xFF800000> : vector<36xf32>
    %307 = vector.multi_reduction <maximumf>, %306, %cst_90 [1] : vector<36x36xf32> to vector<36xf32>
    %308 = vector.shape_cast %307 : vector<36xf32> to vector<36x1xf32>
    %309 = vector.broadcast %308 : vector<36x1xf32> to vector<36x36xf32>
    %310 = arith.subf %306, %309 : vector<36x36xf32>
    %311 = math.exp %310 : vector<36x36xf32>
    %cst_91 = arith.constant dense<0.000000e+00> : vector<36xf32>
    %312 = vector.multi_reduction <add>, %311, %cst_91 [1] : vector<36x36xf32> to vector<36xf32>
    %313 = vector.shape_cast %312 : vector<36xf32> to vector<36x1xf32>
    %314 = vector.broadcast %313 : vector<36x1xf32> to vector<36x36xf32>
    %315 = arith.divf %311, %314 : vector<36x36xf32>
    %316 = arith.truncf %315 : vector<36x36xf32> to vector<36x36xbf16>
    %317 = arith.truncf %300 : vector<36x8xf32> to vector<36x8xbf16>
    %cst_92 = arith.constant dense<0.000000e+00> : vector<36x8xf32>
    %318 = tpu.matmul %316, %317, %cst_92 {dimension_numbers = #tpu.dot_dimension_numbers<[1], [0], [0], [1], [0, 0, 1, 1], [], []>} : vector<36x36xbf16>, vector<36x8xbf16>, vector<36x8xf32> -> vector<36x8xf32>
    %319 = vector.extract_strided_slice %297 {offsets = [0, 8], sizes = [36, 8], strides = [1, 1]} : vector<36x96xf32> to vector<36x8xf32>
    %320 = vector.extract_strided_slice %297 {offsets = [0, 40], sizes = [36, 8], strides = [1, 1]} : vector<36x96xf32> to vector<36x8xf32>
    %321 = vector.extract_strided_slice %297 {offsets = [0, 72], sizes = [36, 8], strides = [1, 1]} : vector<36x96xf32> to vector<36x8xf32>
    %322 = arith.truncf %319 : vector<36x8xf32> to vector<36x8xbf16>
    %323 = arith.truncf %320 : vector<36x8xf32> to vector<36x8xbf16>
    %cst_93 = arith.constant dense<0.000000e+00> : vector<36x36xf32>
    %324 = tpu.matmul %322, %323, %cst_93 {dimension_numbers = #tpu.dot_dimension_numbers<[1], [1], [0], [0], [0, 0, 1, 0], [], []>} : vector<36x8xbf16>, vector<36x8xbf16>, vector<36x36xf32> -> vector<36x36xf32>
    %cst_94 = arith.constant 0.353553385 : f32
    %325 = vector.broadcast %cst_94 : f32 to vector<36x36xf32>
    %326 = arith.mulf %324, %325 : vector<36x36xf32>
    %327 = arith.addf %326, %53 : vector<36x36xf32>
    %cst_95 = arith.constant dense<0xFF800000> : vector<36xf32>
    %328 = vector.multi_reduction <maximumf>, %327, %cst_95 [1] : vector<36x36xf32> to vector<36xf32>
    %329 = vector.shape_cast %328 : vector<36xf32> to vector<36x1xf32>
    %330 = vector.broadcast %329 : vector<36x1xf32> to vector<36x36xf32>
    %331 = arith.subf %327, %330 : vector<36x36xf32>
    %332 = math.exp %331 : vector<36x36xf32>
    %cst_96 = arith.constant dense<0.000000e+00> : vector<36xf32>
    %333 = vector.multi_reduction <add>, %332, %cst_96 [1] : vector<36x36xf32> to vector<36xf32>
    %334 = vector.shape_cast %333 : vector<36xf32> to vector<36x1xf32>
    %335 = vector.broadcast %334 : vector<36x1xf32> to vector<36x36xf32>
    %336 = arith.divf %332, %335 : vector<36x36xf32>
    %337 = arith.truncf %336 : vector<36x36xf32> to vector<36x36xbf16>
    %338 = arith.truncf %321 : vector<36x8xf32> to vector<36x8xbf16>
    %cst_97 = arith.constant dense<0.000000e+00> : vector<36x8xf32>
    %339 = tpu.matmul %337, %338, %cst_97 {dimension_numbers = #tpu.dot_dimension_numbers<[1], [0], [0], [1], [0, 0, 1, 1], [], []>} : vector<36x36xbf16>, vector<36x8xbf16>, vector<36x8xf32> -> vector<36x8xf32>
    %340 = vector.extract_strided_slice %297 {offsets = [0, 16], sizes = [36, 8], strides = [1, 1]} : vector<36x96xf32> to vector<36x8xf32>
    %341 = vector.extract_strided_slice %297 {offsets = [0, 48], sizes = [36, 8], strides = [1, 1]} : vector<36x96xf32> to vector<36x8xf32>
    %342 = vector.extract_strided_slice %297 {offsets = [0, 80], sizes = [36, 8], strides = [1, 1]} : vector<36x96xf32> to vector<36x8xf32>
    %343 = arith.truncf %340 : vector<36x8xf32> to vector<36x8xbf16>
    %344 = arith.truncf %341 : vector<36x8xf32> to vector<36x8xbf16>
    %cst_98 = arith.constant dense<0.000000e+00> : vector<36x36xf32>
    %345 = tpu.matmul %343, %344, %cst_98 {dimension_numbers = #tpu.dot_dimension_numbers<[1], [1], [0], [0], [0, 0, 1, 0], [], []>} : vector<36x8xbf16>, vector<36x8xbf16>, vector<36x36xf32> -> vector<36x36xf32>
    %cst_99 = arith.constant 0.353553385 : f32
    %346 = vector.broadcast %cst_99 : f32 to vector<36x36xf32>
    %347 = arith.mulf %345, %346 : vector<36x36xf32>
    %348 = arith.addf %347, %53 : vector<36x36xf32>
    %cst_100 = arith.constant dense<0xFF800000> : vector<36xf32>
    %349 = vector.multi_reduction <maximumf>, %348, %cst_100 [1] : vector<36x36xf32> to vector<36xf32>
    %350 = vector.shape_cast %349 : vector<36xf32> to vector<36x1xf32>
    %351 = vector.broadcast %350 : vector<36x1xf32> to vector<36x36xf32>
    %352 = arith.subf %348, %351 : vector<36x36xf32>
    %353 = math.exp %352 : vector<36x36xf32>
    %cst_101 = arith.constant dense<0.000000e+00> : vector<36xf32>
    %354 = vector.multi_reduction <add>, %353, %cst_101 [1] : vector<36x36xf32> to vector<36xf32>
    %355 = vector.shape_cast %354 : vector<36xf32> to vector<36x1xf32>
    %356 = vector.broadcast %355 : vector<36x1xf32> to vector<36x36xf32>
    %357 = arith.divf %353, %356 : vector<36x36xf32>
    %358 = arith.truncf %357 : vector<36x36xf32> to vector<36x36xbf16>
    %359 = arith.truncf %342 : vector<36x8xf32> to vector<36x8xbf16>
    %cst_102 = arith.constant dense<0.000000e+00> : vector<36x8xf32>
    %360 = tpu.matmul %358, %359, %cst_102 {dimension_numbers = #tpu.dot_dimension_numbers<[1], [0], [0], [1], [0, 0, 1, 1], [], []>} : vector<36x36xbf16>, vector<36x8xbf16>, vector<36x8xf32> -> vector<36x8xf32>
    %361 = vector.extract_strided_slice %297 {offsets = [0, 24], sizes = [36, 8], strides = [1, 1]} : vector<36x96xf32> to vector<36x8xf32>
    %362 = vector.extract_strided_slice %297 {offsets = [0, 56], sizes = [36, 8], strides = [1, 1]} : vector<36x96xf32> to vector<36x8xf32>
    %363 = vector.extract_strided_slice %297 {offsets = [0, 88], sizes = [36, 8], strides = [1, 1]} : vector<36x96xf32> to vector<36x8xf32>
    %364 = arith.truncf %361 : vector<36x8xf32> to vector<36x8xbf16>
    %365 = arith.truncf %362 : vector<36x8xf32> to vector<36x8xbf16>
    %cst_103 = arith.constant dense<0.000000e+00> : vector<36x36xf32>
    %366 = tpu.matmul %364, %365, %cst_103 {dimension_numbers = #tpu.dot_dimension_numbers<[1], [1], [0], [0], [0, 0, 1, 0], [], []>} : vector<36x8xbf16>, vector<36x8xbf16>, vector<36x36xf32> -> vector<36x36xf32>
    %cst_104 = arith.constant 0.353553385 : f32
    %367 = vector.broadcast %cst_104 : f32 to vector<36x36xf32>
    %368 = arith.mulf %366, %367 : vector<36x36xf32>
    %369 = arith.addf %368, %53 : vector<36x36xf32>
    %cst_105 = arith.constant dense<0xFF800000> : vector<36xf32>
    %370 = vector.multi_reduction <maximumf>, %369, %cst_105 [1] : vector<36x36xf32> to vector<36xf32>
    %371 = vector.shape_cast %370 : vector<36xf32> to vector<36x1xf32>
    %372 = vector.broadcast %371 : vector<36x1xf32> to vector<36x36xf32>
    %373 = arith.subf %369, %372 : vector<36x36xf32>
    %374 = math.exp %373 : vector<36x36xf32>
    %cst_106 = arith.constant dense<0.000000e+00> : vector<36xf32>
    %375 = vector.multi_reduction <add>, %374, %cst_106 [1] : vector<36x36xf32> to vector<36xf32>
    %376 = vector.shape_cast %375 : vector<36xf32> to vector<36x1xf32>
    %377 = vector.broadcast %376 : vector<36x1xf32> to vector<36x36xf32>
    %378 = arith.divf %374, %377 : vector<36x36xf32>
    %379 = arith.truncf %378 : vector<36x36xf32> to vector<36x36xbf16>
    %380 = arith.truncf %363 : vector<36x8xf32> to vector<36x8xbf16>
    %cst_107 = arith.constant dense<0.000000e+00> : vector<36x8xf32>
    %381 = tpu.matmul %379, %380, %cst_107 {dimension_numbers = #tpu.dot_dimension_numbers<[1], [0], [0], [1], [0, 0, 1, 1], [], []>} : vector<36x36xbf16>, vector<36x8xbf16>, vector<36x8xf32> -> vector<36x8xf32>
    %382 = tpu.concatenate %318, %339, %360, %381 in 1 : vector<36x8xf32>, vector<36x8xf32>, vector<36x8xf32>, vector<36x8xf32> -> vector<36x32xf32>
    %383 = arith.truncf %382 : vector<36x32xf32> to vector<36x32xbf16>
    %c1_108 = arith.constant 1 : index
    %c0_109 = arith.constant 0 : index
    %c0_110 = arith.constant 0 : index
    %384 = vector.load %arg6[%c1_108, %c0_109, %c0_110] : memref<2x32x32xf32, #tpu.memory_space<vmem>>, vector<1x32x32xf32>
    %385 = vector.shape_cast %384 : vector<1x32x32xf32> to vector<32x32xf32>
    %386 = arith.truncf %385 : vector<32x32xf32> to vector<32x32xbf16>
    %cst_111 = arith.constant dense<0.000000e+00> : vector<36x32xf32>
    %387 = tpu.matmul %383, %386, %cst_111 {dimension_numbers = #tpu.dot_dimension_numbers<[1], [0], [0], [1], [0, 0, 1, 1], [], []>} : vector<36x32xbf16>, vector<32x32xbf16>, vector<36x32xf32> -> vector<36x32xf32>
    %388 = arith.addf %264, %387 : vector<36x32xf32>
    %389 = vector.broadcast %267 : vector<1x32xf32> to vector<36x32xf32>
    %390 = arith.addf %388, %389 : vector<36x32xf32>
    %cst_112 = arith.constant dense<0.000000e+00> : vector<36xf32>
    %391 = vector.multi_reduction <add>, %390, %cst_112 [1] : vector<36x32xf32> to vector<36xf32>
    %392 = vector.shape_cast %391 : vector<36xf32> to vector<36x1xf32>
    %cst_113 = arith.constant 3.200000e+01 : f32
    %393 = vector.broadcast %cst_113 : f32 to vector<36x1xf32>
    %394 = arith.divf %392, %393 : vector<36x1xf32>
    %395 = vector.broadcast %394 : vector<36x1xf32> to vector<36x32xf32>
    %396 = arith.subf %390, %395 : vector<36x32xf32>
    %397 = arith.mulf %396, %396 : vector<36x32xf32>
    %cst_114 = arith.constant dense<0.000000e+00> : vector<36xf32>
    %398 = vector.multi_reduction <add>, %397, %cst_114 [1] : vector<36x32xf32> to vector<36xf32>
    %399 = vector.shape_cast %398 : vector<36xf32> to vector<36x1xf32>
    %cst_115 = arith.constant 3.200000e+01 : f32
    %400 = vector.broadcast %cst_115 : f32 to vector<36x1xf32>
    %401 = arith.divf %399, %400 : vector<36x1xf32>
    %402 = vector.broadcast %394 : vector<36x1xf32> to vector<36x32xf32>
    %403 = arith.subf %390, %402 : vector<36x32xf32>
    %cst_116 = arith.constant 9.99999974E-6 : f32
    %404 = vector.broadcast %cst_116 : f32 to vector<36x1xf32>
    %405 = arith.addf %401, %404 : vector<36x1xf32>
    %406 = math.rsqrt %405 : vector<36x1xf32>
    %407 = vector.broadcast %406 : vector<36x1xf32> to vector<36x32xf32>
    %408 = arith.mulf %403, %407 : vector<36x32xf32>
    %409 = vector.broadcast %268 : vector<1x32xf32> to vector<36x32xf32>
    %410 = arith.mulf %408, %409 : vector<36x32xf32>
    %411 = vector.broadcast %269 : vector<1x32xf32> to vector<36x32xf32>
    %412 = arith.addf %410, %411 : vector<36x32xf32>
    %c1_117 = arith.constant 1 : index
    %c0_118 = arith.constant 0 : index
    %c0_119 = arith.constant 0 : index
    %413 = vector.load %arg7[%c1_117, %c0_118, %c0_119] : memref<2x33x64xf32, #tpu.memory_space<vmem>>, vector<1x33x64xf32>
    %414 = vector.shape_cast %413 : vector<1x33x64xf32> to vector<33x64xf32>
    %415 = arith.truncf %412 : vector<36x32xf32> to vector<36x32xbf16>
    %416 = vector.extract_strided_slice %414 {offsets = [0, 0], sizes = [32, 64], strides = [1, 1]} : vector<33x64xf32> to vector<32x64xf32>
    %417 = arith.truncf %416 : vector<32x64xf32> to vector<32x64xbf16>
    %cst_120 = arith.constant dense<0.000000e+00> : vector<36x64xf32>
    %418 = tpu.matmul %415, %417, %cst_120 {dimension_numbers = #tpu.dot_dimension_numbers<[1], [0], [0], [1], [0, 0, 1, 1], [], []>} : vector<36x32xbf16>, vector<32x64xbf16>, vector<36x64xf32> -> vector<36x64xf32>
    %419 = vector.extract_strided_slice %414 {offsets = [32, 0], sizes = [1, 64], strides = [1, 1]} : vector<33x64xf32> to vector<1x64xf32>
    %420 = vector.broadcast %419 : vector<1x64xf32> to vector<36x64xf32>
    %421 = arith.addf %418, %420 : vector<36x64xf32>
    %cst_121 = arith.constant 5.000000e-01 : f32
    %422 = vector.broadcast %cst_121 : f32 to vector<36x64xf32>
    %423 = arith.mulf %422, %421 : vector<36x64xf32>
    %cst_122 = arith.constant 0.707106769 : f32
    %424 = vector.broadcast %cst_122 : f32 to vector<36x64xf32>
    %425 = arith.mulf %421, %424 : vector<36x64xf32>
    %cst_123 = arith.constant -4.000000e+00 : f32
    %cst_124 = arith.constant 4.000000e+00 : f32
    %426 = vector.broadcast %cst_123 : f32 to vector<36x64xf32>
    %427 = arith.maximumf %426, %425 : vector<36x64xf32>
    %428 = vector.broadcast %cst_124 : f32 to vector<36x64xf32>
    %429 = arith.minimumf %428, %427 : vector<36x64xf32>
    %430 = arith.mulf %429, %429 : vector<36x64xf32>
    %cst_125 = arith.constant -2.72614237E-10 : f32
    %431 = vector.broadcast %cst_125 : f32 to vector<36x64xf32>
    %432 = arith.mulf %431, %430 : vector<36x64xf32>
    %cst_126 = arith.constant 2.77068146E-8 : f32
    %433 = vector.broadcast %cst_126 : f32 to vector<36x64xf32>
    %434 = arith.addf %432, %433 : vector<36x64xf32>
    %435 = arith.mulf %434, %430 : vector<36x64xf32>
    %cst_127 = arith.constant -2.10102394E-6 : f32
    %436 = vector.broadcast %cst_127 : f32 to vector<36x64xf32>
    %437 = arith.addf %435, %436 : vector<36x64xf32>
    %438 = arith.mulf %437, %430 : vector<36x64xf32>
    %cst_128 = arith.constant -5.69250624E-5 : f32
    %439 = vector.broadcast %cst_128 : f32 to vector<36x64xf32>
    %440 = arith.addf %438, %439 : vector<36x64xf32>
    %441 = arith.mulf %440, %430 : vector<36x64xf32>
    %cst_129 = arith.constant -7.34990637E-4 : f32
    %442 = vector.broadcast %cst_129 : f32 to vector<36x64xf32>
    %443 = arith.addf %441, %442 : vector<36x64xf32>
    %444 = arith.mulf %443, %430 : vector<36x64xf32>
    %cst_130 = arith.constant -2.954600e-03 : f32
    %445 = vector.broadcast %cst_130 : f32 to vector<36x64xf32>
    %446 = arith.addf %444, %445 : vector<36x64xf32>
    %447 = arith.mulf %446, %430 : vector<36x64xf32>
    %cst_131 = arith.constant -0.0160960332 : f32
    %448 = vector.broadcast %cst_131 : f32 to vector<36x64xf32>
    %449 = arith.addf %447, %448 : vector<36x64xf32>
    %450 = arith.mulf %449, %429 : vector<36x64xf32>
    %cst_132 = arith.constant -1.45660715E-5 : f32
    %451 = vector.broadcast %cst_132 : f32 to vector<36x64xf32>
    %452 = arith.mulf %451, %430 : vector<36x64xf32>
    %cst_133 = arith.constant -2.13374049E-4 : f32
    %453 = vector.broadcast %cst_133 : f32 to vector<36x64xf32>
    %454 = arith.addf %452, %453 : vector<36x64xf32>
    %455 = arith.mulf %454, %430 : vector<36x64xf32>
    %cst_134 = arith.constant -0.00168282702 : f32
    %456 = vector.broadcast %cst_134 : f32 to vector<36x64xf32>
    %457 = arith.addf %455, %456 : vector<36x64xf32>
    %458 = arith.mulf %457, %430 : vector<36x64xf32>
    %cst_135 = arith.constant -0.00737332925 : f32
    %459 = vector.broadcast %cst_135 : f32 to vector<36x64xf32>
    %460 = arith.addf %458, %459 : vector<36x64xf32>
    %461 = arith.mulf %460, %430 : vector<36x64xf32>
    %cst_136 = arith.constant -0.0142647391 : f32
    %462 = vector.broadcast %cst_136 : f32 to vector<36x64xf32>
    %463 = arith.addf %461, %462 : vector<36x64xf32>
    %464 = arith.divf %450, %463 : vector<36x64xf32>
    %cst_137 = arith.constant 1.000000e+00 : f32
    %465 = vector.broadcast %cst_137 : f32 to vector<36x64xf32>
    %466 = arith.addf %465, %464 : vector<36x64xf32>
    %467 = arith.mulf %423, %466 : vector<36x64xf32>
    %468 = arith.truncf %467 : vector<36x64xf32> to vector<36x64xbf16>
    %c1_138 = arith.constant 1 : index
    %c0_139 = arith.constant 0 : index
    %c0_140 = arith.constant 0 : index
    %469 = vector.load %arg8[%c1_138, %c0_139, %c0_140] : memref<2x64x32xf32, #tpu.memory_space<vmem>>, vector<1x64x32xf32>
    %470 = vector.shape_cast %469 : vector<1x64x32xf32> to vector<64x32xf32>
    %471 = arith.truncf %470 : vector<64x32xf32> to vector<64x32xbf16>
    %cst_141 = arith.constant dense<0.000000e+00> : vector<36x32xf32>
    %472 = tpu.matmul %468, %471, %cst_141 {dimension_numbers = #tpu.dot_dimension_numbers<[1], [0], [0], [1], [0, 0, 1, 1], [], []>} : vector<36x64xbf16>, vector<64x32xbf16>, vector<36x32xf32> -> vector<36x32xf32>
    %473 = arith.addf %390, %472 : vector<36x32xf32>
    %474 = vector.broadcast %270 : vector<1x32xf32> to vector<36x32xf32>
    %475 = arith.addf %473, %474 : vector<36x32xf32>
    %476 = vector.extract_strided_slice %475 {offsets = [1, 0], sizes = [1, 32], strides = [1, 1]} : vector<36x32xf32> to vector<1x32xf32>
    %477 = vector.extract_strided_slice %475 {offsets = [19, 0], sizes = [1, 32], strides = [1, 1]} : vector<36x32xf32> to vector<1x32xf32>
    %478 = vector.extract_strided_slice %475 {offsets = [0, 0], sizes = [1, 32], strides = [1, 1]} : vector<36x32xf32> to vector<1x32xf32>
    %479 = vector.extract_strided_slice %475 {offsets = [18, 0], sizes = [1, 32], strides = [1, 1]} : vector<36x32xf32> to vector<1x32xf32>
    %480 = tpu.concatenate %476, %477, %478, %479 in 0 : vector<1x32xf32>, vector<1x32xf32>, vector<1x32xf32>, vector<1x32xf32> -> vector<4x32xf32>
    %cst_142 = arith.constant dense<0.000000e+00> : vector<4xf32>
    %481 = vector.multi_reduction <add>, %480, %cst_142 [1] : vector<4x32xf32> to vector<4xf32>
    %482 = vector.shape_cast %481 : vector<4xf32> to vector<4x1xf32>
    %cst_143 = arith.constant 3.200000e+01 : f32
    %483 = vector.broadcast %cst_143 : f32 to vector<4x1xf32>
    %484 = arith.divf %482, %483 : vector<4x1xf32>
    %485 = vector.broadcast %484 : vector<4x1xf32> to vector<4x32xf32>
    %486 = arith.subf %480, %485 : vector<4x32xf32>
    %487 = arith.mulf %486, %486 : vector<4x32xf32>
    %cst_144 = arith.constant dense<0.000000e+00> : vector<4xf32>
    %488 = vector.multi_reduction <add>, %487, %cst_144 [1] : vector<4x32xf32> to vector<4xf32>
    %489 = vector.shape_cast %488 : vector<4xf32> to vector<4x1xf32>
    %cst_145 = arith.constant 3.200000e+01 : f32
    %490 = vector.broadcast %cst_145 : f32 to vector<4x1xf32>
    %491 = arith.divf %489, %490 : vector<4x1xf32>
    %492 = vector.broadcast %484 : vector<4x1xf32> to vector<4x32xf32>
    %493 = arith.subf %480, %492 : vector<4x32xf32>
    %cst_146 = arith.constant 9.99999974E-6 : f32
    %494 = vector.broadcast %cst_146 : f32 to vector<4x1xf32>
    %495 = arith.addf %491, %494 : vector<4x1xf32>
    %496 = math.rsqrt %495 : vector<4x1xf32>
    %497 = vector.broadcast %496 : vector<4x1xf32> to vector<4x32xf32>
    %498 = arith.mulf %493, %497 : vector<4x32xf32>
    %499 = vector.broadcast %4 : vector<1x32xf32> to vector<4x32xf32>
    %500 = arith.mulf %498, %499 : vector<4x32xf32>
    %501 = vector.broadcast %5 : vector<1x32xf32> to vector<4x32xf32>
    %502 = arith.addf %500, %501 : vector<4x32xf32>
    %c0_147 = arith.constant 0 : index
    %c0_148 = arith.constant 0 : index
    %503 = vector.load %arg9[%c0_147, %c0_148] : memref<4x32xf32, #tpu.memory_space<vmem>>, vector<4x32xf32>
    tpu.vector_store %arg9[%c0_147, %c0_148], %502 {strides = array<i32>} : memref<4x32xf32, #tpu.memory_space<vmem>>, vector<4x32xf32>,
    return
  }
  func.func @transform_0(%arg0: i32, %arg1: memref<2xi32, #tpu.memory_space<smem>>) -> (i32, i32) {
    %c0_i32 = arith.constant 0 : i32
    %c0_i32_0 = arith.constant 0 : i32
    %c0_i32_1 = arith.constant 0 : i32
    return %c0_i32, %c0_i32_0 : i32, i32
  }
  func.func @transform_1(%arg0: i32, %arg1: memref<2xi32, #tpu.memory_space<smem>>) -> (i32, i32) {
    %c0_i32 = arith.constant 0 : i32
    %c0_i32_0 = arith.constant 0 : i32
    %c0_i32_1 = arith.constant 0 : i32
    return %c0_i32, %c0_i32_0 : i32, i32
  }
  func.func @transform_2(%arg0: i32, %arg1: memref<2xi32, #tpu.memory_space<smem>>) -> (i32, i32) {
    %c0_i32 = arith.constant 0 : i32
    %c0_i32_0 = arith.constant 0 : i32
    %c0_i32_1 = arith.constant 0 : i32
    return %c0_i32, %c0_i32_0 : i32, i32
  }
  func.func @transform_3(%arg0: i32, %arg1: memref<2xi32, #tpu.memory_space<smem>>) -> (i32, i32, i32) {
    %c0_i32 = arith.constant 0 : i32
    %c0_i32_0 = arith.constant 0 : i32
    %c0_i32_1 = arith.constant 0 : i32
    %c0_i32_2 = arith.constant 0 : i32
    return %c0_i32, %c0_i32_0, %c0_i32_1 : i32, i32, i32
  }
  func.func @transform_4(%arg0: i32, %arg1: memref<2xi32, #tpu.memory_space<smem>>) -> (i32, i32, i32) {
    %c0_i32 = arith.constant 0 : i32
    %c0_i32_0 = arith.constant 0 : i32
    %c0_i32_1 = arith.constant 0 : i32
    %c0_i32_2 = arith.constant 0 : i32
    return %c0_i32, %c0_i32_0, %c0_i32_1 : i32, i32, i32
  }
  func.func @transform_5(%arg0: i32, %arg1: memref<2xi32, #tpu.memory_space<smem>>) -> (i32, i32, i32) {
    %c0_i32 = arith.constant 0 : i32
    %c0_i32_0 = arith.constant 0 : i32
    %c0_i32_1 = arith.constant 0 : i32
    %c0_i32_2 = arith.constant 0 : i32
    return %c0_i32, %c0_i32_0, %c0_i32_1 : i32, i32, i32
  }
  func.func @transform_6(%arg0: i32, %arg1: memref<2xi32, #tpu.memory_space<smem>>) -> (i32, i32, i32) {
    %c0_i32 = arith.constant 0 : i32
    %c0_i32_0 = arith.constant 0 : i32
    %c0_i32_1 = arith.constant 0 : i32
    %c0_i32_2 = arith.constant 0 : i32
    return %c0_i32, %c0_i32_0, %c0_i32_1 : i32, i32, i32
  }
  func.func @transform_7(%arg0: i32, %arg1: memref<2xi32, #tpu.memory_space<smem>>) -> (i32, i32) {
    %c0_i32 = arith.constant 0 : i32
    %c0_i32_0 = arith.constant 0 : i32
    %c0_i32_1 = arith.constant 0 : i32
    return %c0_i32, %c0_i32_0 : i32, i32
  }
}

</mosaic_0001>

<bundles_post_ra>
// kernel: vit_forward.1
= control target key start
LH: loop header
LB: loop body
LE: loop exit
PB: predicated region body
PF: predicated region fallthrough
CT: control target
= control target key end

     0   :  { %s6218_s0 = inlined_call_operand.vmem [shape: s32[2], index: 0, kind: input, shape index: {}]   ;;  %s6219_s1 = inlined_call_operand.vmem [shape: f32[32,48], index: 1, kind: input, shape index: {}]   ;;  %s6220_s2 = inlined_call_operand.vmem [shape: f32[48,32], index: 2, kind: input, shape index: {}]   ;;  %s6221_s3 = inlined_call_operand.vmem [shape: f32[38,32], index: 3, kind: input, shape index: {}]   ;;  %s6222_s4 = inlined_call_operand.vmem [shape: f32[2,32,96], index: 4, kind: input, shape index: {}]   ;;  %s6223_s5 = inlined_call_operand.vmem [shape: f32[2,32,32], index: 5, kind: input, shape index: {}]   ;;  %s6224_s6 = inlined_call_operand.vmem [shape: f32[2,33,64], index: 6, kind: input, shape index: {}]   ;;  %s6225_s7 = inlined_call_operand.vmem [shape: f32[2,64,32], index: 7, kind: input, shape index: {}]   ;;  %s6226_s8 = inlined_call_operand.vmem [shape: f32[4,32], index: 8, kind: output, shape index: {}]  }
   0x1   :  { %s13_s29 = sshll.u32 %s6218_s0, 4  ;;  %s14_s29 = int_to_ptr.vmem [resolvable:$true] %s13_s29 }
   0x2   :  { %s4576_s30 = scalar_lea.vmem %s14_s29, 16  ;;  %p4581_p1 = scmp.lt.s32.totalorder %s14_s29, %s14_s29 }
   0x3   :  { %p4577_p0 = scmp.ne.s32.totalorder %s14_s29, %s4576_s30  ;;  %p4582_p2 = scmp.lt.s32.totalorder %s4576_s30, %s4576_s30 }
   0x5   :  { %p4583_p3 = por %p4582_p2, %p4581_p1 }
   0x7   :  { %p4584_p4 = pnand %p4583_p3, %p4577_p0 }
   0x9   :  { %4587 = shalt.err (!%p4584_p4)  }
   0xa   :  { %s4590_s9 = smov [#allocation3]  }
   0xb   :  { %16 = dma.vmem_to_smem %s14_s29, 16, %s4590_s9, [#allocation2] }
   0xc   :  { %4588 = dma.done.wait [#allocation2], 16 }
   0xd   :  { %4589 = vsyncadd [#allocation2], 4294967280 }
   0xe   :  { %18 = sfence }
   0xf   :  { %v45_v0 = vld [vmem:[%s6220_s2] sm:$0xff]  ;;  %v46_v1 = vld [vmem:[%s6220_s2 + $0x8] sm:$0xff]  ;;  %v47_v2 = vld [vmem:[%s6220_s2 + $0x10] sm:$0xff]  ;;  %vm58_vm0 = vcmask 392192   ;;  %v54_v15 = vlaneseq  ;;  %s114_s28 = sld [smem:[#allocation3]]  ;;  %s3585_s29 = sld [smem:[#allocation3 + $0x1]] }
  0x10   :  { %v51_v3 = vpack.c.bf16 %v46_v1, %v45_v0  ;;  %v48_v4 = vld [vmem:[%s6220_s2 + $0x18] sm:$0xff]  ;;  %v49_v5 = vld [vmem:[%s6220_s2 + $0x20] sm:$0xff]  ;;  %v50_v7 = vld [vmem:[%s6220_s2 + $0x28] sm:$0xff]  ;;  %vm146_vm1 = vcmask 1040384   ;;  %vm127_vm2 = vcmask 1041408   ;;  %vm139_vm3 = vcmask 1043456  }
  0x11   :  { %v52_v6 = vpack.c.bf16 %v48_v4, %v47_v2  ;;  %v39_v8 = vld [vmem:[%s6219_s1] sm:$0xff]  ;;  %v40_v9 = vld [vmem:[%s6219_s1 + $0x8] sm:$0xff]  ;;  %v53_v11 = vpack.c.bf16 %v50_v7, %v49_v5  ;;  %v41_v12 = vld [vmem:[%s6219_s1 + $0x10] sm:$0xff]  ;;  %v4687_v16 = vshrl.u32 %v54_v15, 7  ;;  %vm241_vm4 = vcmask 261120   ;;  %s4593_s27 = smov 96  }
  0x12   :  { %3837 = vmatprep.subr.bf16.mxu0 %v51_v3  ;;  %v43_v10 = vpack.c.bf16 %v40_v9, %v39_v8  ;;  %v42_v13 = vld [vmem:[%s6219_s1 + $0x18] sm:$0xff]  ;;  %v36_v18 = vld [vmem:[%s6221_s3 + $0x10] sm:$0xff]  ;;  %v35_v25 = vld [vmem:[%s6221_s3 + $0x8] sm:$0xff]  ;;  %vm150_vm5 = vcmask 1042432   ;;  %vm254_vm6 = vcmask 257024   ;;  %vm4592_vm7 = vmmov 0  }
  0x13   :  { %3838 = vmatpush3.bf16.msra.mxu0 %v51_v3  ;;  %v44_v14 = vpack.c.bf16 %v42_v13, %v41_v12  ;;  %v4690_v17 = vsub.s32 2, %v4687_v16  ;;  %v123_v20 = vrot.slane %v36_v18, 2  ;;  %v34_v29 = vld [vmem:[%s6221_s3] sm:$0xff]  ;;  %v156_v34 = vrot.slane %v35_v25, 6  ;;  %s4597_s30 = smov 120   ;;  %s4598_s9 = smov 80  }
  0x14   :  { %3839 = vmatprep.subr.bf16.mxu0 %v52_v6  ;;  %3843 = vmatprep.mubr.msk.bf16.mxu0 %vm58_vm0, %v43_v10  ;;  %v158_v39 = vrot.slane %v36_v18, 6  ;;  %v155_v40 = vrot.slane %v34_v29, 6  ;;  %vm413_vm8 = vcmask 64512   ;;  %s4599_s1 = smov 112   ;;  %s4600_s10 = smov 72  }
  0x15   :  { %v57_v19 = vrot.slane %v36_v18, %v4690_v17  ;;  %s3578_s11 = scalar_lea.vmem %s6221_s3, %s114_s28  ;;  %s3580_s0 = scalar_lea.vmem %s6221_s3, %s3585_s29 }
  0x16   :  { %v3584_v22 = vld [vmem:[%s3578_s11 + $0x14] sm:$0x1]  ;;  %v163_v47 = vsel %vm127_vm2, %v36_v18, %v155_v40  ;;  %v159_v51 = vsel %vm127_vm2, %v156_v34, %v158_v39  ;;  %v157_v53 = vsel %vm127_vm2, %v155_v40, %v156_v34  ;;  %s4595_s28 = smov 64   ;;  %s4596_s29 = smov 88  }
  0x17   :  { %3840 = vmatpush3.bf16.msra.mxu0 %v52_v6  ;;  %v3586_v26 = vld [vmem:[%s3580_s0 + $0x14] sm:$0x1]  ;;  %v147_v32 = vsel %vm146_vm1, %v3584_v22, %v123_v20  ;;  %s4601_s11 = smov 104   ;;  %s4602_s12 = smov 56  }
  0x18   :  { %3841 = vmatprep.subr.bf16.mxu0 %v53_v11  ;;  %v135_v36 = vrot.slane %v3586_v26, 6  ;;  %v331_v26 = vld [vmem:[%s6222_s4 + $0x8] sm:$0xff]  ;;  %s4603_s13 = smov 48   ;;  %s4604_s0 = smov 40  }
  0x19   :  { %s4605_s14 = smov 8   ;;  %s4606_s23 = smov 16  }
  0x1a   :  { %s4607_s24 = smov 24  }
  0x1b   :  { %3842 = vmatpush3.bf16.msra.mxu0 %v53_v11 }
  0x1e   :  { %3844 = vmatmul.mubr.msk.bf16.vlgmr.msra.gmra.mrb[0].mxu0 %vm58_vm0, %v44_v14  ;;  %vm498_vm0 = vcmask 293888  }
  0xf1   :  { %v3845_v21 = vpop.f32.mrb[0].mxu0 }
  0xf2   :  { %v108_v23 = vadd.f32 %v3845_v21, %v57_v19  ;;  %v99_v24 = vpop.f32.mrb[1].mxu0 }
  0xf3   :  { %v100_v27 = vadd.f32 %v99_v24, %v57_v19  ;;  %v3846_v28 = vpop.f32.mrb[2].mxu0 }
  0xf4   :  { %v111_v30 = vadd.f32 %v3846_v28, %v57_v19  ;;  %v102_v31 = vpop.f32.mrb[3].mxu0  ;;  %v140_v37 = vrot.slane %v108_v23, 4  ;;  %v4591_v28 = vmov 0.0  }
  0xf5   :  { %v128_v33 = vrot.slane %v100_v27, 6  ;;  %v103_v35 = vadd.f32 %v102_v31, %v57_v19  ;;  %v332_v27 = vld [vmem:[%s6222_s4 + $0x10] sm:$0xff]  ;;  %3847 = vmatprep.subr.bf16.mxu1 %v4591_v28  ;;  %3851 = vmatprep.mubr.msk.bf16.mxu1 %vm4592_vm7, %v4591_v28 }
  0xf6   :  { %v141_v38 = vrot.slane %v111_v30, 4  ;;  %v333_v30 = vld [vmem:[%s6222_s4 + $0x18] sm:$0xff]  ;;  %3881 = vmatprep.subr.bf16.mxu0 %v4591_v28  ;;  %3887 = vmatprep.mubr.msk.bf16.mxu0 %vm4592_vm7, %v4591_v28 }
  0xf7   :  { %v129_v41 = vrot.slane %v103_v35, 6  ;;  %v148_v42 = vsel %vm127_vm2, %v147_v32, %v128_v33  ;;  %v335_v31 = vpack.c.bf16 %v333_v30, %v332_v27 }
  0xf8   :  { %v142_v43 = vsel %vm139_vm3, %v140_v37, %v141_v38  ;;  %v4711_v44 = vadd.f32 %v148_v42, %v34_v29  ;;  %v4726_v55 = vadd.f32 %v159_v51, %v141_v38 }
  0xf9   :  { %v130_v45 = vsel %vm127_vm2, %v128_v33, %v129_v41  ;;  %v149_v46 = vsel %vm127_vm2, %v129_v41, %v135_v36  ;;  %v4732_v58 = vadd.f32 %v157_v53, %v142_v43 }
  0xfa   :  { %v242_v48 = vsel %vm241_vm4, %v4711_v44, 0.0  ;;  %v4718_v49 = vadd.f32 %v130_v45, %v35_v25  ;;  %v151_v50 = vsel %vm150_vm5, %v149_v46, %v36_v18  ;;  %v255_v59 = vsel %vm254_vm6, %v4726_v55, 0.0  ;;  %v330_v25 = vld [vmem:[%s6222_s4] sm:$0xff] }
  0xfb   :  { %243 = vadd.xlane.f32.xlu0 %v242_v48  ;;  %v152_v52 = vsel %vm139_vm3, %v151_v50, %v140_v37  ;;  %v251_v60 = vsel %vm241_vm4, %v4732_v58, 0.0  ;;  %v334_v29 = vpack.c.bf16 %v331_v26, %v330_v25  ;;  %v37_v50 = vld [vmem:[%s6221_s3 + $0x18] sm:$0xff] }
  0xfc   :  { %v4724_v54 = vadd.f32 %v163_v47, %v152_v52  ;;  %v245_v56 = vsel %vm241_vm4, %v4718_v49, 0.0  ;;  %v311_v47 = vsub.s32 0, %v4687_v16 }
  0xfd   :  { %3848 = vmatpush3.bf16.msra.mxu1 %v334_v29 }
  0xfe   :  { %v248_v57 = vsel %vm241_vm4, %v4724_v54, 0.0  ;;  %3849 = vmatprep.subr.bf16.mxu1 %v4591_v28  ;;  %v312_v53 = vrot.slane %v37_v50, %v311_v47 }
  0xff   :  { %246 = vadd.xlane.f32.xlu0 %v245_v56  ;;  %249 = vadd.xlane.f32.xlu1 %v248_v57  ;;  %v320_v56 = vsub.s32 1, %v4687_v16 }
 0x101   :  { %3850 = vmatpush3.bf16.msra.mxu1 %v335_v31 }
 0x102   :  { %3863 = vmatprep.subr.bf16.mxu1 %v4591_v28 }
 0x103   :  { %256 = vadd.xlane.f32.xlu0 %v255_v59  ;;  %252 = vadd.xlane.f32.xlu1 %v251_v60 }
 0x188   :  { %v244_v61 = vpop.xlane.xlu0 %243 }
 0x189   :  { %v259_v62 = vmul.f32 0.03125, %v244_v61  ;;  %v321_v61 = vrot.slane %v37_v50, %v320_v56 }
 0x18b   :  { %v4739_v63 = vsub.f32 %v4711_v44, %v259_v62 }
 0x18c   :  { %v247_v0 = vpop.xlane.xlu0 %246  ;;  %v250_v1 = vpop.xlane.xlu1 %249 }
 0x18d   :  { %v260_v2 = vmul.f32 0.03125, %v247_v0  ;;  %v261_v3 = vmul.f32 0.03125, %v250_v1  ;;  %v269_v4 = vmul.f32 %v4739_v63, %v4739_v63 }
 0x18f   :  { %v4744_v5 = vsub.f32 %v4718_v49, %v260_v2  ;;  %v4747_v6 = vsub.f32 %v4724_v54, %v261_v3  ;;  %v274_v7 = vsel %vm241_vm4, %v269_v4, 0.0 }
 0x190   :  { %v257_v8 = vpop.xlane.xlu0 %256  ;;  %275 = vadd.xlane.f32.xlu1 %v274_v7  ;;  %v253_v9 = vpop.xlane.xlu1 %252 }
 0x191   :  { %v263_v10 = vmul.f32 0.03125, %v257_v8  ;;  %v262_v11 = vmul.f32 0.03125, %v253_v9  ;;  %v270_v12 = vmul.f32 %v4744_v5, %v4744_v5  ;;  %v271_v13 = vmul.f32 %v4747_v6, %v4747_v6 }
 0x193   :  { %v4755_v14 = vsub.f32 %v4726_v55, %v263_v10  ;;  %v4758_v18 = vsub.f32 %v4732_v58, %v262_v11  ;;  %v277_v19 = vsel %vm241_vm4, %v270_v12, 0.0  ;;  %v280_v20 = vsel %vm241_vm4, %v271_v13, 0.0 }
 0x194   :  { %278 = vadd.xlane.f32.xlu0 %v277_v19  ;;  %281 = vadd.xlane.f32.xlu1 %v280_v20 }
 0x195   :  { %v273_v21 = vmul.f32 %v4755_v14, %v4755_v14  ;;  %v272_v22 = vmul.f32 %v4758_v18, %v4758_v18 }
 0x197   :  { %v286_v23 = vsel %vm254_vm6, %v273_v21, 0.0  ;;  %v283_v24 = vsel %vm241_vm4, %v272_v22, 0.0 }
 0x198   :  { %287 = vadd.xlane.f32.xlu1 %v286_v23  ;;  %284 = vadd.xlane.f32.xlu0 %v283_v24 }
 0x21d   :  { %v276_v32 = vpop.xlane.xlu1 %275 }
 0x21e   :  { %v289_v33 = vmul.f32 0.03125, %v276_v32 }
 0x220   :  { %v294_v34 = vadd.f32 1e-05, %v289_v33 }
 0x221   :  { %v279_v35 = vpop.xlane.xlu0 %278  ;;  %v282_v36 = vpop.xlane.xlu1 %281 }
 0x222   :  { %4353 = vrsqrt.f32 %v294_v34  ;;  %v290_v37 = vmul.f32 0.03125, %v279_v35  ;;  %v291_v38 = vmul.f32 0.03125, %v282_v36 }
 0x224   :  { %v295_v39 = vadd.f32 1e-05, %v290_v37  ;;  %v296_v40 = vadd.f32 1e-05, %v291_v38 }
 0x225   :  { %v285_v41 = vpop.xlane.xlu0 %284  ;;  %v288_v42 = vpop.xlane.xlu1 %287 }
 0x226   :  { %4355 = vrsqrt.f32 %v295_v39  ;;  %v292_v43 = vmul.f32 0.03125, %v285_v41  ;;  %v293_v45 = vmul.f32 0.03125, %v288_v42  ;;  %v172_v41 = vadd.s32 16, %v4687_v16 }
 0x227   :  { %4357 = vrsqrt.f32 %v296_v40  ;;  %v176_v42 = vand.u32 127, %v54_v15 }
 0x228   :  { %v297_v46 = vadd.f32 1e-05, %v292_v43  ;;  %v298_v48 = vadd.f32 1e-05, %v293_v45  ;;  %vm206_vm9 = vcmp.ge.s32.totalorder %v172_v41, 18  ;;  %vm184_vm12 = vcmp.lt.s32.totalorder %v172_v41, 18 }
 0x229   :  { %vm219_vm10 = vcmp.ge.s32.totalorder %v176_v42, 18  ;;  %vm198_vm11 = vcmp.lt.s32.totalorder %v176_v42, 18  ;;  %vm225_vm14 = vcmp.lt.s32.totalorder %v176_v42, 36  ;;  %v4594_v45 = vmov -1e+30  }
 0x22a   :  { %4359 = vrsqrt.f32 %v297_v46  ;;  %vm222_vm13 = vmand %vm206_vm9, %vm219_vm10  ;;  %v4844_v46 = vsel %vm198_vm11, 0.0, %v4594_v45 }
 0x22b   :  { %4361 = vrsqrt.f32 %v298_v48  ;;  %vm4846_vm15 = vmand %vm184_vm12, %vm198_vm11 }
 0x22c   :  { %v4354_v51 = vpop.eup %4353  ;;  %vm228_vm3 = vmand %vm222_vm13, %vm225_vm14 }
 0x22d   :  { %v304_v52 = vmul.f32 %v4354_v51, %v4739_v63  ;;  %vm233_vm9 = vmor %vm4846_vm15, %vm228_vm3  ;;  %vm1395_vm3 = vcmask 195584  }
 0x22e   :  { %vm229_vm11 = vmand %vm219_vm10, %vm225_vm14 }
 0x22f   :  { %v313_v60 = vmul.f32 %v312_v53, %v304_v52 }
 0x230   :  { %v4356_v57 = vpop.eup %4355 }
 0x231   :  { %v305_v59 = vmul.f32 %v4356_v57, %v4744_v5  ;;  %v4358_v62 = vpop.eup %4357  ;;  %v322_v2 = vadd.f32 %v321_v61, %v313_v60 }
 0x232   :  { %v306_v63 = vmul.f32 %v4358_v62, %v4747_v6 }
 0x233   :  { %v314_v0 = vmul.f32 %v312_v53, %v305_v59  ;;  %v174_v59 = vadd.s32 32, %v4687_v16 }
 0x234   :  { %v4360_v1 = vpop.eup %4359  ;;  %v315_v10 = vmul.f32 %v312_v53, %v306_v63 }
 0x235   :  { %v323_v3 = vadd.f32 %v321_v61, %v314_v0  ;;  %v307_v4 = vmul.f32 %v4360_v1, %v4758_v18  ;;  %v4362_v9 = vpop.eup %4361  ;;  %vm213_vm12 = vcmp.lt.s32.totalorder %v174_v59, 36  ;;  %v4860_v1 = vsel %vm233_vm9, 0.0, %v4594_v45 }
 0x236   :  { %v308_v11 = vmul.f32 %v4362_v9, %v4755_v14  ;;  %v324_v12 = vadd.f32 %v321_v61, %v315_v10  ;;  %vm224_vm13 = vmand %vm213_vm12, %vm219_vm10  ;;  %vm511_vm10 = vcmask 289792   ;;  %vm1816_vm9 = vcmask 523264  }
 0x237   :  { %v327_v7 = vpack.c.bf16 %v323_v3, %v322_v2  ;;  %v316_v8 = vmul.f32 %v312_v53, %v307_v4  ;;  %v4862_v4 = vsel %vm229_vm11, 0.0, %v4594_v45  ;;  %vm230_vm15 = vmand %vm224_vm13, %vm225_vm14  ;;  %vm1389_vm14 = vcmask 130048  }
 0x238   :  { %v317_v19 = vmul.f32 %v312_v53, %v308_v11 }
 0x239   :  { %3852 = vmatmul.mubr.msk.bf16.vlgmr.msra.gmra.mrb[0].mxu1 %vm241_vm4, %v327_v7  ;;  %v325_v5 = vadd.f32 %v321_v61, %v316_v8 }
 0x23a   :  { %3855 = vmatprep.mubr.msk.bf16.mxu1 %vm4592_vm7, %v4591_v28  ;;  %v326_v6 = vadd.f32 %v321_v61, %v317_v19 }
 0x23b   :  { %v328_v13 = vpack.c.bf16 %v325_v5, %v324_v12  ;;  %v4869_v12 = vsel %vm230_vm15, 0.0, %v4594_v45 }
 0x23c   :  { %v329_v18 = vpack.c.bf16 %v326_v6, %v326_v6 }
 0x241   :  { %3856 = vmatmul.mubr.msk.bf16.gmra.mrb[4].mxu1 %vm241_vm4, %v328_v13 }
 0x242   :  { %3859 = vmatprep.mubr.msk.bf16.mxu1 %vm4592_vm7, %v4591_v28 }
 0x249   :  { %3860 = vmatmul.mubr.msk.bf16.gmra.mrb[8].mxu1 %vm241_vm4, %v329_v18 }
 0x24a   :  { %3869 = vmatprep.mubr.msk.bf16.mxu1 %vm4592_vm7, %v4591_v28 }
 0x30c   :  { %v379_v20 = vpop.f32.mrb[0].mxu1 }
 0x30d   :  { %v3853_v21 = vpop.f32.mrb[1].mxu1 }
 0x30e   :  { %v382_v22 = vpop.f32.mrb[2].mxu1 }
 0x30f   :  { %v4811_v23 = vpack.c.bf16 %v382_v22, %v379_v20  ;;  %v3854_v14 = vpop.f32.mrb[3].mxu1 }
 0x311   :  { %407 = vrot.lane.b32.xlu0 %v4811_v23, %s4593_s27 }
 0x314   :  { %v387_v24 = vpop.f32.mrb[4].mxu1 }
 0x315   :  { %v3857_v25 = vpop.f32.mrb[5].mxu1 }
 0x316   :  { %v390_v26 = vpop.f32.mrb[6].mxu1 }
 0x317   :  { %v4815_v27 = vpack.c.bf16 %v390_v26, %v387_v24  ;;  %v3858_v29 = vpop.f32.mrb[7].mxu1 }
 0x319   :  { %409 = vrot.lane.b32.xlu1 %v4815_v27, %s4593_s27 }
 0x31c   :  { %v395_v30 = vpop.f32.mrb[8].mxu1 }
 0x31d   :  { %v4819_v31 = vpack.c.bf16 %v395_v30, %v395_v30  ;;  %v3861_v32 = vpop.f32.mrb[9].mxu1 }
 0x31e   :  { %v398_v33 = vpop.f32.mrb[10].mxu1 }
 0x31f   :  { %411 = vrot.lane.b32.xlu1 %v4819_v31, %s4593_s27  ;;  %v3862_v34 = vpop.f32.mrb[11].mxu1 }
 0x383   :  { %v408_v35 = vpop.permute.xlu0 %407 }
 0x384   :  { %v424_v36 = vsel %vm413_vm8, %v408_v35, 0 }
 0x385   :  { %3864 = vmatpush3.bf16.xpose.msra.mxu1 %v424_v36 }
 0x386   :  { %3865 = vmatprep.subr.bf16.mxu1 %v4591_v28 }
 0x38b   :  { %v410_v37 = vpop.permute.xlu1 %409 }
 0x38c   :  { %v427_v38 = vsel %vm413_vm8, %v410_v37, 0 }
 0x38d   :  { %3866 = vmatpush3.bf16.xpose.msra.mxu1 %v427_v38 }
 0x38e   :  { %3867 = vmatprep.subr.bf16.mxu1 %v4591_v28 }
 0x391   :  { %v412_v39 = vpop.permute.xlu1 %411 }
 0x392   :  { %v430_v40 = vsel %vm413_vm8, %v412_v39, 0 }
 0x395   :  { %3868 = vmatpush3.bf16.xpose.msra.mxu1 %v430_v40 }
 0x396   :  { %3917 = vmatprep.subr.bf16.mxu1 %v4591_v28 }
 0x39c   :  { %3870 = vmatmul.mubr.msk.bf16.vlgmr.msra.gmra.mrb[12].mxu1 %vm413_vm8, %v4811_v23 }
 0x39d   :  { %3873 = vmatprep.mubr.msk.bf16.mxu1 %vm4592_vm7, %v4591_v28 }
 0x3a4   :  { %3874 = vmatmul.mubr.msk.bf16.gmra.mrb[16].mxu1 %vm413_vm8, %v4815_v27 }
 0x3a5   :  { %3877 = vmatprep.mubr.msk.bf16.mxu1 %vm4592_vm7, %v4591_v28 }
 0x3ac   :  { %3878 = vmatmul.mubr.msk.bf16.gmra.mrb[20].mxu1 %vm413_vm8, %v4819_v31 }
 0x3ad   :  { %3923 = vmatprep.mubr.msk.bf16.mxu1 %vm4592_vm7, %v4591_v28 }
 0x46f   :  { %v466_v43 = vpop.f32.mrb[12].mxu1 }
 0x470   :  { %v488_v48 = vmul.f32 0.35355338, %v466_v43  ;;  %v3871_v50 = vpop.f32.mrb[13].mxu1 }
 0x471   :  { %v469_v52 = vpop.f32.mrb[14].mxu1 }
 0x472   :  { %v489_v15 = vmul.f32 0.35355338, %v469_v52  ;;  %v3872_v53 = vpop.f32.mrb[15].mxu1  ;;  %v493_v57 = vadd.f32 %v488_v48, %v4844_v46 }
 0x474   :  { %v499_v60 = vsel %vm498_vm0, %v493_v57, -inf  ;;  %v494_v61 = vadd.f32 %v489_v15, %v4844_v46 }
 0x475   :  { %500 = vmax.xlane.f32.xlu1 %v499_v60 }
 0x476   :  { %v502_v62 = vsel %vm498_vm0, %v494_v61, -inf }
 0x477   :  { %503 = vmax.xlane.f32.xlu0 %v502_v62  ;;  %v474_v0 = vpop.f32.mrb[16].mxu1 }
 0x478   :  { %v490_v2 = vmul.f32 0.35355338, %v474_v0  ;;  %v3875_v3 = vpop.f32.mrb[17].mxu1 }
 0x479   :  { %v477_v63 = vpop.f32.mrb[18].mxu1 }
 0x47a   :  { %v491_v7 = vmul.f32 0.35355338, %v477_v63  ;;  %v3876_v8 = vpop.f32.mrb[19].mxu1  ;;  %v495_v9 = vadd.f32 %v490_v2, %v4860_v1 }
 0x47c   :  { %v505_v10 = vsel %vm498_vm0, %v495_v9, -inf  ;;  %v496_v5 = vadd.f32 %v491_v7, %v4862_v4 }
 0x47d   :  { %506 = vmax.xlane.f32.xlu0 %v505_v10 }
 0x47e   :  { %v508_v6 = vsel %vm498_vm0, %v496_v5, -inf }
 0x47f   :  { %v482_v11 = vpop.f32.mrb[20].mxu1 }
 0x480   :  { %v492_v13 = vmul.f32 0.35355338, %v482_v11  ;;  %v3879_v19 = vpop.f32.mrb[21].mxu1 }
 0x481   :  { %509 = vmax.xlane.f32.xlu0 %v508_v6  ;;  %v485_v18 = vpop.f32.mrb[22].mxu1 }
 0x482   :  { %v3880_v20 = vpop.f32.mrb[23].mxu1  ;;  %v497_v21 = vadd.f32 %v492_v13, %v4869_v12 }
 0x484   :  { %v512_v22 = vsel %vm511_vm10, %v497_v21, -inf }
 0x485   :  { %513 = vmax.xlane.f32.xlu1 %v512_v22 }
 0x496   :  { %560 = vrot.lane.b32.xlu1 %v4815_v27, %s4595_s28 }
 0x497   :  { %558 = vrot.lane.b32.xlu0 %v4811_v23, %s4595_s28 }
 0x49a   :  { %562 = vrot.lane.b32.xlu1 %v4819_v31, %s4595_s28 }
 0x502   :  { %v501_v14 = vpop.xlane.xlu1 %500 }
 0x503   :  { %v515_v24 = vsub.f32 %v493_v57, %v501_v14 }
 0x504   :  { %v504_v25 = vpop.xlane.xlu0 %503 }
 0x505   :  { %v520_v26 = vmul.f32 1.442695, %v515_v24  ;;  %v516_v29 = vsub.f32 %v494_v61, %v504_v25 }
 0x507   :  { %4363 = vpow2.f32 %v520_v26  ;;  %v522_v30 = vmul.f32 1.442695, %v516_v29 }
 0x509   :  { %4365 = vpow2.f32 %v522_v30 }
 0x50a   :  { %v507_v32 = vpop.xlane.xlu0 %506 }
 0x50b   :  { %v517_v33 = vsub.f32 %v495_v9, %v507_v32 }
 0x50d   :  { %v524_v34 = vmul.f32 1.442695, %v517_v33 }
 0x50e   :  { %v510_v35 = vpop.xlane.xlu0 %509 }
 0x50f   :  { %4367 = vpow2.f32 %v524_v34  ;;  %v518_v36 = vsub.f32 %v496_v5, %v510_v35 }
 0x511   :  { %v4880_v37 = vpop.eup %4363  ;;  %v526_v38 = vmul.f32 1.442695, %v518_v36 }
 0x512   :  { %v559_v39 = vpop.permute.xlu0 %558  ;;  %v514_v40 = vpop.xlane.xlu1 %513  ;;  %v530_v41 = vsel %vm498_vm0, %v4880_v37, 0.0 }
 0x513   :  { %v4884_v42 = vpop.eup %4365  ;;  %4369 = vpow2.f32 %v526_v38  ;;  %v519_v43 = vsub.f32 %v497_v21, %v514_v40  ;;  %531 = vadd.xlane.f32.xlu0 %v530_v41  ;;  %3882 = vmatpush3.bf16.msra.mxu0 %v559_v39 }
 0x514   :  { %v533_v45 = vsel %vm498_vm0, %v4884_v42, 0.0  ;;  %3883 = vmatprep.subr.bf16.mxu0 %v4591_v28 }
 0x515   :  { %v528_v48 = vmul.f32 1.442695, %v519_v43  ;;  %534 = vadd.xlane.f32.xlu1 %v533_v45 }
 0x516   :  { %v561_v50 = vpop.permute.xlu1 %560 }
 0x517   :  { %4371 = vpow2.f32 %v528_v48  ;;  %3884 = vmatpush3.bf16.msra.mxu0 %v561_v50 }
 0x518   :  { %3885 = vmatprep.subr.bf16.mxu0 %v4591_v28 }
 0x519   :  { %v4890_v51 = vpop.eup %4367 }
 0x51a   :  { %v563_v52 = vpop.permute.xlu1 %562  ;;  %v536_v15 = vsel %vm498_vm0, %v4890_v51, 0.0 }
 0x51b   :  { %v576_v53 = vsel %vm127_vm2, %v563_v52, 0  ;;  %537 = vadd.xlane.f32.xlu0 %v536_v15 }
 0x51c   :  { %3886 = vmatpush3.bf16.msra.mxu0 %v576_v53 }
 0x51d   :  { %v4370_v57 = vpop.eup %4369  ;;  %3899 = vmatprep.subr.bf16.mxu0 %v4591_v28 }
 0x51e   :  { %v539_v59 = vsel %vm498_vm0, %v4370_v57, 0.0 }
 0x51f   :  { %540 = vadd.xlane.f32.xlu1 %v539_v59 }
 0x521   :  { %v4897_v60 = vpop.eup %4371 }
 0x522   :  { %v542_v61 = vsel %vm511_vm10, %v4897_v60, 0.0 }
 0x523   :  { %543 = vadd.xlane.f32.xlu1 %v542_v61 }
 0x531   :  { %640 = vrot.lane.b32.xlu0 %v4811_v23, %s4596_s29 }
 0x534   :  { %642 = vrot.lane.b32.xlu1 %v4815_v27, %s4596_s29 }
 0x535   :  { %644 = vrot.lane.b32.xlu0 %v4819_v31, %s4596_s29 }
 0x538   :  { %634 = vrot.lane.b32.xlu1 %v4811_v23, %s4597_s30 }
 0x539   :  { %870 = vrot.lane.b32.xlu0 %v4811_v23, %s4598_s9 }
 0x53c   :  { %636 = vrot.lane.b32.xlu1 %v4815_v27, %s4597_s30 }
 0x53d   :  { %872 = vrot.lane.b32.xlu0 %v4815_v27, %s4598_s9 }
 0x540   :  { %638 = vrot.lane.b32.xlu1 %v4819_v31, %s4597_s30 }
 0x541   :  { %874 = vrot.lane.b32.xlu0 %v4819_v31, %s4598_s9 }
 0x544   :  { %864 = vrot.lane.b32.xlu1 %v4811_v23, %s4599_s1 }
 0x545   :  { %1100 = vrot.lane.b32.xlu0 %v4811_v23, %s4600_s10 }
 0x548   :  { %866 = vrot.lane.b32.xlu1 %v4815_v27, %s4599_s1 }
 0x549   :  { %1102 = vrot.lane.b32.xlu0 %v4815_v27, %s4600_s10 }
 0x54c   :  { %868 = vrot.lane.b32.xlu1 %v4819_v31, %s4599_s1 }
 0x54d   :  { %1104 = vrot.lane.b32.xlu0 %v4819_v31, %s4600_s10 }
 0x550   :  { %1094 = vrot.lane.b32.xlu1 %v4811_v23, %s4601_s11 }
 0x551   :  { %1096 = vrot.lane.b32.xlu0 %v4815_v27, %s4601_s11 }
 0x554   :  { %1098 = vrot.lane.b32.xlu1 %v4819_v31, %s4601_s11 }
 0x555   :  { %788 = vrot.lane.b32.xlu0 %v4811_v23, %s4602_s12 }
 0x5a0   :  { %v532_v62 = vpop.xlane.xlu0 %531 }
 0x5a1   :  { %4373 = vrcp.f32 %v532_v62 }
 0x5a2   :  { %v535_v0 = vpop.xlane.xlu1 %534 }
 0x5a3   :  { %4375 = vrcp.f32 %v535_v0 }
 0x5a8   :  { %v538_v2 = vpop.xlane.xlu0 %537 }
 0x5a9   :  { %4377 = vrcp.f32 %v538_v2 }
 0x5ab   :  { %v4374_v3 = vpop.eup %4373 }
 0x5ac   :  { %v641_v63 = vpop.permute.xlu0 %640  ;;  %v541_v7 = vpop.xlane.xlu1 %540  ;;  %v546_v9 = vmul.f32 %v4374_v3, %v4880_v37 }
 0x5ad   :  { %v4376_v8 = vpop.eup %4375  ;;  %4379 = vrcp.f32 %v541_v7  ;;  %v656_v19 = vsel %vm413_vm8, %v641_v63, 0 }
 0x5ae   :  { %v548_v10 = vmul.f32 %v4376_v8, %v4884_v42 }
 0x5b0   :  { %v645_v5 = vpop.permute.xlu0 %644  ;;  %v544_v11 = vpop.xlane.xlu1 %543  ;;  %v555_v13 = vpack.c.bf16 %v548_v10, %v546_v9 }
 0x5b1   :  { %4381 = vrcp.f32 %v544_v11  ;;  %v662_v34 = vsel %vm413_vm8, %v645_v5, 0 }
 0x5b2   :  { %3888 = vmatmul.mubr.msk.bf16.vlgmr.msra.gmra.mrb[4].mxu0 %vm498_vm0, %v555_v13 }
 0x5b3   :  { %3900 = vmatpush3.bf16.xpose.msra.mxu0 %v656_v19  ;;  %3891 = vmatprep.mubr.msk.bf16.mxu0 %vm4592_vm7, %v4591_v28  ;;  %v4378_v18 = vpop.eup %4377 }
 0x5b4   :  { %v871_v6 = vpop.permute.xlu0 %870  ;;  %3901 = vmatprep.subr.bf16.mxu0 %v4591_v28  ;;  %v643_v21 = vpop.permute.xlu1 %642  ;;  %v550_v14 = vmul.f32 %v4378_v18, %v4890_v51 }
 0x5b5   :  { %v659_v25 = vsel %vm413_vm8, %v643_v21, 0  ;;  %v886_v39 = vsel %vm413_vm8, %v871_v6, 0 }
 0x5b7   :  { %v4380_v20 = vpop.eup %4379 }
 0x5b8   :  { %v873_v22 = vpop.permute.xlu0 %872  ;;  %v552_v24 = vmul.f32 %v4380_v20, %v4370_v57  ;;  %v635_v38 = vpop.permute.xlu1 %634 }
 0x5b9   :  { %v889_v43 = vsel %vm413_vm8, %v873_v22, 0 }
 0x5ba   :  { %v556_v26 = vpack.c.bf16 %v552_v24, %v550_v14 }
 0x5bb   :  { %v4382_v29 = vpop.eup %4381  ;;  %3902 = vmatpush3.bf16.xpose.msra.mxu0 %v659_v25 }
 0x5bc   :  { %v875_v30 = vpop.permute.xlu0 %874  ;;  %3892 = vmatmul.mubr.msk.bf16.gmra.mrb[8].mxu0 %vm498_vm0, %v556_v26  ;;  %3903 = vmatprep.subr.bf16.mxu0 %v4591_v28  ;;  %v554_v32 = vmul.f32 %v4382_v29, %v4897_v60  ;;  %v637_v42 = vpop.permute.xlu1 %636 }
 0x5bd   :  { %3895 = vmatprep.mubr.msk.bf16.mxu0 %vm4592_vm7, %v4591_v28  ;;  %v892_v48 = vsel %vm413_vm8, %v875_v30, 0 }
 0x5be   :  { %v557_v35 = vpack.c.bf16 %v554_v32, %v554_v32 }
 0x5c0   :  { %v1101_v33 = vpop.permute.xlu0 %1100  ;;  %v639_v45 = vpop.permute.xlu1 %638 }
 0x5c1   :  { %v1116_v51 = vsel %vm413_vm8, %v1101_v33, 0 }
 0x5c3   :  { %3904 = vmatpush3.bf16.xpose.msra.mxu0 %v662_v34 }
 0x5c4   :  { %v1103_v36 = vpop.permute.xlu0 %1102  ;;  %3896 = vmatmul.mubr.msk.bf16.gmra.mrb[12].mxu0 %vm498_vm0, %v557_v35  ;;  %3935 = vmatprep.subr.bf16.mxu0 %v4591_v28  ;;  %v865_v50 = vpop.permute.xlu1 %864 }
 0x5c5   :  { %3905 = vmatprep.mubr.msk.bf16.mxu0 %vm4592_vm7, %v4591_v28  ;;  %v1119_v15 = vsel %vm413_vm8, %v1103_v36, 0 }
 0x5c8   :  { %v1105_v37 = vpop.permute.xlu0 %1104  ;;  %v867_v52 = vpop.permute.xlu1 %866 }
 0x5c9   :  { %v1122_v57 = vsel %vm413_vm8, %v1105_v37, 0 }
 0x5cc   :  { %v1097_v40 = vpop.permute.xlu0 %1096  ;;  %3906 = vmatmul.mubr.msk.bf16.vlgmr.msra.gmra.mrb[16].mxu0 %vm413_vm8, %v635_v38  ;;  %v869_v53 = vpop.permute.xlu1 %868 }
 0x5cd   :  { %3936 = vmatpush3.bf16.xpose.msra.mxu0 %v886_v39  ;;  %3909 = vmatprep.mubr.msk.bf16.mxu0 %vm4592_vm7, %v4591_v28 }
 0x5ce   :  { %3937 = vmatprep.subr.bf16.mxu0 %v4591_v28 }
 0x5d0   :  { %v789_v41 = vpop.permute.xlu0 %788  ;;  %v1095_v59 = vpop.permute.xlu1 %1094 }
 0x5d1   :  { %3918 = vmatpush3.bf16.msra.mxu1 %v789_v41 }
 0x5d2   :  { %3919 = vmatprep.subr.bf16.mxu1 %v4591_v28 }
 0x5d4   :  { %3910 = vmatmul.mubr.msk.bf16.gmra.mrb[20].mxu0 %vm413_vm8, %v637_v42  ;;  %v1099_v60 = vpop.permute.xlu1 %1098 }
 0x5d5   :  { %3938 = vmatpush3.bf16.xpose.msra.mxu0 %v889_v43  ;;  %3913 = vmatprep.mubr.msk.bf16.mxu0 %vm4592_vm7, %v4591_v28 }
 0x5d6   :  { %3939 = vmatprep.subr.bf16.mxu0 %v4591_v28 }
 0x5dc   :  { %3914 = vmatmul.mubr.msk.bf16.gmra.mrb[24].mxu0 %vm413_vm8, %v639_v45 }
 0x5dd   :  { %3940 = vmatpush3.bf16.xpose.msra.mxu0 %v892_v48  ;;  %3941 = vmatprep.mubr.msk.bf16.mxu0 %vm4592_vm7, %v4591_v28 }
 0x5de   :  { %3971 = vmatprep.subr.bf16.mxu0 %v4591_v28 }
 0x5e4   :  { %3942 = vmatmul.mubr.msk.bf16.vlgmr.msra.gmra.mrb[28].mxu0 %vm413_vm8, %v865_v50 }
 0x5e5   :  { %3972 = vmatpush3.bf16.xpose.msra.mxu0 %v1116_v51  ;;  %3945 = vmatprep.mubr.msk.bf16.mxu0 %vm4592_vm7, %v4591_v28 }
 0x5e6   :  { %3973 = vmatprep.subr.bf16.mxu0 %v4591_v28 }
 0x5ec   :  { %3946 = vmatmul.mubr.msk.bf16.gmra.mrb[32].mxu0 %vm413_vm8, %v867_v52 }
 0x5ed   :  { %3974 = vmatpush3.bf16.xpose.msra.mxu0 %v1119_v15  ;;  %3949 = vmatprep.mubr.msk.bf16.mxu0 %vm4592_vm7, %v4591_v28 }
 0x5ee   :  { %3975 = vmatprep.subr.bf16.mxu0 %v4591_v28 }
 0x5f4   :  { %3950 = vmatmul.mubr.msk.bf16.gmra.mrb[36].mxu0 %vm413_vm8, %v869_v53 }
 0x5f5   :  { %3976 = vmatpush3.bf16.xpose.msra.mxu0 %v1122_v57  ;;  %3977 = vmatprep.mubr.msk.bf16.mxu0 %vm4592_vm7, %v4591_v28 }
 0x5f6   :  { %4007 = vmatprep.subr.bf16.mxu0 %v4591_v28 }
 0x5fc   :  { %3978 = vmatmul.mubr.msk.bf16.vlgmr.msra.gmra.mrb[40].mxu0 %vm413_vm8, %v1095_v59 }
 0x5fd   :  { %3981 = vmatprep.mubr.msk.bf16.mxu0 %vm4592_vm7, %v4591_v28 }
 0x604   :  { %3982 = vmatmul.mubr.msk.bf16.gmra.mrb[44].mxu0 %vm413_vm8, %v1097_v40 }
 0x605   :  { %3985 = vmatprep.mubr.msk.bf16.mxu0 %vm4592_vm7, %v4591_v28 }
 0x60c   :  { %3986 = vmatmul.mubr.msk.bf16.gmra.mrb[48].mxu0 %vm413_vm8, %v1099_v60 }
 0x60d   :  { %4011 = vmatprep.mubr.msk.bf16.mxu0 %vm4592_vm7, %v4591_v28 }
 0x685   :  { %v4998_v61 = vpop.f32.mrb[4].mxu0 }
 0x686   :  { %v3889_v62 = vpop.f32.mrb[5].mxu0 }
 0x687   :  { %v5000_v0 = vpop.f32.mrb[6].mxu0 }
 0x688   :  { %v3890_v2 = vpop.f32.mrb[7].mxu0 }
 0x68f   :  { %v5002_v3 = vpop.f32.mrb[8].mxu0 }
 0x690   :  { %v3893_v63 = vpop.f32.mrb[9].mxu0 }
 0x691   :  { %v5004_v7 = vpop.f32.mrb[10].mxu0 }
 0x692   :  { %v3894_v8 = vpop.f32.mrb[11].mxu0 }
 0x697   :  { %v5006_v9 = vpop.f32.mrb[12].mxu0 }
 0x698   :  { %v3897_v10 = vpop.f32.mrb[13].mxu0 }
 0x699   :  { %v631_v5 = vpop.f32.mrb[14].mxu0 }
 0x69a   :  { %v3898_v11 = vpop.f32.mrb[15].mxu0 }
 0x69f   :  { %v698_v13 = vpop.f32.mrb[16].mxu0 }
 0x6a0   :  { %v720_v19 = vmul.f32 0.35355338, %v698_v13  ;;  %v3907_v6 = vpop.f32.mrb[17].mxu0 }
 0x6a1   :  { %v701_v18 = vpop.f32.mrb[18].mxu0 }
 0x6a2   :  { %v721_v20 = vmul.f32 0.35355338, %v701_v18  ;;  %v3908_v21 = vpop.f32.mrb[19].mxu0  ;;  %v5009_v22 = vadd.f32 %v720_v19, %v4844_v46 }
 0x6a4   :  { %v730_v14 = vsel %vm498_vm0, %v5009_v22, -inf  ;;  %v5014_v24 = vadd.f32 %v721_v20, %v4844_v46 }
 0x6a5   :  { %731 = vmax.xlane.f32.xlu0 %v730_v14 }
 0x6a6   :  { %v733_v25 = vsel %vm498_vm0, %v5014_v24, -inf }
 0x6a7   :  { %734 = vmax.xlane.f32.xlu1 %v733_v25  ;;  %v706_v26 = vpop.f32.mrb[20].mxu0 }
 0x6a8   :  { %v3911_v29 = vpop.f32.mrb[21].mxu0  ;;  %v722_v57 = vmul.f32 0.35355338, %v706_v26 }
 0x6a9   :  { %v709_v30 = vpop.f32.mrb[22].mxu0 }
 0x6aa   :  { %v3912_v32 = vpop.f32.mrb[23].mxu0  ;;  %v723_v2 = vmul.f32 0.35355338, %v709_v30  ;;  %v5023_v63 = vadd.f32 %v722_v57, %v4860_v1 }
 0x6ac   :  { %v736_v6 = vsel %vm498_vm0, %v5023_v63, -inf  ;;  %v5031_v18 = vadd.f32 %v723_v2, %v4862_v4 }
 0x6ae   :  { %v739_v29 = vsel %vm498_vm0, %v5031_v18, -inf }
 0x6af   :  { %v714_v33 = vpop.f32.mrb[24].mxu0 }
 0x6b0   :  { %v3915_v34 = vpop.f32.mrb[25].mxu0  ;;  %v724_v13 = vmul.f32 0.35355338, %v714_v33 }
 0x6b1   :  { %v717_v35 = vpop.f32.mrb[26].mxu0 }
 0x6b2   :  { %v3916_v36 = vpop.f32.mrb[27].mxu0  ;;  %v5041_v30 = vadd.f32 %v724_v13, %v4869_v12 }
 0x6b7   :  { %v928_v37 = vpop.f32.mrb[28].mxu0 }
 0x6b8   :  { %790 = vrot.lane.b32.xlu1 %v4815_v27, %s4602_s12  ;;  %v3943_v38 = vpop.f32.mrb[29].mxu0  ;;  %v950_v62 = vmul.f32 0.35355338, %v928_v37 }
 0x6b9   :  { %v931_v39 = vpop.f32.mrb[30].mxu0 }
 0x6ba   :  { %v3944_v40 = vpop.f32.mrb[31].mxu0  ;;  %v5026_v5 = vadd.f32 %v950_v62, %v4844_v46  ;;  %v951_v26 = vmul.f32 0.35355338, %v931_v39  ;;  %v742_v39 = vsel %vm511_vm10, %v5041_v30, -inf }
 0x6bb   :  { %792 = vrot.lane.b32.xlu0 %v4819_v31, %s4602_s12 }
 0x6bc   :  { %v960_v14 = vsel %vm498_vm0, %v5026_v5, -inf  ;;  %v5051_v40 = vadd.f32 %v951_v26, %v4844_v46 }
 0x6bf   :  { %v936_v41 = vpop.f32.mrb[32].mxu0 }
 0x6c0   :  { %v3947_v42 = vpop.f32.mrb[33].mxu0  ;;  %v952_v8 = vmul.f32 0.35355338, %v936_v41 }
 0x6c1   :  { %v939_v43 = vpop.f32.mrb[34].mxu0 }
 0x6c2   :  { %v3948_v45 = vpop.f32.mrb[35].mxu0  ;;  %v5036_v25 = vadd.f32 %v952_v8, %v4860_v1  ;;  %v953_v37 = vmul.f32 0.35355338, %v939_v43  ;;  %v963_v43 = vsel %vm498_vm0, %v5051_v40, -inf }
 0x6c4   :  { %v966_v34 = vsel %vm498_vm0, %v5036_v25, -inf }
 0x6c7   :  { %v944_v48 = vpop.f32.mrb[36].mxu0 }
 0x6c8   :  { %v3951_v50 = vpop.f32.mrb[37].mxu0  ;;  %v954_v21 = vmul.f32 0.35355338, %v944_v48 }
 0x6c9   :  { %v947_v51 = vpop.f32.mrb[38].mxu0 }
 0x6ca   :  { %v3952_v52 = vpop.f32.mrb[39].mxu0  ;;  %v5046_v35 = vadd.f32 %v954_v21, %v4869_v12  ;;  %v5061_v51 = vadd.f32 %v953_v37, %v4862_v4 }
 0x6cc   :  { %v972_v45 = vsel %vm511_vm10, %v5046_v35, -inf }
 0x6cf   :  { %v1158_v15 = vpop.f32.mrb[40].mxu0 }
 0x6d0   :  { %v3979_v53 = vpop.f32.mrb[41].mxu0  ;;  %v1180_v50 = vmul.f32 0.35355338, %v1158_v15 }
 0x6d1   :  { %v1161_v59 = vpop.f32.mrb[42].mxu0 }
 0x6d2   :  { %v3980_v60 = vpop.f32.mrb[43].mxu0  ;;  %v1181_v32 = vmul.f32 0.35355338, %v1161_v59  ;;  %v969_v59 = vsel %vm498_vm0, %v5061_v51, -inf  ;;  %v5071_v15 = vadd.f32 %v1180_v50, %v4844_v46 }
 0x6d4   :  { %v5056_v48 = vadd.f32 %v1181_v32, %v4844_v46  ;;  %v1190_v62 = vsel %vm498_vm0, %v5071_v15, -inf }
 0x6d6   :  { %v1193_v52 = vsel %vm498_vm0, %v5056_v48, -inf }
 0x6d7   :  { %v1166_v10 = vpop.f32.mrb[44].mxu0 }
 0x6d8   :  { %v3983_v11 = vpop.f32.mrb[45].mxu0  ;;  %v1182_v57 = vmul.f32 0.35355338, %v1166_v10 }
 0x6d9   :  { %v1169_v19 = vpop.f32.mrb[46].mxu0 }
 0x6da   :  { %737 = vmax.xlane.f32.xlu0 %v736_v6  ;;  %v3984_v20 = vpop.f32.mrb[47].mxu0  ;;  %v1183_v42 = vmul.f32 0.35355338, %v1169_v19  ;;  %v5078_v2 = vadd.f32 %v1182_v57, %v4860_v1 }
 0x6dc   :  { %961 = vmax.xlane.f32.xlu1 %v960_v14  ;;  %v5066_v53 = vadd.f32 %v1183_v42, %v4862_v4  ;;  %v1196_v8 = vsel %vm498_vm0, %v5078_v2, -inf }
 0x6de   :  { %740 = vmax.xlane.f32.xlu0 %v739_v29  ;;  %v1199_v60 = vsel %vm498_vm0, %v5066_v53, -inf }
 0x6df   :  { %v1174_v33 = vpop.f32.mrb[48].mxu0 }
 0x6e0   :  { %967 = vmax.xlane.f32.xlu1 %v966_v34  ;;  %v3987_v36 = vpop.f32.mrb[49].mxu0  ;;  %v1184_v10 = vmul.f32 0.35355338, %v1174_v33 }
 0x6e1   :  { %v1177_v38 = vpop.f32.mrb[50].mxu0 }
 0x6e2   :  { %743 = vmax.xlane.f32.xlu0 %v742_v39  ;;  %v3988_v41 = vpop.f32.mrb[51].mxu0  ;;  %v5087_v11 = vadd.f32 %v1184_v10, %v4869_v12 }
 0x6e4   :  { %973 = vmax.xlane.f32.xlu1 %v972_v45  ;;  %v1202_v13 = vsel %vm511_vm10, %v5087_v11, -inf }
 0x6e6   :  { %964 = vmax.xlane.f32.xlu0 %v963_v43 }
 0x6e8   :  { %1194 = vmax.xlane.f32.xlu1 %v1193_v52 }
 0x6ea   :  { %970 = vmax.xlane.f32.xlu0 %v969_v59 }
 0x6ec   :  { %1200 = vmax.xlane.f32.xlu1 %v1199_v60 }
 0x6ee   :  { %1191 = vmax.xlane.f32.xlu0 %v1190_v62 }
 0x6f2   :  { %1197 = vmax.xlane.f32.xlu0 %v1196_v8 }
 0x6fd   :  { %1018 = vrot.lane.b32.xlu1 %v4811_v23, %s4603_s13 }
 0x708   :  { %1020 = vrot.lane.b32.xlu0 %v4815_v27, %s4603_s13 }
 0x727   :  { %1203 = vmax.xlane.f32.xlu0 %v1202_v13 }
 0x732   :  { %v732_v19 = vpop.xlane.xlu0 %731 }
 0x733   :  { %v745_v6 = vsub.f32 %v5009_v22, %v732_v19 }
 0x734   :  { %v735_v20 = vpop.xlane.xlu1 %734 }
 0x735   :  { %v750_v21 = vmul.f32 1.442695, %v745_v6  ;;  %v746_v14 = vsub.f32 %v5014_v24, %v735_v20 }
 0x736   :  { %v793_v32 = vpop.permute.xlu0 %792 }
 0x737   :  { %4383 = vpow2.f32 %v750_v21  ;;  %v752_v26 = vmul.f32 1.442695, %v746_v14  ;;  %v806_v33 = vsel %vm127_vm2, %v793_v32, 0 }
 0x738   :  { %v791_v29 = vpop.permute.xlu1 %790 }
 0x739   :  { %4385 = vpow2.f32 %v752_v26  ;;  %3920 = vmatpush3.bf16.msra.mxu1 %v791_v29 }
 0x73a   :  { %3921 = vmatprep.subr.bf16.mxu1 %v4591_v28 }
 0x73d   :  { %3922 = vmatpush3.bf16.msra.mxu1 %v806_v33 }
 0x73e   :  { %3953 = vmatprep.subr.bf16.mxu1 %v4591_v28 }
 0x741   :  { %v5096_v34 = vpop.eup %4383 }
 0x742   :  { %v760_v22 = vsel %vm498_vm0, %v5096_v34, 0.0 }
 0x743   :  { %v5100_v36 = vpop.eup %4385  ;;  %761 = vadd.xlane.f32.xlu1 %v760_v22 }
 0x744   :  { %v763_v24 = vsel %vm498_vm0, %v5100_v36, 0.0 }
 0x745   :  { %764 = vadd.xlane.f32.xlu0 %v763_v24 }
 0x767   :  { %v738_v37 = vpop.xlane.xlu0 %737 }
 0x768   :  { %v747_v38 = vsub.f32 %v5023_v63, %v738_v37 }
 0x769   :  { %v962_v39 = vpop.xlane.xlu1 %961 }
 0x76a   :  { %v754_v41 = vmul.f32 1.442695, %v747_v38  ;;  %v975_v50 = vsub.f32 %v5026_v5, %v962_v39 }
 0x76b   :  { %v741_v42 = vpop.xlane.xlu0 %740 }
 0x76c   :  { %4387 = vpow2.f32 %v754_v41  ;;  %v748_v45 = vsub.f32 %v5031_v18, %v741_v42  ;;  %v980_v60 = vmul.f32 1.442695, %v975_v50 }
 0x76d   :  { %v968_v52 = vpop.xlane.xlu1 %967 }
 0x76e   :  { %v756_v43 = vmul.f32 1.442695, %v748_v45  ;;  %v977_v62 = vsub.f32 %v5036_v25, %v968_v52 }
 0x76f   :  { %v744_v57 = vpop.xlane.xlu0 %743 }
 0x770   :  { %4389 = vpow2.f32 %v756_v43  ;;  %v749_v59 = vsub.f32 %v5041_v30, %v744_v57  ;;  %v984_v19 = vmul.f32 1.442695, %v977_v62 }
 0x771   :  { %v974_v63 = vpop.xlane.xlu1 %973 }
 0x772   :  { %v758_v8 = vmul.f32 1.442695, %v749_v59  ;;  %v979_v25 = vsub.f32 %v5046_v35, %v974_v63 }
 0x773   :  { %v965_v10 = vpop.xlane.xlu0 %964 }
 0x774   :  { %4391 = vpow2.f32 %v758_v8  ;;  %v988_v32 = vmul.f32 1.442695, %v979_v25  ;;  %v976_v63 = vsub.f32 %v5051_v40, %v965_v10 }
 0x775   :  { %4393 = vpow2.f32 %v980_v60  ;;  %v1195_v21 = vpop.xlane.xlu1 %1194 }
 0x776   :  { %v5109_v13 = vpop.eup %4387  ;;  %4395 = vpow2.f32 %v984_v19  ;;  %v1206_v33 = vsub.f32 %v5056_v48, %v1195_v21 }
 0x777   :  { %v971_v18 = vpop.xlane.xlu0 %970  ;;  %v766_v5 = vsel %vm498_vm0, %v5109_v13, 0.0 }
 0x778   :  { %v978_v6 = vsub.f32 %v5061_v51, %v971_v18  ;;  %767 = vadd.xlane.f32.xlu1 %v766_v5  ;;  %v1212_v35 = vmul.f32 1.442695, %v1206_v33  ;;  %v982_v18 = vmul.f32 1.442695, %v976_v63 }
 0x779   :  { %v1201_v38 = vpop.xlane.xlu1 %1200 }
 0x77a   :  { %v5114_v20 = vpop.eup %4389  ;;  %v986_v30 = vmul.f32 1.442695, %v978_v6  ;;  %v1208_v48 = vsub.f32 %v5066_v53, %v1201_v38 }
 0x77b   :  { %v1192_v14 = vpop.xlane.xlu0 %1191  ;;  %v769_v26 = vsel %vm498_vm0, %v5114_v20, 0.0 }
 0x77c   :  { %770 = vadd.xlane.f32.xlu0 %v769_v26  ;;  %4397 = vpow2.f32 %v986_v30  ;;  %v1216_v43 = vmul.f32 1.442695, %v1208_v48  ;;  %v1205_v5 = vsub.f32 %v5071_v15, %v1192_v14 }
 0x77d   :  { %4399 = vpow2.f32 %v988_v32  ;;  %v1019_v21 = vpop.permute.xlu1 %1018 }
 0x77e   :  { %v5119_v29 = vpop.eup %4391  ;;  %4401 = vpow2.f32 %v1212_v35  ;;  %v1210_v6 = vmul.f32 1.442695, %v1205_v5 }
 0x77f   :  { %v1198_v51 = vpop.xlane.xlu0 %1197  ;;  %v772_v22 = vsel %vm511_vm10, %v5119_v29, 0.0  ;;  %v5124_v24 = vpop.eup %4393 }
 0x780   :  { %773 = vadd.xlane.f32.xlu1 %v772_v22  ;;  %v1207_v37 = vsub.f32 %v5078_v2, %v1198_v51  ;;  %v990_v39 = vsel %vm498_vm0, %v5124_v24, 0.0  ;;  %v5129_v41 = vpop.eup %4395 }
 0x781   :  { %v996_v45 = vsel %vm498_vm0, %v5129_v41, 0.0 }
 0x782   :  { %v1214_v42 = vmul.f32 1.442695, %v1207_v37 }
 0x783   :  { %v1021_v15 = vpop.permute.xlu0 %1020 }
 0x784   :  { %991 = vadd.xlane.f32.xlu1 %v990_v39  ;;  %4403 = vpow2.f32 %v1214_v42 }
 0x785   :  { %4405 = vpow2.f32 %v1216_v43 }
 0x786   :  { %v5134_v50 = vpop.eup %4397  ;;  %4407 = vpow2.f32 %v982_v18 }
 0x787   :  { %v999_v2 = vsel %vm498_vm0, %v5134_v50, 0.0  ;;  %v5138_v52 = vpop.eup %4399  ;;  %4409 = vpow2.f32 %v1210_v6 }
 0x788   :  { %997 = vadd.xlane.f32.xlu1 %v996_v45  ;;  %v1002_v57 = vsel %vm511_vm10, %v5138_v52, 0.0  ;;  %v5142_v53 = vpop.eup %4401 }
 0x789   :  { %v1223_v59 = vsel %vm498_vm0, %v5142_v53, 0.0 }
 0x78c   :  { %1000 = vadd.xlane.f32.xlu1 %v999_v2 }
 0x78e   :  { %v5148_v60 = vpop.eup %4403 }
 0x78f   :  { %v1226_v62 = vsel %vm498_vm0, %v5148_v60, 0.0  ;;  %v5152_v8 = vpop.eup %4405 }
 0x790   :  { %1003 = vadd.xlane.f32.xlu1 %v1002_v57  ;;  %v1229_v19 = vsel %vm498_vm0, %v5152_v8, 0.0  ;;  %v5158_v25 = vpop.eup %4407 }
 0x791   :  { %v993_v30 = vsel %vm498_vm0, %v5158_v25, 0.0  ;;  %v5164_v40 = vpop.eup %4409 }
 0x792   :  { %1022 = vrot.lane.b32.xlu0 %v4819_v31, %s4603_s13  ;;  %v1220_v10 = vsel %vm498_vm0, %v5164_v40, 0.0 }
 0x794   :  { %1224 = vadd.xlane.f32.xlu1 %v1223_v59 }
 0x798   :  { %1227 = vadd.xlane.f32.xlu1 %v1226_v62 }
 0x79c   :  { %1230 = vadd.xlane.f32.xlu1 %v1229_v19 }
 0x7ad   :  { %1248 = vrot.lane.b32.xlu1 %v4811_v23, %s4604_s0 }
 0x7b1   :  { %994 = vadd.xlane.f32.xlu0 %v993_v30 }
 0x7b4   :  { %v1204_v14 = vpop.xlane.xlu0 %1203 }
 0x7b5   :  { %1221 = vadd.xlane.f32.xlu0 %v1220_v10  ;;  %v1209_v32 = vsub.f32 %v5087_v11, %v1204_v14 }
 0x7b7   :  { %v1218_v51 = vmul.f32 1.442695, %v1209_v32 }
 0x7cb   :  { %1250 = vrot.lane.b32.xlu0 %v4815_v27, %s4604_s0 }
 0x7cf   :  { %1252 = vrot.lane.b32.xlu0 %v4819_v31, %s4604_s0 }
 0x7d0   :  { %v762_v23 = vpop.xlane.xlu1 %761 }
 0x7d1   :  { %4411 = vrcp.f32 %v762_v23 }
 0x7d2   :  { %v765_v26 = vpop.xlane.xlu0 %764 }
 0x7d3   :  { %4413 = vrcp.f32 %v765_v26 }
 0x7d4   :  { %4415 = vpow2.f32 %v1218_v51 }
 0x7db   :  { %v4412_v33 = vpop.eup %4411 }
 0x7dc   :  { %v776_v35 = vmul.f32 %v4412_v33, %v5096_v34 }
 0x7dd   :  { %v4414_v22 = vpop.eup %4413 }
 0x7de   :  { %v778_v37 = vmul.f32 %v4414_v22, %v5100_v36  ;;  %v5180_v31 = vpop.eup %4415 }
 0x7df   :  { %v1232_v11 = vsel %vm511_vm10, %v5180_v31, 0.0 }
 0x7e0   :  { %v785_v27 = vpack.c.bf16 %v778_v37, %v776_v35 }
 0x7e2   :  { %3924 = vmatmul.mubr.msk.bf16.vlgmr.msra.gmra.mrb[24].mxu1 %vm498_vm0, %v785_v27 }
 0x7e3   :  { %3954 = vmatpush3.bf16.msra.mxu1 %v1019_v21  ;;  %3927 = vmatprep.mubr.msk.bf16.mxu1 %vm4592_vm7, %v4591_v28 }
 0x7e4   :  { %3955 = vmatprep.subr.bf16.mxu1 %v4591_v28 }
 0x7e7   :  { %3956 = vmatpush3.bf16.msra.mxu1 %v1021_v15 }
 0x7e8   :  { %3957 = vmatprep.subr.bf16.mxu1 %v4591_v28 }
 0x7ee   :  { %1233 = vadd.xlane.f32.xlu0 %v1232_v11 }
 0x805   :  { %v768_v34 = vpop.xlane.xlu1 %767 }
 0x806   :  { %4417 = vrcp.f32 %v768_v34 }
 0x809   :  { %v771_v36 = vpop.xlane.xlu0 %770 }
 0x80a   :  { %4419 = vrcp.f32 %v771_v36 }
 0x80d   :  { %v1023_v38 = vpop.permute.xlu0 %1022  ;;  %v774_v39 = vpop.xlane.xlu1 %773 }
 0x80e   :  { %v1036_v48 = vsel %vm127_vm2, %v1023_v38, 0  ;;  %4421 = vrcp.f32 %v774_v39 }
 0x80f   :  { %3958 = vmatpush3.bf16.msra.mxu1 %v1036_v48 }
 0x810   :  { %3989 = vmatprep.subr.bf16.mxu1 %v4591_v28  ;;  %v4418_v42 = vpop.eup %4417 }
 0x811   :  { %v780_v43 = vmul.f32 %v4418_v42, %v5109_v13  ;;  %v992_v19 = vpop.xlane.xlu1 %991 }
 0x812   :  { %4423 = vrcp.f32 %v992_v19 }
 0x814   :  { %v4420_v45 = vpop.eup %4419 }
 0x815   :  { %v782_v2 = vmul.f32 %v4420_v45, %v5114_v20  ;;  %v998_v18 = vpop.xlane.xlu1 %997 }
 0x817   :  { %v786_v57 = vpack.c.bf16 %v782_v2, %v780_v43 }
 0x818   :  { %v4422_v59 = vpop.eup %4421 }
 0x819   :  { %3928 = vmatmul.mubr.msk.bf16.gmra.mrb[28].mxu1 %vm498_vm0, %v786_v57  ;;  %v784_v62 = vmul.f32 %v4422_v59, %v5119_v29  ;;  %v1001_v13 = vpop.xlane.xlu1 %1000 }
 0x81a   :  { %3931 = vmatprep.mubr.msk.bf16.mxu1 %vm4592_vm7, %v4591_v28 }
 0x81b   :  { %v787_v63 = vpack.c.bf16 %v784_v62, %v784_v62 }
 0x81c   :  { %v4424_v10 = vpop.eup %4423 }
 0x81d   :  { %v1004_v5 = vpop.xlane.xlu1 %1003  ;;  %v1006_v14 = vmul.f32 %v4424_v10, %v5124_v24 }
 0x821   :  { %3932 = vmatmul.mubr.msk.bf16.gmra.mrb[32].mxu1 %vm498_vm0, %v787_v63  ;;  %v1225_v20 = vpop.xlane.xlu1 %1224 }
 0x822   :  { %3959 = vmatprep.mubr.msk.bf16.mxu1 %vm4592_vm7, %v4591_v28 }
 0x825   :  { %v1228_v30 = vpop.xlane.xlu1 %1227 }
 0x829   :  { %v1231_v29 = vpop.xlane.xlu1 %1230 }
 0x82d   :  { %v1249_v51 = vpop.permute.xlu1 %1248 }
 0x83e   :  { %v995_v6 = vpop.xlane.xlu0 %994 }
 0x83f   :  { %4425 = vrcp.f32 %v995_v6 }
 0x840   :  { %4427 = vrcp.f32 %v1001_v13 }
 0x841   :  { %4429 = vrcp.f32 %v998_v18 }
 0x842   :  { %v1222_v15 = vpop.xlane.xlu0 %1221  ;;  %4431 = vrcp.f32 %v1004_v5 }
 0x843   :  { %4433 = vrcp.f32 %v1222_v15 }
 0x844   :  { %4435 = vrcp.f32 %v1225_v20 }
 0x845   :  { %4437 = vrcp.f32 %v1231_v29  ;;  %v1404_v29 = vld [vmem:[%s6223_s5] sm:$0xff] }
 0x846   :  { %v1251_v33 = vpop.permute.xlu0 %1250  ;;  %4439 = vrcp.f32 %v1228_v30 }
 0x849   :  { %v4426_v21 = vpop.eup %4425 }
 0x84a   :  { %v1008_v23 = vmul.f32 %v4426_v21, %v5158_v25  ;;  %v4428_v32 = vpop.eup %4427  ;;  %v1253_v25 = vpop.permute.xlu0 %1252  ;;  %v1405_v21 = vld [vmem:[%s6223_s5 + $0x8] sm:$0xff] }
 0x84b   :  { %v4430_v22 = vpop.eup %4429  ;;  %v1012_v35 = vmul.f32 %v4428_v32, %v5134_v50  ;;  %v1266_v11 = vsel %vm127_vm2, %v1253_v25, 0 }
 0x84c   :  { %v1015_v26 = vpack.c.bf16 %v1008_v23, %v1006_v14  ;;  %v1010_v24 = vmul.f32 %v4430_v22, %v5129_v41  ;;  %v4432_v27 = vpop.eup %4431  ;;  %v1408_v14 = vpack.c.bf16 %v1405_v21, %v1404_v29  ;;  %v1406_v22 = vld [vmem:[%s6223_s5 + $0x10] sm:$0xff] }
 0x84d   :  { %v1014_v50 = vmul.f32 %v4432_v27, %v5138_v52  ;;  %v4434_v34 = vpop.eup %4433 }
 0x84e   :  { %3960 = vmatmul.mubr.msk.bf16.vlgmr.msra.gmra.mrb[36].mxu1 %vm498_vm0, %v1015_v26  ;;  %v1016_v37 = vpack.c.bf16 %v1012_v35, %v1010_v24  ;;  %v4436_v36 = vpop.eup %4435  ;;  %v1236_v38 = vmul.f32 %v4434_v34, %v5164_v40  ;;  %4008 = vmatpush3.bf16.msra.mxu0 %v1408_v14  ;;  %v1407_v35 = vld [vmem:[%s6223_s5 + $0x18] sm:$0xff] }
 0x84f   :  { %3990 = vmatpush3.bf16.msra.mxu1 %v1249_v51  ;;  %3963 = vmatprep.mubr.msk.bf16.mxu1 %vm4592_vm7, %v4591_v28  ;;  %v1017_v41 = vpack.c.bf16 %v1014_v50, %v1014_v50  ;;  %v1238_v39 = vmul.f32 %v4436_v36, %v5142_v53  ;;  %v4438_v42 = vpop.eup %4437  ;;  %v1409_v24 = vpack.c.bf16 %v1407_v35, %v1406_v22 }
 0x850   :  { %3991 = vmatprep.subr.bf16.mxu1 %v4591_v28  ;;  %v4440_v52 = vpop.eup %4439  ;;  %v1242_v45 = vmul.f32 %v4438_v42, %v5152_v8  ;;  %4009 = vmatprep.subr.bf16.mxu0 %v4591_v28 }
 0x851   :  { %v1245_v48 = vpack.c.bf16 %v1238_v39, %v1236_v38  ;;  %v1240_v43 = vmul.f32 %v4440_v52, %v5148_v60 }
 0x852   :  { %4010 = vmatpush3.bf16.msra.mxu0 %v1409_v24 }
 0x853   :  { %3992 = vmatpush3.bf16.msra.mxu1 %v1251_v33  ;;  %v1246_v2 = vpack.c.bf16 %v1242_v45, %v1240_v43  ;;  %4039 = vmatprep.subr.bf16.mxu0 %v4591_v28 }
 0x854   :  { %3993 = vmatprep.subr.bf16.mxu1 %v4591_v28 }
 0x856   :  { %3964 = vmatmul.mubr.msk.bf16.gmra.mrb[40].mxu1 %vm498_vm0, %v1016_v37 }
 0x857   :  { %3994 = vmatpush3.bf16.msra.mxu1 %v1266_v11  ;;  %3967 = vmatprep.mubr.msk.bf16.mxu1 %vm4592_vm7, %v4591_v28 }
 0x858   :  { %4271 = vmatprep.subr.bf16.mxu1 %v4591_v28 }
 0x85e   :  { %3968 = vmatmul.mubr.msk.bf16.gmra.mrb[44].mxu1 %vm498_vm0, %v1017_v41 }
 0x85f   :  { %3995 = vmatprep.mubr.msk.bf16.mxu1 %vm4592_vm7, %v4591_v28 }
 0x866   :  { %3996 = vmatmul.mubr.msk.bf16.vlgmr.msra.gmra.mrb[48].mxu1 %vm498_vm0, %v1245_v48 }
 0x867   :  { %3999 = vmatprep.mubr.msk.bf16.mxu1 %vm4592_vm7, %v4591_v28  ;;  %4273 = vmatpush3.bf16.msra.mxu1 %v1408_v14 }
 0x868   :  { %4272 = vmatprep.subr.bf16.mxu1 %v4591_v28 }
 0x86b   :  { %4274 = vmatpush3.bf16.msra.mxu1 %v1409_v24 }
 0x86c   :  { %4023 = vmatprep.subr.bf16.mxu1 %v4591_v28 }
 0x86e   :  { %4000 = vmatmul.mubr.msk.bf16.gmra.mrb[52].mxu1 %vm498_vm0, %v1246_v2 }
 0x86f   :  { %4003 = vmatprep.mubr.msk.bf16.mxu1 %vm4592_vm7, %v4591_v28 }
 0x87b   :  { %v1234_v40 = vpop.xlane.xlu0 %1233 }
 0x87c   :  { %4441 = vrcp.f32 %v1234_v40 }
 0x886   :  { %v4442_v53 = vpop.eup %4441 }
 0x887   :  { %v1244_v57 = vmul.f32 %v4442_v53, %v5180_v31 }
 0x889   :  { %v1247_v59 = vpack.c.bf16 %v1244_v57, %v1244_v57 }
 0x88b   :  { %4004 = vmatmul.mubr.msk.bf16.gmra.mrb[56].mxu1 %vm498_vm0, %v1247_v59 }
 0x88c   :  { %4019 = vmatprep.mubr.msk.bf16.mxu1 %vm4592_vm7, %v4591_v28 }
 0x8b5   :  { %v842_v8 = vpop.f32.mrb[24].mxu1 }
 0x8b6   :  { %v3925_v62 = vpop.f32.mrb[25].mxu1 }
 0x8b7   :  { %v845_v60 = vpop.f32.mrb[26].mxu1 }
 0x8b8   :  { %v4293_v63 = vpack.i.bf16 %v845_v60, %v842_v8  ;;  %v3926_v19 = vpop.f32.mrb[27].mxu1 }
 0x8ba   :  { %4294 = vrot.lane.b32.xlu1 %v4293_v63, %s4605_s14 }
 0x8ec   :  { %v850_v18 = vpop.f32.mrb[28].mxu1 }
 0x8ed   :  { %v3929_v13 = vpop.f32.mrb[29].mxu1 }
 0x8ee   :  { %v853_v5 = vpop.f32.mrb[30].mxu1 }
 0x8ef   :  { %v4298_v20 = vpack.i.bf16 %v853_v5, %v850_v18  ;;  %v3930_v6 = vpop.f32.mrb[31].mxu1 }
 0x8f1   :  { %4299 = vrot.lane.b32.xlu1 %v4298_v20, %s4605_s14 }
 0x8f4   :  { %v858_v31 = vpop.f32.mrb[32].mxu1 }
 0x8f5   :  { %v3933_v30 = vpop.f32.mrb[33].mxu1 }
 0x8f6   :  { %v861_v10 = vpop.f32.mrb[34].mxu1 }
 0x8f7   :  { %v3934_v15 = vpop.f32.mrb[35].mxu1 }
 0x921   :  { %v1072_v23 = vpop.f32.mrb[36].mxu1 }
 0x922   :  { %v3961_v26 = vpop.f32.mrb[37].mxu1 }
 0x923   :  { %v1075_v32 = vpop.f32.mrb[38].mxu1 }
 0x924   :  { %v4303_v33 = vpack.i.bf16 %v1075_v32, %v1072_v23  ;;  %v3962_v51 = vpop.f32.mrb[39].mxu1 }
 0x926   :  { %4304 = vrot.lane.b32.xlu1 %v4303_v33, %s4606_s23 }
 0x929   :  { %v1080_v25 = vpop.f32.mrb[40].mxu1 }
 0x92a   :  { %v3965_v37 = vpop.f32.mrb[41].mxu1 }
 0x92b   :  { %v1083_v27 = vpop.f32.mrb[42].mxu1 }
 0x92c   :  { %v4313_v11 = vpack.i.bf16 %v1083_v27, %v1080_v25  ;;  %v3966_v50 = vpop.f32.mrb[43].mxu1  ;;  %v4295_v63 = vpop.permute.xlu1 %4294 }
 0x92d   :  { %v4297_v13 = vunpack.i.h.bf16 %v4295_v63  ;;  %v4296_v5 = vunpack.i.l.bf16 %v4295_v63 }
 0x92f   :  { %v1385_v10 = vsel %vm413_vm8, %v5000_v0, %v4297_v13 }
 0x931   :  { %v1088_v41 = vpop.f32.mrb[44].mxu1 }
 0x932   :  { %1357 = vrot.lane.b32.xlu0 %v1088_v41, %s4606_s23  ;;  %v3969_v34 = vpop.f32.mrb[45].mxu1 }
 0x933   :  { %v1091_v36 = vpop.f32.mrb[46].mxu1 }
 0x934   :  { %v3970_v38 = vpop.f32.mrb[47].mxu1 }
 0x939   :  { %v1302_v39 = vpop.f32.mrb[48].mxu1 }
 0x93a   :  { %v3997_v48 = vpop.f32.mrb[49].mxu1 }
 0x93b   :  { %v1305_v42 = vpop.f32.mrb[50].mxu1 }
 0x93c   :  { %v4308_v52 = vpack.i.bf16 %v1305_v42, %v1302_v39  ;;  %v3998_v45 = vpop.f32.mrb[51].mxu1 }
 0x93d   :  { %v5284_v45 = vld [vmem:[%s6221_s3 + $0x18] sm:$0xff] }
 0x93e   :  { %4309 = vrot.lane.b32.xlu1 %v4308_v52, %s4607_s24 }
 0x941   :  { %v1310_v43 = vpop.f32.mrb[52].mxu1 }
 0x942   :  { %4314 = vrot.lane.b32.xlu1 %v4313_v11, %s4606_s23  ;;  %v4001_v2 = vpop.f32.mrb[53].mxu1 }
 0x943   :  { %v1313_v40 = vpop.f32.mrb[54].mxu1 }
 0x944   :  { %v4318_v53 = vpack.i.bf16 %v1313_v40, %v1310_v43  ;;  %v4002_v57 = vpop.f32.mrb[55].mxu1 }
 0x946   :  { %4319 = vrot.lane.b32.xlu1 %v4318_v53, %s4607_s24 }
 0x94a   :  { %1337 = vrot.lane.b32.xlu1 %v858_v31, %s4605_s14  ;;  %v1384_v31 = vsel %vm413_vm8, %v4998_v61, %v4296_v5 }
 0x95e   :  { %v1318_v59 = vpop.f32.mrb[56].mxu1 }
 0x95f   :  { %1377 = vrot.lane.b32.xlu1 %v1318_v59, %s4607_s24  ;;  %v4005_v8 = vpop.f32.mrb[57].mxu1 }
 0x960   :  { %v1321_v62 = vpop.f32.mrb[58].mxu1 }
 0x961   :  { %v4006_v60 = vpop.f32.mrb[59].mxu1 }
 0x963   :  { %v4300_v19 = vpop.permute.xlu1 %4299 }
 0x964   :  { %v4302_v51 = vunpack.i.h.bf16 %v4300_v19  ;;  %v4301_v22 = vunpack.i.l.bf16 %v4300_v19 }
 0x966   :  { %v1387_v0 = vsel %vm413_vm8, %v5004_v7, %v4302_v51  ;;  %v1386_v25 = vsel %vm413_vm8, %v5002_v3, %v4301_v22 }
 0x998   :  { %v4305_v18 = vpop.permute.xlu1 %4304 }
 0x999   :  { %v4307_v20 = vunpack.i.h.bf16 %v4305_v18  ;;  %v4306_v6 = vunpack.i.l.bf16 %v4305_v18 }
 0x99b   :  { %v1391_v21 = vsel %vm1389_vm14, %v1385_v10, %v4307_v20  ;;  %v1390_v14 = vsel %vm1389_vm14, %v1384_v31, %v4306_v6 }
 0x9a4   :  { %v1358_v38 = vpop.permute.xlu0 %1357 }
 0x9b0   :  { %v4310_v30 = vpop.permute.xlu1 %4309 }
 0x9b1   :  { %v4312_v15 = vunpack.i.h.bf16 %v4310_v30  ;;  %v4311_v29 = vunpack.i.l.bf16 %v4310_v30 }
 0x9b3   :  { %v1397_v23 = vsel %vm1395_vm3, %v1391_v21, %v4312_v15  ;;  %v1396_v26 = vsel %vm1395_vm3, %v1390_v14, %v4311_v29 }
 0x9b4   :  { %v1401_v32 = vpack.c.bf16 %v1397_v23, %v1396_v26  ;;  %v4315_v33 = vpop.permute.xlu1 %4314 }
 0x9b5   :  { %v4317_v35 = vunpack.i.h.bf16 %v4315_v33  ;;  %v4316_v24 = vunpack.i.l.bf16 %v4315_v33 }
 0x9b6   :  { %4012 = vmatmul.mubr.msk.bf16.vlgmr.msra.gmra.mrb[52].mxu0 %vm241_vm4, %v1401_v32 }
 0x9b7   :  { %4015 = vmatprep.mubr.msk.bf16.mxu0 %vm4592_vm7, %v4591_v28  ;;  %v1393_v11 = vsel %vm1389_vm14, %v1387_v0, %v4317_v35  ;;  %v1392_v50 = vsel %vm1389_vm14, %v1386_v25, %v4316_v24 }
 0x9b8   :  { %v4320_v61 = vpop.permute.xlu1 %4319 }
 0x9b9   :  { %v4322_v37 = vunpack.i.h.bf16 %v4320_v61  ;;  %v4321_v27 = vunpack.i.l.bf16 %v4320_v61 }
 0x9bb   :  { %v1399_v41 = vsel %vm1395_vm3, %v1393_v11, %v4322_v37  ;;  %v1398_v34 = vsel %vm1395_vm3, %v1392_v50, %v4321_v27 }
 0x9bc   :  { %v1402_v36 = vpack.c.bf16 %v1399_v41, %v1398_v34  ;;  %v1338_v7 = vpop.permute.xlu1 %1337 }
 0x9bd   :  { %v1388_v3 = vsel %vm413_vm8, %v5006_v9, %v1338_v7  ;;  %v1483_v9 = vrot.slane %v5284_v45, %v4690_v17 }
 0x9be   :  { %4016 = vmatmul.mubr.msk.bf16.gmra.mrb[56].mxu0 %vm241_vm4, %v1402_v36  ;;  %v1394_v39 = vsel %vm1389_vm14, %v1388_v3, %v1358_v38 }
 0x9bf   :  { %4047 = vmatprep.mubr.msk.bf16.mxu0 %vm4592_vm7, %v4591_v28 }
 0x9d1   :  { %v1378_v48 = vpop.permute.xlu1 %1377 }
 0x9d2   :  { %v1400_v42 = vsel %vm1395_vm3, %v1394_v39, %v1378_v48 }
 0x9d3   :  { %v1403_v52 = vpack.c.bf16 %v1400_v42, %v1400_v42 }
 0x9d5   :  { %4020 = vmatmul.mubr.msk.bf16.vlgmr.msra.gmra.mrb[60].mxu1 %vm241_vm4, %v1403_v52  ;;  %v1572_v52 = vld [vmem:[%s6224_s6] sm:$0xff] }
 0x9d6   :  { %4027 = vmatprep.mubr.msk.bf16.mxu1 %vm4592_vm7, %v4591_v28 }
 0xa89   :  { %v1453_v43 = vpop.f32.mrb[52].mxu0 }
 0xa8a   :  { %v1475_v2 = vadd.f32 %v1453_v43, %v4711_v44  ;;  %v4013_v40 = vpop.f32.mrb[53].mxu0 }
 0xa8b   :  { %v1456_v53 = vpop.f32.mrb[54].mxu0  ;;  %v1575_v40 = vld [vmem:[%s6224_s6 + $0x18] sm:$0xff] }
 0xa8c   :  { %v5289_v57 = vadd.f32 %v1483_v9, %v1475_v2  ;;  %v1476_v59 = vadd.f32 %v1456_v53, %v4718_v49  ;;  %v4014_v8 = vpop.f32.mrb[55].mxu0  ;;  %v1574_v2 = vld [vmem:[%s6224_s6 + $0x10] sm:$0xff] }
 0xa8d   :  { %v1581_v53 = vpack.c.bf16 %v1575_v40, %v1574_v2  ;;  %v1807_v2 = vld [vmem:[%s6225_s7 + $0x18] sm:$0xff] }
 0xa8e   :  { %v5292_v62 = vadd.f32 %v1483_v9, %v1476_v59  ;;  %v1489_v60 = vsel %vm241_vm4, %v5289_v57, 0.0 }
 0xa8f   :  { %1490 = vadd.xlane.f32.xlu1 %v1489_v60 }
 0xa90   :  { %v1492_v63 = vsel %vm241_vm4, %v5292_v62, 0.0 }
 0xa91   :  { %1493 = vadd.xlane.f32.xlu0 %v1492_v63  ;;  %v1461_v19 = vpop.f32.mrb[56].mxu0 }
 0xa92   :  { %v1477_v44 = vadd.f32 %v1461_v19, %v4724_v54  ;;  %v4017_v18 = vpop.f32.mrb[57].mxu0 }
 0xa93   :  { %v1464_v13 = vpop.f32.mrb[58].mxu0 }
 0xa94   :  { %v5299_v5 = vadd.f32 %v1483_v9, %v1477_v44  ;;  %v1478_v49 = vadd.f32 %v1464_v13, %v4732_v58  ;;  %v4018_v20 = vpop.f32.mrb[59].mxu0 }
 0xa96   :  { %v5302_v6 = vadd.f32 %v1483_v9, %v1478_v49  ;;  %v1495_v30 = vsel %vm241_vm4, %v5299_v5, 0.0  ;;  %v1556_v49 = vsub.s32 3, %v4687_v16 }
 0xa97   :  { %1496 = vadd.xlane.f32.xlu1 %v1495_v30 }
 0xa98   :  { %v1498_v10 = vsel %vm241_vm4, %v5302_v6, 0.0 }
 0xa9b   :  { %1499 = vadd.xlane.f32.xlu1 %v1498_v10 }
 0xaa8   :  { %v1469_v31 = vpop.f32.mrb[60].mxu1 }
 0xaa9   :  { %v1479_v54 = vadd.f32 %v1469_v31, %v4726_v55  ;;  %v4021_v15 = vpop.f32.mrb[61].mxu1  ;;  %v1557_v31 = vrot.slane %v5284_v45, %v1556_v49 }
 0xaaa   :  { %v1472_v29 = vpop.f32.mrb[62].mxu1 }
 0xaab   :  { %v5309_v21 = vadd.f32 %v1483_v9, %v1479_v54  ;;  %v4022_v14 = vpop.f32.mrb[63].mxu1  ;;  %v1573_v9 = vld [vmem:[%s6224_s6 + $0x8] sm:$0xff]  ;;  %v1565_v54 = vsub.s32 4, %v4687_v16 }
 0xaac   :  { %v1580_v43 = vpack.c.bf16 %v1573_v9, %v1572_v52  ;;  %v1805_v9 = vld [vmem:[%s6225_s7 + $0x8] sm:$0xff] }
 0xaad   :  { %v1501_v58 = vsel %vm254_vm6, %v5309_v21, 0.0 }
 0xaae   :  { %1502 = vadd.xlane.f32.xlu1 %v1501_v58  ;;  %4024 = vmatpush3.bf16.msra.mxu1 %v1580_v43 }
 0xaaf   :  { %4025 = vmatprep.subr.bf16.mxu1 %v4591_v28 }
 0xab2   :  { %4026 = vmatpush3.bf16.msra.mxu1 %v1581_v53  ;;  %v1808_v53 = vld [vmem:[%s6225_s7 + $0x20] sm:$0xff] }
 0xab3   :  { %4059 = vmatprep.subr.bf16.mxu1 %v4591_v28 }
 0xb1c   :  { %v1491_v23 = vpop.xlane.xlu1 %1490 }
 0xb1d   :  { %v1504_v26 = vmul.f32 0.03125, %v1491_v23 }
 0xb1e   :  { %v1494_v32 = vpop.xlane.xlu0 %1493 }
 0xb1f   :  { %v1509_v33 = vsub.f32 %v5289_v57, %v1504_v26  ;;  %v1505_v51 = vmul.f32 0.03125, %v1494_v32  ;;  %v1566_v32 = vrot.slane %v5284_v45, %v1565_v54 }
 0xb21   :  { %v1510_v22 = vsub.f32 %v5292_v62, %v1505_v51  ;;  %v1514_v35 = vmul.f32 %v1509_v33, %v1509_v33 }
 0xb23   :  { %v1519_v55 = vsel %vm241_vm4, %v1514_v35, 0.0  ;;  %v1515_v24 = vmul.f32 %v1510_v22, %v1510_v22 }
 0xb24   :  { %v1497_v61 = vpop.xlane.xlu1 %1496  ;;  %1520 = vadd.xlane.f32.xlu1 %v1519_v55 }
 0xb25   :  { %v1506_v0 = vmul.f32 0.03125, %v1497_v61  ;;  %v1522_v25 = vsel %vm241_vm4, %v1515_v24, 0.0 }
 0xb26   :  { %1523 = vadd.xlane.f32.xlu0 %v1522_v25 }
 0xb27   :  { %v1511_v37 = vsub.f32 %v5299_v5, %v1506_v0 }
 0xb28   :  { %v1500_v27 = vpop.xlane.xlu1 %1499 }
 0xb29   :  { %v1507_v11 = vmul.f32 0.03125, %v1500_v27  ;;  %v1516_v50 = vmul.f32 %v1511_v37, %v1511_v37 }
 0xb2b   :  { %v1512_v41 = vsub.f32 %v5302_v6, %v1507_v11  ;;  %v1525_v34 = vsel %vm241_vm4, %v1516_v50, 0.0 }
 0xb2c   :  { %1526 = vadd.xlane.f32.xlu1 %v1525_v34 }
 0xb2d   :  { %v1517_v36 = vmul.f32 %v1512_v41, %v1512_v41 }
 0xb2f   :  { %v1528_v7 = vsel %vm241_vm4, %v1517_v36, 0.0 }
 0xb30   :  { %1529 = vadd.xlane.f32.xlu0 %v1528_v7 }
 0xb3b   :  { %v1503_v3 = vpop.xlane.xlu1 %1502 }
 0xb3c   :  { %v1508_v38 = vmul.f32 0.03125, %v1503_v3 }
 0xb3e   :  { %v1513_v39 = vsub.f32 %v5309_v21, %v1508_v38 }
 0xb40   :  { %v1518_v48 = vmul.f32 %v1513_v39, %v1513_v39 }
 0xb42   :  { %v1531_v42 = vsel %vm254_vm6, %v1518_v48, 0.0 }
 0xb43   :  { %1532 = vadd.xlane.f32.xlu1 %v1531_v42 }
 0xbb1   :  { %v1521_v59 = vpop.xlane.xlu1 %1520 }
 0xbb2   :  { %v1534_v8 = vmul.f32 0.03125, %v1521_v59  ;;  %v1809_v59 = vld [vmem:[%s6225_s7 + $0x28] sm:$0xff] }
 0xbb3   :  { %v1524_v60 = vpop.xlane.xlu0 %1523 }
 0xbb4   :  { %v1539_v63 = vadd.f32 1e-05, %v1534_v8  ;;  %v1535_v19 = vmul.f32 0.03125, %v1524_v60  ;;  %v1814_v8 = vpack.c.bf16 %v1809_v59, %v1808_v53  ;;  %v1810_v60 = vld [vmem:[%s6225_s7 + $0x30] sm:$0xff] }
 0xbb6   :  { %4443 = vrsqrt.f32 %v1539_v63  ;;  %v1540_v44 = vadd.f32 1e-05, %v1535_v19  ;;  %v1811_v63 = vld [vmem:[%s6225_s7 + $0x38] sm:$0xff] }
 0xbb7   :  { %v1815_v19 = vpack.c.bf16 %v1811_v63, %v1810_v60 }
 0xbb8   :  { %4445 = vrsqrt.f32 %v1540_v44  ;;  %v5385_v44 = vld [vmem:[%s6224_s6 + $0x20] ss:$0 sm:$0xff] }
 0xbb9   :  { %v1527_v18 = vpop.xlane.xlu1 %1526 }
 0xbba   :  { %v1536_v13 = vmul.f32 0.03125, %v1527_v18 }
 0xbbc   :  { %v1541_v20 = vadd.f32 1e-05, %v1536_v13 }
 0xbbd   :  { %v1530_v30 = vpop.xlane.xlu0 %1529 }
 0xbbe   :  { %4447 = vrsqrt.f32 %v1541_v20  ;;  %v1537_v10 = vmul.f32 0.03125, %v1530_v30 }
 0xbc0   :  { %v4444_v15 = vpop.eup %4443  ;;  %v1542_v29 = vadd.f32 1e-05, %v1537_v10 }
 0xbc1   :  { %v1549_v14 = vmul.f32 %v4444_v15, %v1509_v33 }
 0xbc2   :  { %v4446_v58 = vpop.eup %4445  ;;  %4449 = vrsqrt.f32 %v1542_v29 }
 0xbc3   :  { %v1558_v23 = vmul.f32 %v1557_v31, %v1549_v14  ;;  %v1550_v26 = vmul.f32 %v4446_v58, %v1510_v22 }
 0xbc5   :  { %v1559_v51 = vmul.f32 %v1557_v31, %v1550_v26  ;;  %v1567_v35 = vadd.f32 %v1566_v32, %v1558_v23 }
 0xbc7   :  { %v1568_v55 = vadd.f32 %v1566_v32, %v1559_v51 }
 0xbc8   :  { %v4448_v24 = vpop.eup %4447 }
 0xbc9   :  { %v1577_v61 = vpack.c.bf16 %v1568_v55, %v1567_v35  ;;  %v1551_v0 = vmul.f32 %v4448_v24, %v1511_v37 }
 0xbcb   :  { %4028 = vmatmul.mubr.msk.bf16.vlgmr.msra.gmra.mrb[64].mxu1 %vm241_vm4, %v1577_v61  ;;  %v1560_v27 = vmul.f32 %v1557_v31, %v1551_v0 }
 0xbcc   :  { %v4450_v25 = vpop.eup %4449  ;;  %4031 = vmatprep.mubr.msk.bf16.mxu1 %vm4592_vm7, %v4591_v28 }
 0xbcd   :  { %v1552_v33 = vmul.f32 %v4450_v25, %v1512_v41  ;;  %v1569_v34 = vadd.f32 %v1566_v32, %v1560_v27  ;;  %v1804_v41 = vld [vmem:[%s6225_s7] sm:$0xff] }
 0xbce   :  { %v1812_v43 = vpack.c.bf16 %v1805_v9, %v1804_v41 }
 0xbcf   :  { %v1561_v11 = vmul.f32 %v1557_v31, %v1552_v33 }
 0xbd0   :  { %v1533_v22 = vpop.xlane.xlu1 %1532  ;;  %4040 = vmatpush3.bf16.msra.mxu0 %v1812_v43 }
 0xbd1   :  { %v1538_v50 = vmul.f32 0.03125, %v1533_v22  ;;  %v1570_v36 = vadd.f32 %v1566_v32, %v1561_v11  ;;  %4041 = vmatprep.subr.bf16.mxu0 %v4591_v28 }
 0xbd3   :  { %v1543_v7 = vadd.f32 1e-05, %v1538_v50  ;;  %v1578_v3 = vpack.c.bf16 %v1570_v36, %v1569_v34 }
 0xbd5   :  { %4451 = vrsqrt.f32 %v1543_v7  ;;  %4032 = vmatmul.mubr.msk.bf16.gmra.mrb[68].mxu1 %vm241_vm4, %v1578_v3 }
 0xbd6   :  { %4035 = vmatprep.mubr.msk.bf16.mxu1 %vm4592_vm7, %v4591_v28 }
 0xbdf   :  { %v4452_v37 = vpop.eup %4451 }
 0xbe0   :  { %v1553_v38 = vmul.f32 %v4452_v37, %v1513_v39  ;;  %v1806_v39 = vld [vmem:[%s6225_s7 + $0x10] sm:$0xff] }
 0xbe1   :  { %v1813_v40 = vpack.c.bf16 %v1807_v2, %v1806_v39 }
 0xbe2   :  { %v1562_v48 = vmul.f32 %v1557_v31, %v1553_v38 }
 0xbe3   :  { %4042 = vmatpush3.bf16.msra.mxu0 %v1813_v40 }
 0xbe4   :  { %v1571_v42 = vadd.f32 %v1566_v32, %v1562_v48  ;;  %4043 = vmatprep.subr.bf16.mxu0 %v4591_v28 }
 0xbe6   :  { %v1579_v52 = vpack.c.bf16 %v1571_v42, %v1571_v42 }
 0xbe7   :  { %4044 = vmatpush3.bf16.msra.mxu0 %v1814_v8 }
 0xbe8   :  { %4036 = vmatmul.mubr.msk.bf16.gmra.mrb[72].mxu1 %vm241_vm4, %v1579_v52  ;;  %4045 = vmatprep.subr.bf16.mxu0 %v4591_v28 }
 0xbe9   :  { %4063 = vmatprep.mubr.msk.bf16.mxu1 %vm4592_vm7, %v4591_v28 }
 0xbeb   :  { %4046 = vmatpush3.bf16.msra.mxu0 %v1815_v19 }
 0xbec   :  { %4075 = vmatprep.subr.bf16.mxu0 %v4591_v28 }
 0xc9e   :  { %v1629_v18 = vpop.f32.mrb[64].mxu1 }
 0xc9f   :  { %v5388_v13 = vadd.f32 %v5385_v44, %v1629_v18  ;;  %v4029_v20 = vpop.f32.mrb[65].mxu1 }
 0xca0   :  { %v1632_v30 = vpop.f32.mrb[66].mxu1 }
 0xca1   :  { %v1656_v10 = vmul.f32 0.70710677, %v5388_v13  ;;  %v5392_v31 = vadd.f32 %v5385_v44, %v1632_v30  ;;  %v4030_v15 = vpop.f32.mrb[67].mxu1 }
 0xca3   :  { %v5394_v29 = vclamps-f32 %v1656_v10, 4.0  ;;  %v1657_v14 = vmul.f32 0.70710677, %v5392_v31 }
 0xca5   :  { %v5399_v58 = vmul.f32 %v5394_v29, %v5394_v29  ;;  %v5401_v23 = vclamps-f32 %v1657_v14, 4.0 }
 0xca7   :  { %v1676_v26 = vmul.f32 -2.7261424e-10, %v5399_v58  ;;  %v1741_v32 = vmul.f32 -1.45660715e-05, %v5399_v58  ;;  %v5407_v51 = vmul.f32 %v5401_v23, %v5401_v23 }
 0xca8   :  { %v1637_v35 = vpop.f32.mrb[68].mxu1 }
 0xca9   :  { %v1681_v55 = vadd.f32 2.7706815e-08, %v1676_v26  ;;  %v1746_v24 = vadd.f32 -0.00021337405, %v1741_v32  ;;  %v1677_v61 = vmul.f32 -2.7261424e-10, %v5407_v51  ;;  %v5411_v0 = vadd.f32 %v5385_v44, %v1637_v35 }
 0xcaa   :  { %v1742_v25 = vmul.f32 -1.45660715e-05, %v5407_v51  ;;  %v4033_v33 = vpop.f32.mrb[69].mxu1 }
 0xcab   :  { %v1686_v27 = vmul.f32 %v1681_v55, %v5399_v58  ;;  %v1751_v11 = vmul.f32 %v1746_v24, %v5399_v58  ;;  %v1682_v22 = vadd.f32 2.7706815e-08, %v1677_v61  ;;  %v1640_v50 = vpop.f32.mrb[70].mxu1  ;;  %v1658_v36 = vmul.f32 0.70710677, %v5411_v0 }
 0xcac   :  { %v1747_v34 = vadd.f32 -0.00021337405, %v1742_v25  ;;  %v5418_v7 = vadd.f32 %v5385_v44, %v1640_v50  ;;  %v4034_v3 = vpop.f32.mrb[71].mxu1 }
 0xcad   :  { %v1691_v37 = vadd.f32 -2.101024e-06, %v1686_v27  ;;  %v1756_v38 = vadd.f32 -0.001682827, %v1751_v11  ;;  %v1687_v48 = vmul.f32 %v1682_v22, %v5407_v51  ;;  %v5422_v52 = vclamps-f32 %v1658_v36, 4.0 }
 0xcae   :  { %v1752_v42 = vmul.f32 %v1747_v34, %v5407_v51  ;;  %v1659_v41 = vmul.f32 0.70710677, %v5418_v7 }
 0xcaf   :  { %v1696_v9 = vmul.f32 %v1691_v37, %v5399_v58  ;;  %v1761_v43 = vmul.f32 %v1756_v38, %v5399_v58  ;;  %v1692_v39 = vadd.f32 -2.101024e-06, %v1687_v48  ;;  %v5429_v40 = vmul.f32 %v5422_v52, %v5422_v52 }
 0xcb0   :  { %v1757_v2 = vadd.f32 -0.001682827, %v1752_v42  ;;  %v5431_v53 = vclamps-f32 %v1659_v41, 4.0 }
 0xcb1   :  { %v1701_v59 = vadd.f32 -5.6925062e-05, %v1696_v9  ;;  %v1766_v8 = vadd.f32 -0.0073733293, %v1761_v43  ;;  %v1697_v60 = vmul.f32 %v1692_v39, %v5407_v51  ;;  %v1678_v19 = vmul.f32 -2.7261424e-10, %v5429_v40 }
 0xcb2   :  { %v1762_v63 = vmul.f32 %v1757_v2, %v5407_v51  ;;  %v1743_v18 = vmul.f32 -1.45660715e-05, %v5429_v40  ;;  %v5439_v20 = vmul.f32 %v5431_v53, %v5431_v53 }
 0xcb3   :  { %v1706_v30 = vmul.f32 %v1701_v59, %v5399_v58  ;;  %v1771_v10 = vmul.f32 %v1766_v8, %v5399_v58  ;;  %v1702_v15 = vadd.f32 -5.6925062e-05, %v1697_v60  ;;  %v1683_v26 = vadd.f32 2.7706815e-08, %v1678_v19 }
 0xcb4   :  { %v1767_v14 = vadd.f32 -0.0073733293, %v1762_v63  ;;  %v1748_v32 = vadd.f32 -0.00021337405, %v1743_v18  ;;  %v1679_v61 = vmul.f32 -2.7261424e-10, %v5439_v20 }
 0xcb5   :  { %v1711_v35 = vadd.f32 -0.00073499064, %v1706_v30  ;;  %v1776_v55 = vadd.f32 -0.014264739, %v1771_v10  ;;  %v1707_v24 = vmul.f32 %v1702_v15, %v5407_v51  ;;  %v1688_v33 = vmul.f32 %v1683_v26, %v5429_v40 }
 0xcb6   :  { %v1772_v25 = vmul.f32 %v1767_v14, %v5407_v51  ;;  %v1753_v27 = vmul.f32 %v1748_v32, %v5429_v40  ;;  %v1744_v11 = vmul.f32 -1.45660715e-05, %v5439_v20  ;;  %v1684_v34 = vadd.f32 2.7706815e-08, %v1679_v61 }
 0xcb7   :  { %v1716_v22 = vmul.f32 %v1711_v35, %v5399_v58  ;;  %4453 = vrcp.f32 %v1776_v55  ;;  %v1712_v50 = vadd.f32 -0.00073499064, %v1707_v24  ;;  %v1693_v3 = vadd.f32 -2.101024e-06, %v1688_v33 }
 0xcb8   :  { %v1777_v36 = vadd.f32 -0.014264739, %v1772_v25  ;;  %v1758_v37 = vadd.f32 -0.001682827, %v1753_v27  ;;  %v1689_v42 = vmul.f32 %v1684_v34, %v5439_v20  ;;  %v1749_v41 = vadd.f32 -0.00021337405, %v1744_v11 }
 0xcb9   :  { %v1721_v38 = vadd.f32 -0.0029546, %v1716_v22  ;;  %v1717_v48 = vmul.f32 %v1712_v50, %v5407_v51  ;;  %v1698_v9 = vmul.f32 %v1693_v3, %v5429_v40 }
 0xcba   :  { %4455 = vrcp.f32 %v1777_v36  ;;  %v1763_v43 = vmul.f32 %v1758_v37, %v5429_v40  ;;  %v1694_v59 = vadd.f32 -2.101024e-06, %v1689_v42  ;;  %v1754_v8 = vmul.f32 %v1749_v41, %v5439_v20 }
 0xcbb   :  { %v1726_v39 = vmul.f32 %v1721_v38, %v5399_v58  ;;  %v1722_v2 = vadd.f32 -0.0029546, %v1717_v48  ;;  %v1645_v60 = vpop.f32.mrb[72].mxu1  ;;  %v1703_v63 = vadd.f32 -5.6925062e-05, %v1698_v9 }
 0xcbc   :  { %v1768_v19 = vadd.f32 -0.0073733293, %v1763_v43  ;;  %v5457_v18 = vadd.f32 %v5385_v44, %v1645_v60  ;;  %v4037_v30 = vpop.f32.mrb[73].mxu1  ;;  %v1699_v14 = vmul.f32 %v1694_v59, %v5439_v20  ;;  %v1759_v26 = vadd.f32 -0.001682827, %v1754_v8 }
 0xcbd   :  { %v1731_v10 = vadd.f32 -0.016096033, %v1726_v39  ;;  %v1727_v15 = vmul.f32 %v1722_v2, %v5407_v51  ;;  %v1648_v32 = vpop.f32.mrb[74].mxu1  ;;  %v1708_v58 = vmul.f32 %v1703_v63, %v5429_v40  ;;  %v1651_v8 = vmul.f32 0.5, %v5388_v13 }
 0xcbe   :  { %v1773_v35 = vmul.f32 %v1768_v19, %v5429_v40  ;;  %v1660_v55 = vmul.f32 0.70710677, %v5457_v18  ;;  %v4038_v24 = vpop.f32.mrb[75].mxu1  ;;  %v1704_v44 = vadd.f32 -5.6925062e-05, %v1699_v14  ;;  %v1764_v33 = vmul.f32 %v1759_v26, %v5439_v20 }
 0xcbf   :  { %v1736_v61 = vmul.f32 %v5394_v29, %v1731_v10  ;;  %v1732_v25 = vadd.f32 -0.016096033, %v1727_v15  ;;  %v1713_v27 = vadd.f32 -0.00073499064, %v1708_v58  ;;  %v1652_v60 = vmul.f32 0.5, %v5392_v31 }
 0xcc0   :  { %v1778_v11 = vadd.f32 -0.014264739, %v1773_v35  ;;  %v5466_v51 = vclamps-f32 %v1660_v55, 4.0  ;;  %v1709_v34 = vmul.f32 %v1704_v44, %v5439_v20  ;;  %v1769_v36 = vadd.f32 -0.0073733293, %v1764_v33 }
 0xcc1   :  { %v4454_v22 = vpop.eup %4453  ;;  %v1737_v50 = vmul.f32 %v5401_v23, %v1732_v25  ;;  %v1718_v37 = vmul.f32 %v1713_v27, %v5429_v40 }
 0xcc2   :  { %v1782_v3 = vmul.f32 %v4454_v22, %v1736_v61  ;;  %4457 = vrcp.f32 %v1778_v11  ;;  %v1675_v29 = vmul.f32 %v5466_v51, %v5466_v51  ;;  %v1714_v38 = vadd.f32 -0.00073499064, %v1709_v34 }
 0xcc3   :  { %v1774_v48 = vmul.f32 %v1769_v36, %v5439_v20  ;;  %v1723_v9 = vadd.f32 -0.0029546, %v1718_v37 }
 0xcc4   :  { %v4456_v42 = vpop.eup %4455  ;;  %v1791_v41 = vadd.f32 1.0, %v1782_v3  ;;  %v1680_v43 = vmul.f32 -2.7261424e-10, %v1675_v29  ;;  %v1719_v23 = vmul.f32 %v1714_v38, %v5439_v20  ;;  %v1745_v59 = vmul.f32 -1.45660715e-05, %v1675_v29 }
 0xcc5   :  { %v1784_v39 = vmul.f32 %v4456_v42, %v1737_v50  ;;  %v1779_v2 = vadd.f32 -0.014264739, %v1774_v48  ;;  %v1728_v63 = vmul.f32 %v1723_v9, %v5429_v40  ;;  %v1653_v48 = vmul.f32 0.5, %v5411_v0 }
 0xcc6   :  { %v1685_v19 = vadd.f32 2.7706815e-08, %v1680_v43  ;;  %v1724_v10 = vadd.f32 -0.0029546, %v1719_v23  ;;  %v1750_v15 = vadd.f32 -0.00021337405, %v1745_v59  ;;  %v1796_v32 = vmul.f32 %v1791_v41, %v1651_v8 }
 0xcc7   :  { %v1792_v30 = vadd.f32 1.0, %v1784_v39  ;;  %4459 = vrcp.f32 %v1779_v2  ;;  %v1733_v14 = vadd.f32 -0.016096033, %v1728_v63  ;;  %v1654_v42 = vmul.f32 0.5, %v5418_v7 }
 0xcc8   :  { %v1690_v26 = vmul.f32 %v1685_v19, %v1675_v29  ;;  %v1729_v35 = vmul.f32 %v1724_v10, %v5439_v20  ;;  %v1755_v55 = vmul.f32 %v1750_v15, %v1675_v29  ;;  %v1655_v7 = vmul.f32 0.5, %v5457_v18 }
 0xcc9   :  { %v1797_v58 = vmul.f32 %v1792_v30, %v1652_v60  ;;  %v1738_v24 = vmul.f32 %v5422_v52, %v1733_v14 }
 0xcca   :  { %v1695_v61 = vadd.f32 -2.101024e-06, %v1690_v26  ;;  %v1734_v31 = vadd.f32 -0.016096033, %v1729_v35  ;;  %v1760_v25 = vadd.f32 -0.001682827, %v1755_v55 }
 0xccb   :  { %v1801_v13 = vpack.c.bf16 %v1797_v58, %v1796_v32 }
 0xccc   :  { %v4458_v40 = vpop.eup %4457  ;;  %v1700_v44 = vmul.f32 %v1695_v61, %v1675_v29  ;;  %v1765_v33 = vmul.f32 %v1760_v25, %v1675_v29  ;;  %v1739_v11 = vmul.f32 %v5431_v53, %v1734_v31 }
 0xccd   :  { %4048 = vmatmul.mubr.msk.bf16.vlgmr.msra.gmra.mrb[60].mxu0 %vm1816_vm9, %v1801_v13  ;;  %v1786_v27 = vmul.f32 %v4458_v40, %v1738_v24 }
 0xcce   :  { %v1705_v22 = vadd.f32 -5.6925062e-05, %v1700_v44  ;;  %4051 = vmatprep.mubr.msk.bf16.mxu0 %vm4592_vm7, %v4591_v28  ;;  %v1770_v20 = vadd.f32 -0.0073733293, %v1765_v33 }
 0xccf   :  { %v1793_v36 = vadd.f32 1.0, %v1786_v27 }
 0xcd0   :  { %v1710_v50 = vmul.f32 %v1705_v22, %v1675_v29  ;;  %v1775_v34 = vmul.f32 %v1770_v20, %v1675_v29 }
 0xcd1   :  { %v4460_v52 = vpop.eup %4459  ;;  %v1798_v53 = vmul.f32 %v1793_v36, %v1653_v48 }
 0xcd2   :  { %v1788_v3 = vmul.f32 %v4460_v52, %v1739_v11  ;;  %v1715_v37 = vadd.f32 -0.00073499064, %v1710_v50  ;;  %v1780_v38 = vadd.f32 -0.014264739, %v1775_v34 }
 0xcd4   :  { %v1794_v41 = vadd.f32 1.0, %v1788_v3  ;;  %v1720_v9 = vmul.f32 %v1715_v37, %v1675_v29  ;;  %4461 = vrcp.f32 %v1780_v38 }
 0xcd6   :  { %v1799_v43 = vmul.f32 %v1794_v41, %v1654_v42  ;;  %v1725_v39 = vadd.f32 -0.0029546, %v1720_v9 }
 0xcd8   :  { %v1802_v23 = vpack.c.bf16 %v1799_v43, %v1798_v53  ;;  %v1730_v2 = vmul.f32 %v1725_v39, %v1675_v29  ;;  %v1889_v29 = vsub.s32 5, %v4687_v16 }
 0xcda   :  { %v1735_v59 = vadd.f32 -0.016096033, %v1730_v2  ;;  %4052 = vmatmul.mubr.msk.bf16.gmra.mrb[64].mxu0 %vm1816_vm9, %v1802_v23  ;;  %v1890_v10 = vrot.slane %v5284_v45, %v1889_v29 }
 0xcdb   :  { %4055 = vmatprep.mubr.msk.bf16.mxu0 %vm4592_vm7, %v4591_v28 }
 0xcdc   :  { %v1740_v8 = vmul.f32 %v5466_v51, %v1735_v59 }
 0xcde   :  { %v4462_v60 = vpop.eup %4461 }
 0xcdf   :  { %v1790_v0 = vmul.f32 %v4462_v60, %v1740_v8 }
 0xce1   :  { %v1795_v63 = vadd.f32 1.0, %v1790_v0 }
 0xce3   :  { %v1800_v19 = vmul.f32 %v1795_v63, %v1655_v7 }
 0xce5   :  { %v1803_v30 = vpack.c.bf16 %v1800_v19, %v1800_v19 }
 0xce7   :  { %4056 = vmatmul.mubr.msk.bf16.gmra.mrb[68].mxu0 %vm1816_vm9, %v1803_v30 }
 0xce8   :  { %4081 = vmatprep.mubr.msk.bf16.mxu0 %vm4592_vm7, %v4591_v28 }
 0xda0   :  { %v1860_v15 = vpop.f32.mrb[60].mxu0 }
 0xda1   :  { %v1882_v51 = vadd.f32 %v1860_v15, %v5289_v57  ;;  %v4049_v14 = vpop.f32.mrb[61].mxu0 }
 0xda2   :  { %v1863_v26 = vpop.f32.mrb[62].mxu0  ;;  %v3630_v14 = vld [vmem:[%s6222_s4 + $0x28] sm:$0xff] }
 0xda3   :  { %v5499_v18 = vadd.f32 %v1890_v10, %v1882_v51  ;;  %v1883_v32 = vadd.f32 %v1863_v26, %v5292_v62  ;;  %v4050_v58 = vpop.f32.mrb[63].mxu0  ;;  %v3629_v51 = vld [vmem:[%s6222_s4 + $0x20] sm:$0xff] }
 0xda4   :  { %v1987_v26 = vpack.c.bf16 %v3630_v14, %v3629_v51  ;;  %v3632_v58 = vld [vmem:[%s6222_s4 + $0x38] sm:$0xff] }
 0xda5   :  { %v5502_v35 = vadd.f32 %v1890_v10, %v1883_v32  ;;  %v1896_v55 = vsel %vm241_vm4, %v5499_v18, 0.0  ;;  %v3631_v32 = vld [vmem:[%s6222_s4 + $0x30] sm:$0xff] }
 0xda6   :  { %1897 = vadd.xlane.f32.xlu0 %v1896_v55  ;;  %4060 = vmatpush3.bf16.msra.mxu1 %v1987_v26  ;;  %v1988_v55 = vpack.c.bf16 %v3632_v58, %v3631_v32 }
 0xda7   :  { %v1899_v24 = vsel %vm241_vm4, %v5502_v35, 0.0  ;;  %4061 = vmatprep.subr.bf16.mxu1 %v4591_v28 }
 0xda8   :  { %1900 = vadd.xlane.f32.xlu1 %v1899_v24 }
 0xdaa   :  { %4062 = vmatpush3.bf16.msra.mxu1 %v1988_v55 }
 0xdab   :  { %4093 = vmatprep.subr.bf16.mxu1 %v4591_v28 }
 0xdad   :  { %v1868_v61 = vpop.f32.mrb[64].mxu0 }
 0xdae   :  { %v1884_v57 = vadd.f32 %v1868_v61, %v5299_v5  ;;  %v4053_v13 = vpop.f32.mrb[65].mxu0 }
 0xdaf   :  { %v1871_v31 = vpop.f32.mrb[66].mxu0 }
 0xdb0   :  { %v5509_v25 = vadd.f32 %v1890_v10, %v1884_v57  ;;  %v1885_v62 = vadd.f32 %v1871_v31, %v5302_v6  ;;  %v4054_v40 = vpop.f32.mrb[67].mxu0 }
 0xdb1   :  { %v1963_v40 = vsub.s32 6, %v4687_v16 }
 0xdb2   :  { %v5512_v44 = vadd.f32 %v1890_v10, %v1885_v62  ;;  %v1902_v33 = vsel %vm241_vm4, %v5509_v25, 0.0 }
 0xdb3   :  { %1903 = vadd.xlane.f32.xlu0 %v1902_v33  ;;  %v1972_v33 = vsub.s32 7, %v4687_v16 }
 0xdb4   :  { %v1905_v27 = vsel %vm241_vm4, %v5512_v44, 0.0 }
 0xdb5   :  { %1906 = vadd.xlane.f32.xlu1 %v1905_v27 }
 0xdba   :  { %v1876_v11 = vpop.f32.mrb[68].mxu0 }
 0xdbb   :  { %v1886_v5 = vadd.f32 %v1876_v11, %v5309_v21  ;;  %v4057_v22 = vpop.f32.mrb[69].mxu0  ;;  %v1964_v11 = vrot.slane %v5284_v45, %v1963_v40 }
 0xdbc   :  { %v1879_v20 = vpop.f32.mrb[70].mxu0 }
 0xdbd   :  { %v5519_v50 = vadd.f32 %v1890_v10, %v1886_v5  ;;  %v4058_v52 = vpop.f32.mrb[71].mxu0 }
 0xdbf   :  { %v1908_v6 = vsel %vm254_vm6, %v5519_v50, 0.0 }
 0xdc0   :  { %1909 = vadd.xlane.f32.xlu0 %v1908_v6 }
 0xe33   :  { %v1898_v34 = vpop.xlane.xlu0 %1897 }
 0xe34   :  { %v1911_v36 = vmul.f32 0.03125, %v1898_v34 }
 0xe35   :  { %v1901_v3 = vpop.xlane.xlu1 %1900 }
 0xe36   :  { %v1916_v37 = vsub.f32 %v5499_v18, %v1911_v36  ;;  %v1912_v38 = vmul.f32 0.03125, %v1901_v3  ;;  %v1973_v3 = vrot.slane %v5284_v45, %v1972_v33 }
 0xe38   :  { %v1917_v48 = vsub.f32 %v5502_v35, %v1912_v38  ;;  %v1921_v42 = vmul.f32 %v1916_v37, %v1916_v37 }
 0xe3a   :  { %v1926_v21 = vsel %vm241_vm4, %v1921_v42, 0.0  ;;  %v1922_v41 = vmul.f32 %v1917_v48, %v1917_v48 }
 0xe3b   :  { %1927 = vadd.xlane.f32.xlu1 %v1926_v21 }
 0xe3c   :  { %v1929_v9 = vsel %vm241_vm4, %v1922_v41, 0.0 }
 0xe3d   :  { %1930 = vadd.xlane.f32.xlu0 %v1929_v9 }
 0xe40   :  { %v1904_v53 = vpop.xlane.xlu0 %1903 }
 0xe41   :  { %v1913_v43 = vmul.f32 0.03125, %v1904_v53 }
 0xe42   :  { %v1907_v39 = vpop.xlane.xlu1 %1906 }
 0xe43   :  { %v1918_v23 = vsub.f32 %v5509_v25, %v1913_v43  ;;  %v1914_v2 = vmul.f32 0.03125, %v1907_v39 }
 0xe45   :  { %v1919_v59 = vsub.f32 %v5512_v44, %v1914_v2  ;;  %v1923_v8 = vmul.f32 %v1918_v23, %v1918_v23 }
 0xe47   :  { %v1932_v60 = vsel %vm241_vm4, %v1923_v8, 0.0  ;;  %v1924_v0 = vmul.f32 %v1919_v59, %v1919_v59 }
 0xe48   :  { %1933 = vadd.xlane.f32.xlu1 %v1932_v60 }
 0xe49   :  { %v1935_v7 = vsel %vm241_vm4, %v1924_v0, 0.0 }
 0xe4a   :  { %1936 = vadd.xlane.f32.xlu0 %v1935_v7 }
 0xe4d   :  { %v1910_v63 = vpop.xlane.xlu0 %1909 }
 0xe4e   :  { %v1915_v19 = vmul.f32 0.03125, %v1910_v63 }
 0xe50   :  { %v1920_v30 = vsub.f32 %v5519_v50, %v1915_v19 }
 0xe52   :  { %v1925_v10 = vmul.f32 %v1920_v30, %v1920_v30 }
 0xe54   :  { %v1938_v15 = vsel %vm254_vm6, %v1925_v10, 0.0 }
 0xe55   :  { %1939 = vadd.xlane.f32.xlu1 %v1938_v15 }
 0xec8   :  { %v1928_v24 = vpop.xlane.xlu1 %1927 }
 0xec9   :  { %v1941_v61 = vmul.f32 0.03125, %v1928_v24 }
 0xeca   :  { %v1931_v57 = vpop.xlane.xlu0 %1930 }
 0xecb   :  { %v1946_v13 = vadd.f32 1e-05, %v1941_v61  ;;  %v1942_v31 = vmul.f32 0.03125, %v1931_v57 }
 0xecd   :  { %4463 = vrsqrt.f32 %v1946_v13  ;;  %v1947_v62 = vadd.f32 1e-05, %v1942_v31 }
 0xecf   :  { %4465 = vrsqrt.f32 %v1947_v62 }
 0xed5   :  { %v1934_v27 = vpop.xlane.xlu1 %1933 }
 0xed6   :  { %v1943_v5 = vmul.f32 0.03125, %v1934_v27 }
 0xed7   :  { %v4464_v22 = vpop.eup %4463  ;;  %v1937_v20 = vpop.xlane.xlu0 %1936 }
 0xed8   :  { %v1956_v52 = vmul.f32 %v4464_v22, %v1916_v37  ;;  %v1948_v6 = vadd.f32 1e-05, %v1943_v5  ;;  %v1944_v34 = vmul.f32 0.03125, %v1937_v20 }
 0xed9   :  { %v4466_v36 = vpop.eup %4465 }
 0xeda   :  { %v1965_v38 = vmul.f32 %v1964_v11, %v1956_v52  ;;  %v1957_v42 = vmul.f32 %v4466_v36, %v1917_v48  ;;  %4467 = vrsqrt.f32 %v1948_v6  ;;  %v1949_v21 = vadd.f32 1e-05, %v1944_v34 }
 0xedc   :  { %v1966_v41 = vmul.f32 %v1964_v11, %v1957_v42  ;;  %4469 = vrsqrt.f32 %v1949_v21  ;;  %v1974_v9 = vadd.f32 %v1973_v3, %v1965_v38 }
 0xede   :  { %v1975_v53 = vadd.f32 %v1973_v3, %v1966_v41 }
 0xee0   :  { %v1979_v43 = vpack.c.bf16 %v1975_v53, %v1974_v9 }
 0xee2   :  { %4064 = vmatmul.mubr.msk.bf16.vlgmr.msra.gmra.mrb[76].mxu1 %vm241_vm4, %v1979_v43  ;;  %v1940_v39 = vpop.xlane.xlu1 %1939 }
 0xee3   :  { %4067 = vmatprep.mubr.msk.bf16.mxu1 %vm4592_vm7, %v4591_v28  ;;  %v1945_v2 = vmul.f32 0.03125, %v1940_v39 }
 0xee4   :  { %v4468_v37 = vpop.eup %4467 }
 0xee5   :  { %v1958_v8 = vmul.f32 %v4468_v37, %v1918_v23  ;;  %v1950_v45 = vadd.f32 1e-05, %v1945_v2 }
 0xee6   :  { %v4470_v60 = vpop.eup %4469 }
 0xee7   :  { %v1959_v0 = vmul.f32 %v4470_v60, %v1919_v59  ;;  %v1967_v48 = vmul.f32 %v1964_v11, %v1958_v8  ;;  %4471 = vrsqrt.f32 %v1950_v45 }
 0xee9   :  { %v1968_v7 = vmul.f32 %v1964_v11, %v1959_v0  ;;  %v1976_v63 = vadd.f32 %v1973_v3, %v1967_v48 }
 0xeeb   :  { %v1977_v19 = vadd.f32 %v1973_v3, %v1968_v7 }
 0xeed   :  { %v1980_v10 = vpack.c.bf16 %v1977_v19, %v1976_v63 }
 0xeef   :  { %4068 = vmatmul.mubr.msk.bf16.gmra.mrb[80].mxu1 %vm241_vm4, %v1980_v10 }
 0xef0   :  { %4071 = vmatprep.mubr.msk.bf16.mxu1 %vm4592_vm7, %v4591_v28 }
 0xef1   :  { %v4472_v15 = vpop.eup %4471 }
 0xef2   :  { %v1960_v51 = vmul.f32 %v4472_v15, %v1920_v30 }
 0xef4   :  { %v1969_v14 = vmul.f32 %v1964_v11, %v1960_v51 }
 0xef6   :  { %v1978_v26 = vadd.f32 %v1973_v3, %v1969_v14 }
 0xef8   :  { %v1981_v32 = vpack.c.bf16 %v1978_v26, %v1978_v26 }
 0xefa   :  { %4072 = vmatmul.mubr.msk.bf16.gmra.mrb[84].mxu1 %vm241_vm4, %v1981_v32 }
 0xefb   :  { %4099 = vmatprep.mubr.msk.bf16.mxu1 %vm4592_vm7, %v4591_v28 }
 0xfb5   :  { %v2032_v23 = vpop.f32.mrb[76].mxu1 }
 0xfb6   :  { %v4065_v59 = vpop.f32.mrb[77].mxu1 }
 0xfb7   :  { %v2035_v58 = vpop.f32.mrb[78].mxu1 }
 0xfb8   :  { %v5560_v55 = vpack.c.bf16 %v2035_v58, %v2032_v23  ;;  %v4066_v24 = vpop.f32.mrb[79].mxu1 }
 0xfba   :  { %2060 = vrot.lane.b32.xlu0 %v5560_v55, %s4593_s27 }
 0xfbe   :  { %2290 = vrot.lane.b32.xlu0 %v5560_v55, %s4596_s29 }
 0xfc2   :  { %v2040_v30 = vpop.f32.mrb[80].mxu1 }
 0xfc3   :  { %v4069_v61 = vpop.f32.mrb[81].mxu1 }
 0xfc4   :  { %v2043_v57 = vpop.f32.mrb[82].mxu1 }
 0xfc5   :  { %v5566_v13 = vpack.c.bf16 %v2043_v57, %v2040_v30  ;;  %v4070_v31 = vpop.f32.mrb[83].mxu1 }
 0xfc7   :  { %2062 = vrot.lane.b32.xlu1 %v5566_v13, %s4593_s27 }
 0xfcd   :  { %v2048_v62 = vpop.f32.mrb[84].mxu1 }
 0xfce   :  { %v5570_v40 = vpack.c.bf16 %v2048_v62, %v2048_v62  ;;  %v4073_v33 = vpop.f32.mrb[85].mxu1 }
 0xfcf   :  { %v2051_v27 = vpop.f32.mrb[86].mxu1 }
 0xfd0   :  { %2294 = vrot.lane.b32.xlu0 %v5570_v40, %s4596_s29  ;;  %2064 = vrot.lane.b32.xlu1 %v5570_v40, %s4593_s27  ;;  %v4074_v11 = vpop.f32.mrb[87].mxu1 }
 0xfd4   :  { %2520 = vrot.lane.b32.xlu0 %v5560_v55, %s4598_s9  ;;  %2292 = vrot.lane.b32.xlu1 %v5566_v13, %s4596_s29 }
 0xfd8   :  { %2522 = vrot.lane.b32.xlu0 %v5566_v13, %s4598_s9  ;;  %2284 = vrot.lane.b32.xlu1 %v5560_v55, %s4597_s30 }
 0xfdc   :  { %2524 = vrot.lane.b32.xlu0 %v5570_v40, %s4598_s9  ;;  %2286 = vrot.lane.b32.xlu1 %v5566_v13, %s4597_s30 }
 0xfe0   :  { %2750 = vrot.lane.b32.xlu0 %v5560_v55, %s4600_s10  ;;  %2288 = vrot.lane.b32.xlu1 %v5570_v40, %s4597_s30 }
 0xfe4   :  { %2752 = vrot.lane.b32.xlu0 %v5566_v13, %s4600_s10  ;;  %2514 = vrot.lane.b32.xlu1 %v5560_v55, %s4599_s1 }
 0xfe8   :  { %2754 = vrot.lane.b32.xlu0 %v5570_v40, %s4600_s10  ;;  %2516 = vrot.lane.b32.xlu1 %v5566_v13, %s4599_s1 }
 0xfec   :  { %2746 = vrot.lane.b32.xlu0 %v5566_v13, %s4601_s11  ;;  %2518 = vrot.lane.b32.xlu1 %v5570_v40, %s4599_s1 }
 0xff0   :  { %2210 = vrot.lane.b32.xlu0 %v5566_v13, %s4595_s28  ;;  %2744 = vrot.lane.b32.xlu1 %v5560_v55, %s4601_s11 }
 0xff4   :  { %2208 = vrot.lane.b32.xlu1 %v5560_v55, %s4595_s28 }
 0xff8   :  { %2748 = vrot.lane.b32.xlu1 %v5570_v40, %s4601_s11 }
 0xffc   :  { %2212 = vrot.lane.b32.xlu1 %v5570_v40, %s4595_s28 }
0x102c   :  { %v2061_v5 = vpop.permute.xlu0 %2060 }
0x102d   :  { %v2076_v22 = vsel %vm413_vm8, %v2061_v5, 0 }
0x102e   :  { %4076 = vmatpush3.bf16.xpose.msra.mxu0 %v2076_v22 }
0x102f   :  { %4077 = vmatprep.subr.bf16.mxu0 %v4591_v28 }
0x1030   :  { %v2291_v6 = vpop.permute.xlu0 %2290 }
0x1031   :  { %v2306_v9 = vsel %vm413_vm8, %v2291_v6, 0 }
0x1039   :  { %v2063_v20 = vpop.permute.xlu1 %2062 }
0x103a   :  { %v2079_v52 = vsel %vm413_vm8, %v2063_v20, 0 }
0x103b   :  { %4078 = vmatpush3.bf16.xpose.msra.mxu0 %v2079_v52 }
0x103c   :  { %4079 = vmatprep.subr.bf16.mxu0 %v4591_v28 }
0x1042   :  { %v2295_v34 = vpop.permute.xlu0 %2294  ;;  %v2065_v36 = vpop.permute.xlu1 %2064 }
0x1043   :  { %v2082_v3 = vsel %vm413_vm8, %v2065_v36, 0  ;;  %v2312_v0 = vsel %vm413_vm8, %v2295_v34, 0 }
0x1044   :  { %4080 = vmatpush3.bf16.xpose.msra.mxu0 %v2082_v3 }
0x1045   :  { %4111 = vmatprep.subr.bf16.mxu0 %v4591_v28 }
0x1046   :  { %v2521_v38 = vpop.permute.xlu0 %2520  ;;  %v2293_v42 = vpop.permute.xlu1 %2292 }
0x1047   :  { %v2309_v2 = vsel %vm413_vm8, %v2293_v42, 0  ;;  %v2536_v19 = vsel %vm413_vm8, %v2521_v38, 0 }
0x104a   :  { %v2523_v21 = vpop.permute.xlu0 %2522  ;;  %v2285_v41 = vpop.permute.xlu1 %2284 }
0x104b   :  { %4082 = vmatmul.mubr.msk.bf16.vlgmr.msra.gmra.mrb[72].mxu0 %vm413_vm8, %v5560_v55  ;;  %v2539_v26 = vsel %vm413_vm8, %v2523_v21, 0 }
0x104c   :  { %4112 = vmatpush3.bf16.xpose.msra.mxu0 %v2306_v9  ;;  %4085 = vmatprep.mubr.msk.bf16.mxu0 %vm4592_vm7, %v4591_v28 }
0x104d   :  { %4113 = vmatprep.subr.bf16.mxu0 %v4591_v28 }
0x104e   :  { %v2525_v53 = vpop.permute.xlu0 %2524  ;;  %v2287_v43 = vpop.permute.xlu1 %2286 }
0x104f   :  { %v2542_v59 = vsel %vm413_vm8, %v2525_v53, 0 }
0x1052   :  { %v2751_v39 = vpop.permute.xlu0 %2750  ;;  %v2289_v37 = vpop.permute.xlu1 %2288 }
0x1053   :  { %4086 = vmatmul.mubr.msk.bf16.gmra.mrb[76].mxu0 %vm413_vm8, %v5566_v13  ;;  %v2766_v58 = vsel %vm413_vm8, %v2751_v39, 0 }
0x1054   :  { %4114 = vmatpush3.bf16.xpose.msra.mxu0 %v2309_v2  ;;  %4089 = vmatprep.mubr.msk.bf16.mxu0 %vm4592_vm7, %v4591_v28 }
0x1055   :  { %4115 = vmatprep.subr.bf16.mxu0 %v4591_v28 }
0x1056   :  { %v2515_v8 = vpop.permute.xlu1 %2514  ;;  %v2753_v60 = vpop.permute.xlu0 %2752 }
0x1057   :  { %v2769_v24 = vsel %vm413_vm8, %v2753_v60, 0 }
0x105a   :  { %v2517_v45 = vpop.permute.xlu1 %2516  ;;  %v2755_v48 = vpop.permute.xlu0 %2754 }
0x105b   :  { %4090 = vmatmul.mubr.msk.bf16.gmra.mrb[80].mxu0 %vm413_vm8, %v5570_v40  ;;  %v2772_v30 = vsel %vm413_vm8, %v2755_v48, 0 }
0x105c   :  { %4116 = vmatpush3.bf16.xpose.msra.mxu0 %v2312_v0  ;;  %4117 = vmatprep.mubr.msk.bf16.mxu0 %vm4592_vm7, %v4591_v28 }
0x105d   :  { %4147 = vmatprep.subr.bf16.mxu0 %v4591_v28 }
0x105e   :  { %v2519_v7 = vpop.permute.xlu1 %2518  ;;  %v2747_v10 = vpop.permute.xlu0 %2746 }
0x1062   :  { %v2745_v63 = vpop.permute.xlu1 %2744  ;;  %v2211_v51 = vpop.permute.xlu0 %2210 }
0x1063   :  { %4118 = vmatmul.mubr.msk.bf16.vlgmr.msra.gmra.mrb[84].mxu0 %vm413_vm8, %v2285_v41 }
0x1064   :  { %4148 = vmatpush3.bf16.xpose.msra.mxu0 %v2536_v19  ;;  %4121 = vmatprep.mubr.msk.bf16.mxu0 %vm4592_vm7, %v4591_v28 }
0x1065   :  { %4149 = vmatprep.subr.bf16.mxu0 %v4591_v28 }
0x1066   :  { %v2209_v15 = vpop.permute.xlu1 %2208 }
0x1067   :  { %4094 = vmatpush3.bf16.msra.mxu1 %v2209_v15 }
0x1068   :  { %4095 = vmatprep.subr.bf16.mxu1 %v4591_v28 }
0x106a   :  { %v2749_v14 = vpop.permute.xlu1 %2748 }
0x106b   :  { %4096 = vmatpush3.bf16.msra.mxu1 %v2211_v51  ;;  %4122 = vmatmul.mubr.msk.bf16.gmra.mrb[88].mxu0 %vm413_vm8, %v2287_v43 }
0x106c   :  { %4150 = vmatpush3.bf16.xpose.msra.mxu0 %v2539_v26  ;;  %4097 = vmatprep.subr.bf16.mxu1 %v4591_v28 }
0x106d   :  { %4125 = vmatprep.mubr.msk.bf16.mxu0 %vm4592_vm7, %v4591_v28  ;;  %4151 = vmatprep.subr.bf16.mxu0 %v4591_v28 }
0x106e   :  { %v2213_v32 = vpop.permute.xlu1 %2212 }
0x106f   :  { %v2226_v23 = vsel %vm127_vm2, %v2213_v32, 0 }
0x1070   :  { %4098 = vmatpush3.bf16.msra.mxu1 %v2226_v23 }
0x1071   :  { %4129 = vmatprep.subr.bf16.mxu1 %v4591_v28 }
0x1073   :  { %4126 = vmatmul.mubr.msk.bf16.gmra.mrb[92].mxu0 %vm413_vm8, %v2289_v37 }
0x1074   :  { %4152 = vmatpush3.bf16.xpose.msra.mxu0 %v2542_v59  ;;  %4153 = vmatprep.mubr.msk.bf16.mxu0 %vm4592_vm7, %v4591_v28 }
0x1075   :  { %4183 = vmatprep.subr.bf16.mxu0 %v4591_v28 }
0x107b   :  { %4154 = vmatmul.mubr.msk.bf16.vlgmr.msra.gmra.mrb[96].mxu0 %vm413_vm8, %v2515_v8 }
0x107c   :  { %4184 = vmatpush3.bf16.xpose.msra.mxu0 %v2766_v58  ;;  %4157 = vmatprep.mubr.msk.bf16.mxu0 %vm4592_vm7, %v4591_v28 }
0x107d   :  { %4185 = vmatprep.subr.bf16.mxu0 %v4591_v28 }
0x1083   :  { %4158 = vmatmul.mubr.msk.bf16.gmra.mrb[100].mxu0 %vm413_vm8, %v2517_v45 }
0x1084   :  { %4186 = vmatpush3.bf16.xpose.msra.mxu0 %v2769_v24  ;;  %4161 = vmatprep.mubr.msk.bf16.mxu0 %vm4592_vm7, %v4591_v28 }
0x1085   :  { %4187 = vmatprep.subr.bf16.mxu0 %v4591_v28 }
0x108b   :  { %4162 = vmatmul.mubr.msk.bf16.gmra.mrb[104].mxu0 %vm413_vm8, %v2519_v7 }
0x108c   :  { %4188 = vmatpush3.bf16.xpose.msra.mxu0 %v2772_v30  ;;  %4189 = vmatprep.mubr.msk.bf16.mxu0 %vm4592_vm7, %v4591_v28 }
0x108d   :  { %4219 = vmatprep.subr.bf16.mxu0 %v4591_v28 }
0x1093   :  { %4190 = vmatmul.mubr.msk.bf16.vlgmr.msra.gmra.mrb[108].mxu0 %vm413_vm8, %v2745_v63 }
0x1094   :  { %4193 = vmatprep.mubr.msk.bf16.mxu0 %vm4592_vm7, %v4591_v28 }
0x109b   :  { %4194 = vmatmul.mubr.msk.bf16.gmra.mrb[112].mxu0 %vm413_vm8, %v2747_v10 }
0x109c   :  { %4197 = vmatprep.mubr.msk.bf16.mxu0 %vm4592_vm7, %v4591_v28 }
0x10a3   :  { %4198 = vmatmul.mubr.msk.bf16.gmra.mrb[116].mxu0 %vm413_vm8, %v2749_v14 }
0x10a4   :  { %4223 = vmatprep.mubr.msk.bf16.mxu0 %vm4592_vm7, %v4591_v28 }
0x111e   :  { %v2118_v61 = vpop.f32.mrb[72].mxu0 }
0x111f   :  { %v2140_v57 = vmul.f32 0.35355338, %v2118_v61  ;;  %v4083_v31 = vpop.f32.mrb[73].mxu0 }
0x1120   :  { %v2121_v62 = vpop.f32.mrb[74].mxu0 }
0x1121   :  { %v5682_v33 = vadd.f32 %v2140_v57, %v4844_v46  ;;  %v2141_v27 = vmul.f32 0.35355338, %v2121_v62  ;;  %v4084_v11 = vpop.f32.mrb[75].mxu0 }
0x1123   :  { %v5685_v5 = vadd.f32 %v2141_v27, %v4844_v46  ;;  %v2150_v22 = vsel %vm498_vm0, %v5682_v33, -inf }
0x1124   :  { %2151 = vmax.xlane.f32.xlu0 %v2150_v22 }
0x1125   :  { %v2153_v20 = vsel %vm498_vm0, %v5685_v5, -inf }
0x1126   :  { %2154 = vmax.xlane.f32.xlu1 %v2153_v20  ;;  %v2126_v52 = vpop.f32.mrb[76].mxu0 }
0x1127   :  { %v2142_v6 = vmul.f32 0.35355338, %v2126_v52  ;;  %v4087_v34 = vpop.f32.mrb[77].mxu0 }
0x1128   :  { %v2129_v36 = vpop.f32.mrb[78].mxu0 }
0x1129   :  { %v5692_v3 = vadd.f32 %v2142_v6, %v4860_v1  ;;  %v2143_v38 = vmul.f32 0.35355338, %v2129_v36  ;;  %v4088_v42 = vpop.f32.mrb[79].mxu0 }
0x112b   :  { %v5695_v21 = vadd.f32 %v2143_v38, %v4862_v4  ;;  %v2156_v41 = vsel %vm498_vm0, %v5692_v3, -inf }
0x112c   :  { %2157 = vmax.xlane.f32.xlu0 %v2156_v41 }
0x112d   :  { %v2159_v43 = vsel %vm498_vm0, %v5695_v21, -inf }
0x112e   :  { %v2134_v9 = vpop.f32.mrb[80].mxu0 }
0x112f   :  { %v4091_v53 = vpop.f32.mrb[81].mxu0  ;;  %v2144_v59 = vmul.f32 0.35355338, %v2134_v9 }
0x1130   :  { %2160 = vmax.xlane.f32.xlu0 %v2159_v43  ;;  %v2137_v39 = vpop.f32.mrb[82].mxu0 }
0x1131   :  { %v4092_v37 = vpop.f32.mrb[83].mxu0  ;;  %v5710_v58 = vadd.f32 %v2144_v59, %v4869_v12 }
0x1133   :  { %v2162_v31 = vsel %vm511_vm10, %v5710_v58, -inf }
0x1136   :  { %v2348_v2 = vpop.f32.mrb[84].mxu0 }
0x1137   :  { %2440 = vrot.lane.b32.xlu1 %v5566_v13, %s4602_s12  ;;  %v4119_v8 = vpop.f32.mrb[85].mxu0  ;;  %v2370_v62 = vmul.f32 0.35355338, %v2348_v2 }
0x1138   :  { %v5703_v60 = vpop.f32.mrb[86].mxu0 }
0x1139   :  { %v4120_v45 = vpop.f32.mrb[87].mxu0  ;;  %v5715_v22 = vadd.f32 %v2370_v62, %v4844_v46 }
0x113b   :  { %v2380_v38 = vsel %vm498_vm0, %v5715_v22, -inf }
0x113e   :  { %v2356_v0 = vpop.f32.mrb[88].mxu0 }
0x113f   :  { %v4123_v48 = vpop.f32.mrb[89].mxu0  ;;  %v2372_v20 = vmul.f32 0.35355338, %v2356_v0 }
0x1140   :  { %v5705_v7 = vpop.f32.mrb[90].mxu0 }
0x1141   :  { %v4124_v63 = vpop.f32.mrb[91].mxu0  ;;  %v5718_v34 = vadd.f32 %v2372_v20, %v4860_v1  ;;  %v2371_v20 = vmul.f32 0.35355338, %v5703_v60 }
0x1143   :  { %v2386_v39 = vsel %vm498_vm0, %v5718_v34, -inf }
0x1146   :  { %2438 = vrot.lane.b32.xlu0 %v5560_v55, %s4602_s12  ;;  %v2364_v19 = vpop.f32.mrb[92].mxu0 }
0x1147   :  { %v4127_v10 = vpop.f32.mrb[93].mxu0  ;;  %v2374_v36 = vmul.f32 0.35355338, %v2364_v19 }
0x1148   :  { %v2367_v15 = vpop.f32.mrb[94].mxu0 }
0x1149   :  { %v4128_v51 = vpop.f32.mrb[95].mxu0  ;;  %v5723_v9 = vadd.f32 %v2374_v36, %v4869_v12 }
0x114b   :  { %v2392_v45 = vsel %vm511_vm10, %v5723_v9, -inf }
0x114e   :  { %v2578_v14 = vpop.f32.mrb[96].mxu0 }
0x114f   :  { %v4155_v26 = vpop.f32.mrb[97].mxu0 }
0x1150   :  { %v2581_v32 = vpop.f32.mrb[98].mxu0 }
0x1151   :  { %v4156_v23 = vpop.f32.mrb[99].mxu0  ;;  %v2601_v53 = vmul.f32 0.35355338, %v2581_v32 }
0x1153   :  { %v5728_v2 = vadd.f32 %v2601_v53, %v4844_v46 }
0x1155   :  { %v2613_v15 = vsel %vm498_vm0, %v5728_v2, -inf }
0x1156   :  { %v2586_v24 = vpop.f32.mrb[100].mxu0 }
0x1157   :  { %v4159_v30 = vpop.f32.mrb[101].mxu0  ;;  %v2602_v53 = vmul.f32 0.35355338, %v2586_v24 }
0x1158   :  { %v2589_v61 = vpop.f32.mrb[102].mxu0 }
0x1159   :  { %v4160_v57 = vpop.f32.mrb[103].mxu0  ;;  %v2603_v8 = vmul.f32 0.35355338, %v2589_v61 }
0x115b   :  { %2163 = vmax.xlane.f32.xlu1 %v2162_v31  ;;  %v5735_v63 = vadd.f32 %v2603_v8, %v4862_v4 }
0x115d   :  { %v2619_v23 = vsel %vm498_vm0, %v5735_v63, -inf }
0x115e   :  { %v2594_v27 = vpop.f32.mrb[104].mxu0 }
0x115f   :  { %v4163_v11 = vpop.f32.mrb[105].mxu0 }
0x1160   :  { %v2597_v52 = vpop.f32.mrb[106].mxu0 }
0x1161   :  { %v4164_v6 = vpop.f32.mrb[107].mxu0  ;;  %v5755_v52 = vadd.f32 %v2371_v20, %v4844_v46 }
0x1162   :  { %v2373_v6 = vmul.f32 0.35355338, %v5705_v7  ;;  %v2604_v7 = vmul.f32 0.35355338, %v2594_v27 }
0x1164   :  { %v5759_v36 = vadd.f32 %v2373_v6, %v4862_v4 }
0x1165   :  { %2381 = vmax.xlane.f32.xlu0 %v2380_v38  ;;  %v2600_v38 = vmul.f32 0.35355338, %v2578_v14  ;;  %v5774_v14 = vadd.f32 %v2604_v7, %v4869_v12 }
0x1166   :  { %v2808_v42 = vpop.f32.mrb[108].mxu0  ;;  %v2389_v60 = vsel %vm498_vm0, %v5759_v36, -inf }
0x1167   :  { %v4191_v41 = vpop.f32.mrb[109].mxu0  ;;  %v2830_v19 = vmul.f32 0.35355338, %v2808_v42  ;;  %v2383_v42 = vsel %vm498_vm0, %v5755_v52, -inf }
0x1168   :  { %v2811_v43 = vpop.f32.mrb[110].mxu0  ;;  %v5764_v41 = vadd.f32 %v2600_v38, %v4844_v46 }
0x1169   :  { %2387 = vmax.xlane.f32.xlu0 %v2386_v39  ;;  %v4192_v37 = vpop.f32.mrb[111].mxu0  ;;  %v5740_v26 = vadd.f32 %v2830_v19, %v4844_v46  ;;  %v5769_v39 = vadd.f32 %v2602_v53, %v4860_v1  ;;  %v2831_v8 = vmul.f32 0.35355338, %v2811_v43 }
0x116a   :  { %v2610_v37 = vsel %vm498_vm0, %v5764_v41, -inf }
0x116b   :  { %v2840_v31 = vsel %vm498_vm0, %v5740_v26, -inf  ;;  %v5779_v24 = vadd.f32 %v2831_v8, %v4844_v46 }
0x116c   :  { %2442 = vrot.lane.b32.xlu1 %v5570_v40, %s4602_s12 }
0x116d   :  { %2393 = vmax.xlane.f32.xlu0 %v2392_v45  ;;  %v2616_v45 = vsel %vm498_vm0, %v5769_v39, -inf }
0x116e   :  { %v2816_v0 = vpop.f32.mrb[112].mxu0 }
0x116f   :  { %v4195_v48 = vpop.f32.mrb[113].mxu0  ;;  %v2832_v32 = vmul.f32 0.35355338, %v2816_v0 }
0x1170   :  { %v2819_v10 = vpop.f32.mrb[114].mxu0  ;;  %v2843_v48 = vsel %vm498_vm0, %v5779_v24, -inf }
0x1171   :  { %2614 = vmax.xlane.f32.xlu0 %v2613_v15  ;;  %v4196_v51 = vpop.f32.mrb[115].mxu0  ;;  %v5747_v61 = vadd.f32 %v2832_v32, %v4860_v1  ;;  %v2833_v0 = vmul.f32 0.35355338, %v2819_v10  ;;  %v2622_v1 = vsel %vm511_vm10, %v5774_v14, -inf }
0x1173   :  { %v2846_v11 = vsel %vm498_vm0, %v5747_v61, -inf  ;;  %v5784_v27 = vadd.f32 %v2833_v0, %v4862_v4 }
0x1175   :  { %2620 = vmax.xlane.f32.xlu0 %v2619_v23  ;;  %v2849_v43 = vsel %vm498_vm0, %v5784_v27, -inf }
0x1176   :  { %v5744_v59 = vpop.f32.mrb[116].mxu0 }
0x1177   :  { %v4199_v30 = vpop.f32.mrb[117].mxu0 }
0x1178   :  { %v2827_v57 = vpop.f32.mrb[118].mxu0 }
0x1179   :  { %2841 = vmax.xlane.f32.xlu0 %v2840_v31  ;;  %v4200_v62 = vpop.f32.mrb[119].mxu0 }
0x117d   :  { %2847 = vmax.xlane.f32.xlu0 %v2846_v11 }
0x1190   :  { %2384 = vmax.xlane.f32.xlu1 %v2383_v42 }
0x1194   :  { %2390 = vmax.xlane.f32.xlu1 %v2389_v60 }
0x1198   :  { %2611 = vmax.xlane.f32.xlu1 %v2610_v37 }
0x119c   :  { %2617 = vmax.xlane.f32.xlu1 %v2616_v45 }
0x11a0   :  { %2623 = vmax.xlane.f32.xlu1 %v2622_v1 }
0x11a4   :  { %2844 = vmax.xlane.f32.xlu1 %v2843_v48 }
0x11a8   :  { %2850 = vmax.xlane.f32.xlu1 %v2849_v43 }
0x11b1   :  { %v2152_v19 = vpop.xlane.xlu0 %2151 }
0x11b2   :  { %v2165_v46 = vsub.f32 %v5682_v33, %v2152_v19 }
0x11b3   :  { %v2155_v15 = vpop.xlane.xlu1 %2154 }
0x11b4   :  { %v2170_v10 = vmul.f32 1.442695, %v2165_v46  ;;  %v2166_v51 = vsub.f32 %v5685_v5, %v2155_v15 }
0x11b6   :  { %4473 = vpow2.f32 %v2170_v10  ;;  %v2172_v32 = vmul.f32 1.442695, %v2166_v51 }
0x11b7   :  { %v5812_v42 = vpop.permute.xlu1 %2440 }
0x11b8   :  { %4475 = vpow2.f32 %v2172_v32 }
0x11b9   :  { %v2158_v4 = vpop.xlane.xlu0 %2157 }
0x11ba   :  { %v2167_v23 = vsub.f32 %v5692_v3, %v2158_v4 }
0x11bc   :  { %v2174_v30 = vmul.f32 1.442695, %v2167_v23 }
0x11bd   :  { %v2161_v57 = vpop.xlane.xlu0 %2160 }
0x11be   :  { %4477 = vpow2.f32 %v2174_v30  ;;  %v2168_v31 = vsub.f32 %v5695_v21, %v2161_v57 }
0x11c0   :  { %v5794_v62 = vpop.eup %4473  ;;  %v2176_v11 = vmul.f32 1.442695, %v2168_v31 }
0x11c1   :  { %v2180_v33 = vsel %vm498_vm0, %v5794_v62, 0.0  ;;  %v5815_v37 = vpop.permute.xlu0 %2438 }
0x11c2   :  { %v5798_v20 = vpop.eup %4475  ;;  %4479 = vpow2.f32 %v2176_v11  ;;  %2181 = vadd.xlane.f32.xlu0 %v2180_v33 }
0x11c3   :  { %v2183_v5 = vsel %vm498_vm0, %v5798_v20, 0.0 }
0x11c4   :  { %2184 = vadd.xlane.f32.xlu1 %v2183_v5 }
0x11c8   :  { %v5802_v3 = vpop.eup %4477 }
0x11c9   :  { %v2186_v6 = vsel %vm498_vm0, %v5802_v3, 0.0 }
0x11ca   :  { %2187 = vadd.xlane.f32.xlu0 %v2186_v6 }
0x11cc   :  { %v5806_v21 = vpop.eup %4479 }
0x11cd   :  { %v2189_v38 = vsel %vm498_vm0, %v5806_v21, 0.0 }
0x11ce   :  { %2190 = vadd.xlane.f32.xlu1 %v2189_v38 }
0x11df   :  { %2668 = vrot.lane.b32.xlu1 %v5560_v55, %s4603_s13 }
0x11e8   :  { %v2164_v53 = vpop.xlane.xlu1 %2163 }
0x11e9   :  { %v2169_v60 = vsub.f32 %v5710_v58, %v2164_v53 }
0x11eb   :  { %v2178_v7 = vmul.f32 1.442695, %v2169_v60 }
0x11ec   :  { %v5828_v15 = vpop.permute.xlu1 %2442 }
0x11ed   :  { %4481 = vpow2.f32 %v2178_v7 }
0x11f2   :  { %v2382_v8 = vpop.xlane.xlu0 %2381 }
0x11f3   :  { %v2395_v45 = vsub.f32 %v5715_v22, %v2382_v8 }
0x11f5   :  { %v2400_v0 = vmul.f32 1.442695, %v2395_v45 }
0x11f6   :  { %v2388_v19 = vpop.xlane.xlu0 %2387 }
0x11f7   :  { %v5818_v1 = vpop.eup %4481  ;;  %4483 = vpow2.f32 %v2400_v0  ;;  %v2397_v51 = vsub.f32 %v5718_v34, %v2388_v19 }
0x11f8   :  { %v2192_v48 = vsel %vm511_vm10, %v5818_v1, 0.0 }
0x11f9   :  { %2193 = vadd.xlane.f32.xlu0 %v2192_v48  ;;  %v2404_v23 = vmul.f32 1.442695, %v2397_v51 }
0x11fa   :  { %v2394_v46 = vpop.xlane.xlu0 %2393 }
0x11fb   :  { %v2399_v33 = vsub.f32 %v5723_v9, %v2394_v46 }
0x11fd   :  { %v2408_v34 = vmul.f32 1.442695, %v2399_v33 }
0x11fe   :  { %v2615_v22 = vpop.xlane.xlu0 %2614 }
0x11ff   :  { %v2626_v60 = vsub.f32 %v5728_v2, %v2615_v22 }
0x1201   :  { %v5822_v43 = vpop.eup %4483 }
0x1202   :  { %v2410_v58 = vsel %vm498_vm0, %v5822_v43, 0.0  ;;  %v2621_v10 = vpop.xlane.xlu0 %2620 }
0x1203   :  { %2411 = vadd.xlane.f32.xlu1 %v2410_v58  ;;  %v2628_v2 = vsub.f32 %v5735_v63, %v2621_v10 }
0x1206   :  { %v2842_v57 = vpop.xlane.xlu0 %2841 }
0x1207   :  { %v2855_v5 = vsub.f32 %v5740_v26, %v2842_v57 }
0x120a   :  { %v2848_v57 = vpop.xlane.xlu0 %2847 }
0x120b   :  { %v2857_v33 = vsub.f32 %v5747_v61, %v2848_v57 }
0x120f   :  { %2670 = vrot.lane.b32.xlu0 %v5566_v13, %s4603_s13 }
0x121d   :  { %v2385_v32 = vpop.xlane.xlu1 %2384 }
0x121e   :  { %v2396_v4 = vsub.f32 %v5755_v52, %v2385_v32  ;;  %v2860_v52 = vmul.f32 1.442695, %v2855_v5 }
0x1220   :  { %v2402_v30 = vmul.f32 1.442695, %v2396_v4 }
0x1221   :  { %v2391_v31 = vpop.xlane.xlu1 %2390 }
0x1222   :  { %4485 = vpow2.f32 %v2402_v30  ;;  %v2398_v11 = vsub.f32 %v5759_v36, %v2391_v31  ;;  %v2632_v36 = vmul.f32 1.442695, %v2626_v60 }
0x1223   :  { %4487 = vpow2.f32 %v2404_v23 }
0x1224   :  { %v2406_v6 = vmul.f32 1.442695, %v2398_v11 }
0x1225   :  { %v2612_v38 = vpop.xlane.xlu1 %2611 }
0x1226   :  { %v2625_v53 = vsub.f32 %v5764_v41, %v2612_v38  ;;  %4489 = vpow2.f32 %v2406_v6 }
0x1228   :  { %v2630_v7 = vmul.f32 1.442695, %v2625_v53 }
0x1229   :  { %v2618_v8 = vpop.xlane.xlu1 %2617 }
0x122a   :  { %4491 = vpow2.f32 %v2630_v7  ;;  %v2627_v9 = vsub.f32 %v5769_v39, %v2618_v8  ;;  %v2636_v39 = vmul.f32 1.442695, %v2628_v2 }
0x122b   :  { %4493 = vpow2.f32 %v2408_v34 }
0x122c   :  { %v5837_v45 = vpop.eup %4485  ;;  %4495 = vpow2.f32 %v2860_v52  ;;  %v2634_v48 = vmul.f32 1.442695, %v2627_v9 }
0x122d   :  { %v2413_v26 = vsel %vm498_vm0, %v5837_v45, 0.0  ;;  %v5842_v0 = vpop.eup %4487  ;;  %v2624_v41 = vpop.xlane.xlu1 %2623  ;;  %4497 = vpow2.f32 %v2632_v36 }
0x122e   :  { %2414 = vadd.xlane.f32.xlu0 %v2413_v26  ;;  %v2416_v58 = vsel %vm498_vm0, %v5842_v0, 0.0  ;;  %4499 = vpow2.f32 %v2634_v48  ;;  %v2629_v22 = vsub.f32 %v5774_v14, %v2624_v41 }
0x122f   :  { %4501 = vpow2.f32 %v2636_v39 }
0x1230   :  { %v5847_v19 = vpop.eup %4489  ;;  %v2638_v23 = vmul.f32 1.442695, %v2629_v22 }
0x1231   :  { %v2845_v32 = vpop.xlane.xlu1 %2844  ;;  %v2419_v4 = vsel %vm498_vm0, %v5847_v19, 0.0 }
0x1232   :  { %2417 = vadd.xlane.f32.xlu0 %v2416_v58  ;;  %v2856_v30 = vsub.f32 %v5779_v24, %v2845_v32  ;;  %4503 = vpow2.f32 %v2638_v23  ;;  %v2864_v24 = vmul.f32 1.442695, %v2857_v33 }
0x1234   :  { %v5849_v46 = vpop.eup %4491  ;;  %v2862_v5 = vmul.f32 1.442695, %v2856_v30 }
0x1235   :  { %v5852_v51 = vpop.eup %4493  ;;  %v2640_v63 = vsel %vm498_vm0, %v5849_v46, 0.0  ;;  %v2851_v8 = vpop.xlane.xlu1 %2850 }
0x1236   :  { %v5858_v10 = vpop.eup %4495  ;;  %2420 = vadd.xlane.f32.xlu0 %v2419_v4  ;;  %2641 = vadd.xlane.f32.xlu1 %v2640_v63  ;;  %v2422_v14 = vsel %vm511_vm10, %v5852_v51, 0.0  ;;  %4505 = vpow2.f32 %v2862_v5  ;;  %v2858_v58 = vsub.f32 %v5784_v27, %v2851_v8 }
0x1237   :  { %v2870_v31 = vsel %vm498_vm0, %v5858_v10, 0.0  ;;  %v5865_v11 = vpop.eup %4497  ;;  %4507 = vpow2.f32 %v2864_v24 }
0x1238   :  { %v2643_v6 = vsel %vm498_vm0, %v5865_v11, 0.0  ;;  %v5870_v38 = vpop.eup %4499  ;;  %v2866_v4 = vmul.f32 1.442695, %v2858_v58 }
0x1239   :  { %v2646_v53 = vsel %vm498_vm0, %v5870_v38, 0.0  ;;  %v5874_v34 = vpop.eup %4501 }
0x123a   :  { %2423 = vadd.xlane.f32.xlu0 %v2422_v14  ;;  %2871 = vadd.xlane.f32.xlu1 %v2870_v31  ;;  %v2649_v61 = vsel %vm498_vm0, %v5874_v34, 0.0 }
0x123c   :  { %v5878_v60 = vpop.eup %4503 }
0x123d   :  { %v2652_v52 = vsel %vm511_vm10, %v5878_v60, 0.0 }
0x123e   :  { %2644 = vadd.xlane.f32.xlu0 %v2643_v6 }
0x1240   :  { %v5882_v7 = vpop.eup %4505 }
0x1241   :  { %v2873_v36 = vsel %vm498_vm0, %v5882_v7, 0.0  ;;  %v5888_v9 = vpop.eup %4507 }
0x1242   :  { %2647 = vadd.xlane.f32.xlu0 %v2646_v53  ;;  %v2876_v2 = vsel %vm498_vm0, %v5888_v9, 0.0 }
0x1246   :  { %2650 = vadd.xlane.f32.xlu0 %v2649_v61 }
0x124a   :  { %2653 = vadd.xlane.f32.xlu0 %v2652_v52 }
0x124b   :  { %2672 = vrot.lane.b32.xlu1 %v5570_v40, %s4603_s13 }
0x124e   :  { %2874 = vadd.xlane.f32.xlu0 %v2873_v36 }
0x124f   :  { %v2182_v26 = vpop.xlane.xlu0 %2181 }
0x1250   :  { %4509 = vrcp.f32 %v2182_v26 }
0x1251   :  { %v2185_v41 = vpop.xlane.xlu1 %2184 }
0x1252   :  { %4511 = vrcp.f32 %v2185_v41  ;;  %2877 = vadd.xlane.f32.xlu0 %v2876_v2 }
0x1257   :  { %v2188_v48 = vpop.xlane.xlu0 %2187 }
0x1258   :  { %4513 = vrcp.f32 %v2188_v48 }
0x125a   :  { %v4510_v39 = vpop.eup %4509 }
0x125b   :  { %v2191_v22 = vpop.xlane.xlu1 %2190  ;;  %v2196_v63 = vmul.f32 %v4510_v39, %v5794_v62 }
0x125c   :  { %v4512_v32 = vpop.eup %4511  ;;  %4515 = vrcp.f32 %v2191_v22 }
0x125d   :  { %v2198_v23 = vmul.f32 %v4512_v32, %v5798_v20  ;;  %4517 = vpow2.f32 %v2866_v4 }
0x125f   :  { %v2205_v30 = vpack.c.bf16 %v2198_v23, %v2196_v63 }
0x1261   :  { %4100 = vmatmul.mubr.msk.bf16.vlgmr.msra.gmra.mrb[88].mxu1 %vm498_vm0, %v2205_v30 }
0x1262   :  { %4130 = vmatpush3.bf16.msra.mxu1 %v5815_v37  ;;  %4103 = vmatprep.mubr.msk.bf16.mxu1 %vm4592_vm7, %v4591_v28  ;;  %v4514_v27 = vpop.eup %4513  ;;  %v2456_v37 = vsel %vm127_vm2, %v5828_v15, 0 }
0x1263   :  { %4131 = vmatprep.subr.bf16.mxu1 %v4591_v28  ;;  %v2200_v62 = vmul.f32 %v4514_v27, %v5802_v3  ;;  %v2834_v3 = vmul.f32 0.35355338, %v5744_v59 }
0x1266   :  { %v4516_v57 = vpop.eup %4515  ;;  %4132 = vmatpush3.bf16.msra.mxu1 %v5812_v42  ;;  %v5922_v42 = vadd.f32 %v2834_v3, %v4869_v12 }
0x1267   :  { %4133 = vmatprep.subr.bf16.mxu1 %v4591_v28  ;;  %v2202_v20 = vmul.f32 %v4516_v57, %v5806_v21  ;;  %v5908_v31 = vpop.eup %4517 }
0x1268   :  { %2898 = vrot.lane.b32.xlu0 %v5560_v55, %s4604_s0  ;;  %v2879_v55 = vsel %vm498_vm0, %v5908_v31, 0.0 }
0x1269   :  { %v2206_v14 = vpack.c.bf16 %v2202_v20, %v2200_v62 }
0x126a   :  { %4134 = vmatpush3.bf16.msra.mxu1 %v2456_v37 }
0x126b   :  { %4104 = vmatmul.mubr.msk.bf16.gmra.mrb[92].mxu1 %vm498_vm0, %v2206_v14  ;;  %4165 = vmatprep.subr.bf16.mxu1 %v4591_v28 }
0x126c   :  { %2900 = vrot.lane.b32.xlu0 %v5566_v13, %s4604_s0  ;;  %4107 = vmatprep.mubr.msk.bf16.mxu1 %vm4592_vm7, %v4591_v28  ;;  %v2852_v13 = vsel %vm511_vm10, %v5922_v42, -inf }
0x126f   :  { %2880 = vadd.xlane.f32.xlu1 %v2879_v55 }
0x1270   :  { %2902 = vrot.lane.b32.xlu0 %v5570_v40, %s4604_s0  ;;  %v2669_v40 = vpop.permute.xlu1 %2668 }
0x1286   :  { %v2194_v21 = vpop.xlane.xlu0 %2193 }
0x1287   :  { %4519 = vrcp.f32 %v2194_v21 }
0x128a   :  { %v2671_v59 = vpop.permute.xlu0 %2670 }
0x128f   :  { %2853 = vmax.xlane.f32.xlu0 %v2852_v13 }
0x1290   :  { %v2412_v6 = vpop.xlane.xlu1 %2411 }
0x1291   :  { %v4520_v15 = vpop.eup %4519  ;;  %4521 = vrcp.f32 %v2412_v6 }
0x1292   :  { %v2204_v33 = vmul.f32 %v4520_v15, %v5818_v1 }
0x1294   :  { %v2207_v5 = vpack.c.bf16 %v2204_v33, %v2204_v33 }
0x1296   :  { %4108 = vmatmul.mubr.msk.bf16.gmra.mrb[96].mxu1 %vm498_vm0, %v2207_v5 }
0x1297   :  { %4135 = vmatprep.mubr.msk.bf16.mxu1 %vm4592_vm7, %v4591_v28 }
0x129b   :  { %v4522_v61 = vpop.eup %4521 }
0x129c   :  { %v2426_v1 = vmul.f32 %v4522_v61, %v5822_v43 }
0x12bb   :  { %v2415_v24 = vpop.xlane.xlu0 %2414 }
0x12bc   :  { %4523 = vrcp.f32 %v2415_v24 }
0x12bf   :  { %v2418_v12 = vpop.xlane.xlu0 %2417 }
0x12c0   :  { %4525 = vrcp.f32 %v2418_v12 }
0x12c3   :  { %v2421_v53 = vpop.xlane.xlu0 %2420  ;;  %v2642_v52 = vpop.xlane.xlu1 %2641 }
0x12c4   :  { %4527 = vrcp.f32 %v2421_v53 }
0x12c6   :  { %v4524_v8 = vpop.eup %4523 }
0x12c7   :  { %v2428_v36 = vmul.f32 %v4524_v8, %v5837_v45  ;;  %v2424_v26 = vpop.xlane.xlu0 %2423  ;;  %v2872_v2 = vpop.xlane.xlu1 %2871 }
0x12c8   :  { %4529 = vrcp.f32 %v2424_v26 }
0x12c9   :  { %v2435_v41 = vpack.c.bf16 %v2428_v36, %v2426_v1 }
0x12ca   :  { %v4526_v58 = vpop.eup %4525 }
0x12cb   :  { %v2645_v48 = vpop.xlane.xlu0 %2644  ;;  %4136 = vmatmul.mubr.msk.bf16.vlgmr.msra.gmra.mrb[100].mxu1 %vm498_vm0, %v2435_v41  ;;  %v2430_v43 = vmul.f32 %v4526_v58, %v5842_v0  ;;  %v2673_v32 = vpop.permute.xlu1 %2672 }
0x12cc   :  { %4166 = vmatpush3.bf16.msra.mxu1 %v2669_v40  ;;  %4139 = vmatprep.mubr.msk.bf16.mxu1 %vm4592_vm7, %v4591_v28  ;;  %4531 = vrcp.f32 %v2645_v48  ;;  %v2686_v23 = vsel %vm127_vm2, %v2673_v32, 0 }
0x12cd   :  { %4167 = vmatprep.subr.bf16.mxu1 %v4591_v28  ;;  %4533 = vrcp.f32 %v2642_v52 }
0x12ce   :  { %v4528_v39 = vpop.eup %4527 }
0x12cf   :  { %v2648_v22 = vpop.xlane.xlu0 %2647  ;;  %v2432_v45 = vmul.f32 %v4528_v39, %v5847_v19 }
0x12d0   :  { %4168 = vmatpush3.bf16.msra.mxu1 %v2671_v59 }
0x12d1   :  { %4169 = vmatprep.subr.bf16.mxu1 %v4591_v28  ;;  %v2436_v4 = vpack.c.bf16 %v2432_v45, %v2430_v43 }
0x12d2   :  { %v4530_v63 = vpop.eup %4529 }
0x12d3   :  { %v2651_v30 = vpop.xlane.xlu0 %2650  ;;  %4140 = vmatmul.mubr.msk.bf16.gmra.mrb[104].mxu1 %vm498_vm0, %v2436_v4  ;;  %v2434_v0 = vmul.f32 %v4530_v63, %v5852_v51 }
0x12d4   :  { %4170 = vmatpush3.bf16.msra.mxu1 %v2686_v23  ;;  %4143 = vmatprep.mubr.msk.bf16.mxu1 %vm4592_vm7, %v4591_v28  ;;  %4535 = vrcp.f32 %v2651_v30 }
0x12d5   :  { %4201 = vmatprep.subr.bf16.mxu1 %v4591_v28  ;;  %v2437_v27 = vpack.c.bf16 %v2434_v0, %v2434_v0  ;;  %4537 = vrcp.f32 %v2648_v22 }
0x12d6   :  { %v4532_v57 = vpop.eup %4531 }
0x12d7   :  { %v2654_v19 = vpop.xlane.xlu0 %2653  ;;  %v4534_v20 = vpop.eup %4533  ;;  %v2658_v37 = vmul.f32 %v4532_v57, %v5865_v11 }
0x12d8   :  { %v2656_v14 = vmul.f32 %v4534_v20, %v5849_v46  ;;  %4539 = vrcp.f32 %v2654_v19 }
0x12da   :  { %v2665_v51 = vpack.c.bf16 %v2658_v37, %v2656_v14 }
0x12db   :  { %v2875_v62 = vpop.xlane.xlu0 %2874  ;;  %4144 = vmatmul.mubr.msk.bf16.gmra.mrb[108].mxu1 %vm498_vm0, %v2437_v27 }
0x12dc   :  { %4171 = vmatprep.mubr.msk.bf16.mxu1 %vm4592_vm7, %v4591_v28  ;;  %4541 = vrcp.f32 %v2875_v62 }
0x12dd   :  { %4543 = vrcp.f32 %v2872_v2 }
0x12de   :  { %v4536_v3 = vpop.eup %4535 }
0x12df   :  { %v2878_v55 = vpop.xlane.xlu0 %2877  ;;  %v4538_v13 = vpop.eup %4537  ;;  %v2662_v15 = vmul.f32 %v4536_v3, %v5874_v34 }
0x12e0   :  { %v2660_v11 = vmul.f32 %v4538_v13, %v5870_v38  ;;  %4545 = vrcp.f32 %v2878_v55  ;;  %v3660_v13 = vld [vmem:[%s6223_s5 + $0x20] sm:$0xff] }
0x12e2   :  { %v2666_v46 = vpack.c.bf16 %v2662_v15, %v2660_v11  ;;  %v4540_v5 = vpop.eup %4539  ;;  %v3661_v15 = vld [vmem:[%s6223_s5 + $0x28] sm:$0xff] }
0x12e3   :  { %v2899_v21 = vpop.permute.xlu0 %2898  ;;  %4172 = vmatmul.mubr.msk.bf16.vlgmr.msra.gmra.mrb[112].mxu1 %vm498_vm0, %v2665_v51  ;;  %v2664_v34 = vmul.f32 %v4540_v5, %v5878_v60  ;;  %v3057_v11 = vpack.c.bf16 %v3661_v15, %v3660_v13 }
0x12e4   :  { %4202 = vmatpush3.bf16.msra.mxu1 %v2899_v21  ;;  %4175 = vmatprep.mubr.msk.bf16.mxu1 %vm4592_vm7, %v4591_v28 }
0x12e5   :  { %4203 = vmatprep.subr.bf16.mxu1 %v4591_v28  ;;  %v2667_v38 = vpack.c.bf16 %v2664_v34, %v2664_v34  ;;  %4220 = vmatpush3.bf16.msra.mxu0 %v3057_v11 }
0x12e6   :  { %v4542_v6 = vpop.eup %4541  ;;  %4221 = vmatprep.subr.bf16.mxu0 %v4591_v28 }
0x12e7   :  { %v2901_v33 = vpop.permute.xlu0 %2900  ;;  %v4544_v24 = vpop.eup %4543  ;;  %v2888_v12 = vmul.f32 %v4542_v6, %v5882_v7 }
0x12e8   :  { %4204 = vmatpush3.bf16.msra.mxu1 %v2901_v33  ;;  %v2886_v53 = vmul.f32 %v4544_v24, %v5858_v10 }
0x12e9   :  { %4205 = vmatprep.subr.bf16.mxu1 %v4591_v28 }
0x12ea   :  { %v2895_v61 = vpack.c.bf16 %v2888_v12, %v2886_v53  ;;  %v4546_v60 = vpop.eup %4545 }
0x12eb   :  { %v2903_v40 = vpop.permute.xlu0 %2902  ;;  %4176 = vmatmul.mubr.msk.bf16.gmra.mrb[116].mxu1 %vm498_vm0, %v2666_v46  ;;  %v2890_v1 = vmul.f32 %v4546_v60, %v5888_v9 }
0x12ec   :  { %v2916_v59 = vsel %vm127_vm2, %v2903_v40, 0  ;;  %4179 = vmatprep.mubr.msk.bf16.mxu1 %vm4592_vm7, %v4591_v28 }
0x12ed   :  { %4206 = vmatpush3.bf16.msra.mxu1 %v2916_v59 }
0x12ee   :  { %4235 = vmatprep.subr.bf16.mxu1 %v4591_v28 }
0x12f3   :  { %4180 = vmatmul.mubr.msk.bf16.gmra.mrb[120].mxu1 %vm498_vm0, %v2667_v38 }
0x12f4   :  { %4207 = vmatprep.mubr.msk.bf16.mxu1 %vm4592_vm7, %v4591_v28 }
0x12fb   :  { %4208 = vmatmul.mubr.msk.bf16.vlgmr.msra.gmra.mrb[124].mxu1 %vm498_vm0, %v2895_v61 }
0x12fc   :  { %v2881_v52 = vpop.xlane.xlu1 %2880  ;;  %4211 = vmatprep.mubr.msk.bf16.mxu1 %vm4592_vm7, %v4591_v28 }
0x12fd   :  { %4547 = vrcp.f32 %v2881_v52 }
0x1307   :  { %v4548_v8 = vpop.eup %4547 }
0x1308   :  { %v2892_v36 = vmul.f32 %v4548_v8, %v5908_v31 }
0x130a   :  { %v2896_v26 = vpack.c.bf16 %v2892_v36, %v2890_v1 }
0x130c   :  { %4212 = vmatmul.mubr.msk.bf16.gmra.mrb[128].mxu1 %vm498_vm0, %v2896_v26 }
0x130d   :  { %4215 = vmatprep.mubr.msk.bf16.mxu1 %vm4592_vm7, %v4591_v28 }
0x131c   :  { %v2854_v10 = vpop.xlane.xlu0 %2853 }
0x131d   :  { %v2859_v7 = vsub.f32 %v5922_v42, %v2854_v10  ;;  %v3662_v10 = vld [vmem:[%s6223_s5 + $0x30] sm:$0xff] }
0x131f   :  { %v2868_v41 = vmul.f32 1.442695, %v2859_v7  ;;  %v3663_v7 = vld [vmem:[%s6223_s5 + $0x38] sm:$0xff] }
0x1321   :  { %4549 = vpow2.f32 %v2868_v41 }
0x132b   :  { %v4550_v2 = vpop.eup %4549 }
0x132c   :  { %v2882_v48 = vsel %vm511_vm10, %v4550_v2, 0.0 }
0x132d   :  { %2883 = vadd.xlane.f32.xlu1 %v2882_v48  ;;  %v3058_v48 = vpack.c.bf16 %v3663_v7, %v3662_v10 }
0x132f   :  { %4222 = vmatpush3.bf16.msra.mxu0 %v3058_v48 }
0x1330   :  { %4251 = vmatprep.subr.bf16.mxu0 %v4591_v28 }
0x1334   :  { %v5978_v58 = vpop.f32.mrb[88].mxu1 }
0x1335   :  { %v4101_v9 = vpop.f32.mrb[89].mxu1 }
0x1336   :  { %v5980_v39 = vpop.f32.mrb[90].mxu1 }
0x1337   :  { %v4102_v31 = vpop.f32.mrb[91].mxu1 }
0x133e   :  { %v5982_v22 = vpop.f32.mrb[92].mxu1 }
0x133f   :  { %v4105_v43 = vpop.f32.mrb[93].mxu1 }
0x1340   :  { %v5984_v45 = vpop.f32.mrb[94].mxu1 }
0x1341   :  { %v4106_v32 = vpop.f32.mrb[95].mxu1 }
0x1369   :  { %v5986_v4 = vpop.f32.mrb[96].mxu1 }
0x136a   :  { %v4109_v42 = vpop.f32.mrb[97].mxu1 }
0x136b   :  { %v2281_v63 = vpop.f32.mrb[98].mxu1 }
0x136c   :  { %v4110_v23 = vpop.f32.mrb[99].mxu1 }
0x139e   :  { %v2492_v30 = vpop.f32.mrb[100].mxu1 }
0x139f   :  { %v4137_v0 = vpop.f32.mrb[101].mxu1 }
0x13a0   :  { %v2495_v19 = vpop.f32.mrb[102].mxu1 }
0x13a1   :  { %v4323_v27 = vpack.i.bf16 %v2495_v19, %v2492_v30  ;;  %v4138_v57 = vpop.f32.mrb[103].mxu1 }
0x13a3   :  { %4324 = vrot.lane.b32.xlu1 %v4323_v27, %s4605_s14 }
0x13a6   :  { %v2500_v62 = vpop.f32.mrb[104].mxu1 }
0x13a7   :  { %v4141_v20 = vpop.f32.mrb[105].mxu1 }
0x13a8   :  { %v2503_v37 = vpop.f32.mrb[106].mxu1 }
0x13a9   :  { %v4328_v14 = vpack.i.bf16 %v2503_v37, %v2500_v62  ;;  %v4142_v55 = vpop.f32.mrb[107].mxu1 }
0x13ab   :  { %4329 = vrot.lane.b32.xlu0 %v4328_v14, %s4605_s14 }
0x13ae   :  { %v2508_v51 = vpop.f32.mrb[108].mxu1 }
0x13af   :  { %v4145_v3 = vpop.f32.mrb[109].mxu1 }
0x13b0   :  { %v2511_v21 = vpop.f32.mrb[110].mxu1 }
0x13b1   :  { %v4146_v33 = vpop.f32.mrb[111].mxu1 }
0x13b6   :  { %v2722_v46 = vpop.f32.mrb[112].mxu1 }
0x13b7   :  { %v4173_v5 = vpop.f32.mrb[113].mxu1 }
0x13b8   :  { %v2725_v40 = vpop.f32.mrb[114].mxu1 }
0x13b9   :  { %v4333_v59 = vpack.i.bf16 %v2725_v40, %v2722_v46  ;;  %v4174_v34 = vpop.f32.mrb[115].mxu1 }
0x13ba   :  { %v2884_v38 = vpop.xlane.xlu1 %2883 }
0x13bb   :  { %4551 = vrcp.f32 %v2884_v38  ;;  %4334 = vrot.lane.b32.xlu1 %v4333_v59, %s4606_s23 }
0x13be   :  { %v2730_v6 = vpop.f32.mrb[116].mxu1 }
0x13bf   :  { %v4177_v24 = vpop.f32.mrb[117].mxu1 }
0x13c0   :  { %v2733_v12 = vpop.f32.mrb[118].mxu1 }
0x13c1   :  { %v4343_v53 = vpack.i.bf16 %v2733_v12, %v2730_v6  ;;  %v4178_v61 = vpop.f32.mrb[119].mxu1 }
0x13c5   :  { %v4552_v52 = vpop.eup %4551 }
0x13c6   :  { %v2738_v60 = vpop.f32.mrb[120].mxu1  ;;  %v2894_v8 = vmul.f32 %v4552_v52, %v4550_v2 }
0x13c7   :  { %v4181_v1 = vpop.f32.mrb[121].mxu1 }
0x13c8   :  { %v2741_v36 = vpop.f32.mrb[122].mxu1  ;;  %v2897_v26 = vpack.c.bf16 %v2894_v8, %v2894_v8 }
0x13c9   :  { %v4182_v41 = vpop.f32.mrb[123].mxu1 }
0x13ca   :  { %4216 = vmatmul.mubr.msk.bf16.gmra.mrb[132].mxu1 %vm498_vm0, %v2897_v26 }
0x13cb   :  { %4239 = vmatprep.mubr.msk.bf16.mxu1 %vm4592_vm7, %v4591_v28 }
0x13ce   :  { %v2952_v2 = vpop.f32.mrb[124].mxu1 }
0x13cf   :  { %v4209_v9 = vpop.f32.mrb[125].mxu1 }
0x13d0   :  { %v2955_v31 = vpop.f32.mrb[126].mxu1 }
0x13d1   :  { %v4338_v43 = vpack.i.bf16 %v2955_v31, %v2952_v2  ;;  %v4210_v32 = vpop.f32.mrb[127].mxu1 }
0x13d3   :  { %4339 = vrot.lane.b32.xlu1 %v4338_v43, %s4607_s24  ;;  %v6046_v43 = vld [vmem:[%s6221_s3 + $0x20] sm:$0x3f] }
0x13d7   :  { %4344 = vrot.lane.b32.xlu1 %v4343_v53, %s4606_s23 }
0x13df   :  { %v2960_v42 = vpop.f32.mrb[128].mxu1 }
0x13e0   :  { %v4213_v63 = vpop.f32.mrb[129].mxu1 }
0x13e1   :  { %v2963_v23 = vpop.f32.mrb[130].mxu1 }
0x13e2   :  { %v4348_v30 = vpack.i.bf16 %v2963_v23, %v2960_v42  ;;  %v4214_v0 = vpop.f32.mrb[131].mxu1 }
0x13e4   :  { %4349 = vrot.lane.b32.xlu1 %v4348_v30, %s4607_s24 }
0x13e8   :  { %2987 = vrot.lane.b32.xlu1 %v2508_v51, %s4605_s14 }
0x13ec   :  { %3007 = vrot.lane.b32.xlu1 %v2738_v60, %s4606_s23 }
0x1415   :  { %v4325_v19 = vpop.permute.xlu1 %4324 }
0x1416   :  { %v4327_v57 = vunpack.i.h.bf16 %v4325_v19  ;;  %v4326_v62 = vunpack.i.l.bf16 %v4325_v19 }
0x1418   :  { %v3035_v55 = vsel %vm413_vm8, %v5980_v39, %v4327_v57  ;;  %v3034_v3 = vsel %vm413_vm8, %v5978_v58, %v4326_v62 }
0x141d   :  { %v4330_v39 = vpop.permute.xlu0 %4329 }
0x141e   :  { %v4332_v40 = vunpack.i.h.bf16 %v4330_v39  ;;  %v4331_v58 = vunpack.i.l.bf16 %v4330_v39 }
0x1420   :  { %v3037_v6 = vsel %vm413_vm8, %v5984_v45, %v4332_v40  ;;  %v3036_v24 = vsel %vm413_vm8, %v5982_v22, %v4331_v58 }
0x142d   :  { %v4335_v27 = vpop.permute.xlu1 %4334 }
0x142e   :  { %v4337_v20 = vunpack.i.h.bf16 %v4335_v27  ;;  %v4336_v37 = vunpack.i.l.bf16 %v4335_v27 }
0x1430   :  { %v3040_v15 = vsel %vm1389_vm14, %v3035_v55, %v4337_v20  ;;  %v3039_v51 = vsel %vm1389_vm14, %v3034_v3, %v4336_v37 }
0x1445   :  { %v4340_v14 = vpop.permute.xlu1 %4339 }
0x1446   :  { %v4342_v21 = vunpack.i.h.bf16 %v4340_v14  ;;  %v4341_v13 = vunpack.i.l.bf16 %v4340_v14 }
0x1448   :  { %v3045_v33 = vsel %vm1395_vm3, %v3040_v15, %v4342_v21  ;;  %v3044_v11 = vsel %vm1395_vm3, %v3039_v51, %v4341_v13 }
0x1449   :  { %v3049_v46 = vpack.c.bf16 %v3045_v33, %v3044_v11  ;;  %v4345_v5 = vpop.permute.xlu1 %4344 }
0x144a   :  { %v4347_v59 = vunpack.i.h.bf16 %v4345_v5  ;;  %v4346_v34 = vunpack.i.l.bf16 %v4345_v5 }
0x144b   :  { %4224 = vmatmul.mubr.msk.bf16.vlgmr.msra.gmra.mrb[120].mxu0 %vm241_vm4, %v3049_v46 }
0x144c   :  { %4227 = vmatprep.mubr.msk.bf16.mxu0 %vm4592_vm7, %v4591_v28  ;;  %v3042_v61 = vsel %vm1389_vm14, %v3037_v6, %v4347_v59  ;;  %v3041_v52 = vsel %vm1389_vm14, %v3036_v24, %v4346_v34 }
0x1456   :  { %v4350_v38 = vpop.permute.xlu1 %4349 }
0x1457   :  { %v4352_v12 = vunpack.i.h.bf16 %v4350_v38  ;;  %v4351_v53 = vunpack.i.l.bf16 %v4350_v38 }
0x1459   :  { %v3047_v60 = vsel %vm1395_vm3, %v3042_v61, %v4352_v12  ;;  %v3046_v8 = vsel %vm1395_vm3, %v3041_v52, %v4351_v53 }
0x145a   :  { %v3050_v1 = vpack.c.bf16 %v3047_v60, %v3046_v8  ;;  %v2988_v10 = vpop.permute.xlu1 %2987  ;;  %v3667_v60 = vld [vmem:[%s6224_s6 + $0x28] sm:$0xff]  ;;  %v3668_v8 = vld [vmem:[%s6224_s6 + $0x30] sm:$0xff] }
0x145b   :  { %v3038_v41 = vsel %vm413_vm8, %v5986_v4, %v2988_v10  ;;  %v3132_v4 = vrot.slane %v6046_v43, %v311_v47 }
0x145c   :  { %4228 = vmatmul.mubr.msk.bf16.gmra.mrb[124].mxu0 %vm241_vm4, %v3050_v1  ;;  %v3230_v1 = vpack.c.bf16 %v3668_v8, %v3667_v60  ;;  %v3685_v60 = vld [vmem:[%s6225_s7 + $0x60] sm:$0xff]  ;;  %v3686_v8 = vld [vmem:[%s6225_s7 + $0x68] sm:$0xff] }
0x145d   :  { %4231 = vmatprep.mubr.msk.bf16.mxu0 %vm4592_vm7, %v4591_v28 }
0x145e   :  { %v3008_v7 = vpop.permute.xlu1 %3007  ;;  %4236 = vmatpush3.bf16.msra.mxu1 %v3230_v1  ;;  %v3465_v1 = vpack.c.bf16 %v3686_v8, %v3685_v60 }
0x145f   :  { %v3043_v48 = vsel %vm1389_vm14, %v3038_v41, %v3008_v7  ;;  %4237 = vmatprep.subr.bf16.mxu1 %v4591_v28 }
0x149d   :  { %v2968_v45 = vpop.f32.mrb[132].mxu1 }
0x149e   :  { %3027 = vrot.lane.b32.xlu1 %v2968_v45, %s4607_s24  ;;  %v4217_v22 = vpop.f32.mrb[133].mxu1  ;;  %v3669_v45 = vld [vmem:[%s6224_s6 + $0x38] sm:$0xff] }
0x149f   :  { %v2971_v36 = vpop.f32.mrb[134].mxu1  ;;  %v3670_v22 = vld [vmem:[%s6224_s6 + $0x40] sm:$0xff] }
0x14a0   :  { %v4218_v26 = vpop.f32.mrb[135].mxu1  ;;  %v3231_v36 = vpack.c.bf16 %v3670_v22, %v3669_v45  ;;  %v3687_v45 = vld [vmem:[%s6225_s7 + $0x70] sm:$0xff]  ;;  %v3688_v22 = vld [vmem:[%s6225_s7 + $0x78] sm:$0xff] }
0x14a2   :  { %4238 = vmatpush3.bf16.msra.mxu1 %v3231_v36  ;;  %v3466_v36 = vpack.c.bf16 %v3688_v22, %v3687_v45 }
0x1510   :  { %v3028_v2 = vpop.permute.xlu1 %3027 }
0x1511   :  { %v3048_v9 = vsel %vm1395_vm3, %v3043_v48, %v3028_v2 }
0x1512   :  { %v3051_v31 = vpack.c.bf16 %v3048_v9, %v3048_v9 }
0x1514   :  { %4232 = vmatmul.mubr.msk.bf16.gmra.mrb[128].mxu0 %vm241_vm4, %v3051_v31 }
0x1515   :  { %4259 = vmatprep.mubr.msk.bf16.mxu0 %vm4592_vm7, %v4591_v28 }
0x151e   :  { %v3102_v32 = vpop.f32.mrb[120].mxu0 }
0x151f   :  { %v3124_v42 = vadd.f32 %v3102_v32, %v5499_v18  ;;  %v4225_v63 = vpop.f32.mrb[121].mxu0 }
0x1520   :  { %v3105_v23 = vpop.f32.mrb[122].mxu0 }
0x1521   :  { %v6052_v30 = vadd.f32 %v3132_v4, %v3124_v42  ;;  %v3125_v0 = vadd.f32 %v3105_v23, %v5502_v35  ;;  %v4226_v19 = vpop.f32.mrb[123].mxu0 }
0x1522   :  { %v6089_v19 = vrot.slane %v6046_v43, %v320_v56 }
0x1523   :  { %v3134_v27 = vadd.f32 %v3132_v4, %v3125_v0  ;;  %v3138_v57 = vsel %vm241_vm4, %v6052_v30, 0.0 }
0x1524   :  { %3139 = vadd.xlane.f32.xlu1 %v3138_v57 }
0x1525   :  { %v3141_v62 = vsel %vm241_vm4, %v3134_v27, 0.0 }
0x1526   :  { %3142 = vadd.xlane.f32.xlu0 %v3141_v62  ;;  %v3215_v62 = vrot.slane %v6046_v43, %v4690_v17 }
0x152f   :  { %v3110_v20 = vpop.f32.mrb[124].mxu0 }
0x1530   :  { %v3126_v47 = vadd.f32 %v3110_v20, %v5509_v25  ;;  %v4229_v37 = vpop.f32.mrb[125].mxu0 }
0x1531   :  { %v3113_v18 = vpop.f32.mrb[126].mxu0 }
0x1532   :  { %v6059_v14 = vadd.f32 %v3132_v4, %v3126_v47  ;;  %v3127_v55 = vadd.f32 %v3113_v18, %v5512_v44  ;;  %v4230_v3 = vpop.f32.mrb[127].mxu0 }
0x1534   :  { %v3136_v35 = vadd.f32 %v3132_v4, %v3127_v55  ;;  %v3144_v21 = vsel %vm241_vm4, %v6059_v14, 0.0 }
0x1535   :  { %3145 = vadd.xlane.f32.xlu0 %v3144_v21 }
0x1536   :  { %v3147_v13 = vsel %vm241_vm4, %v3136_v35, 0.0 }
0x1537   :  { %3148 = vadd.xlane.f32.xlu1 %v3147_v13 }
0x15b1   :  { %v3140_v15 = vpop.xlane.xlu1 %3139 }
0x15b2   :  { %v3153_v51 = vmul.f32 0.03125, %v3140_v15 }
0x15b3   :  { %v3143_v33 = vpop.xlane.xlu0 %3142 }
0x15b4   :  { %v3158_v25 = vsub.f32 %v6052_v30, %v3153_v51  ;;  %v3154_v11 = vmul.f32 0.03125, %v3143_v33 }
0x15b6   :  { %v3159_v46 = vsub.f32 %v3134_v27, %v3154_v11  ;;  %v3163_v39 = vmul.f32 %v3158_v25, %v3158_v25 }
0x15b8   :  { %v3168_v5 = vsel %vm241_vm4, %v3163_v39, 0.0  ;;  %v3164_v44 = vmul.f32 %v3159_v46, %v3159_v46 }
0x15b9   :  { %3169 = vadd.xlane.f32.xlu0 %v3168_v5 }
0x15ba   :  { %v3171_v40 = vsel %vm241_vm4, %v3164_v44, 0.0 }
0x15bb   :  { %3172 = vadd.xlane.f32.xlu1 %v3171_v40 }
0x15c2   :  { %v3146_v58 = vpop.xlane.xlu0 %3145 }
0x15c3   :  { %v3155_v59 = vmul.f32 0.03125, %v3146_v58 }
0x15c4   :  { %v3149_v34 = vpop.xlane.xlu1 %3148 }
0x15c5   :  { %v3160_v38 = vsub.f32 %v6059_v14, %v3155_v59  ;;  %v3156_v6 = vmul.f32 0.03125, %v3149_v34 }
0x15c7   :  { %v3161_v24 = vsub.f32 %v3136_v35, %v3156_v6  ;;  %v3165_v12 = vmul.f32 %v3160_v38, %v3160_v38  ;;  %v3681_v6 = vld [vmem:[%s6225_s7 + $0x40] sm:$0xff] }
0x15c9   :  { %v3174_v53 = vsel %vm241_vm4, %v3165_v12, 0.0  ;;  %v3166_v61 = vmul.f32 %v3161_v24, %v3161_v24 }
0x15ca   :  { %3175 = vadd.xlane.f32.xlu0 %v3174_v53  ;;  %v3683_v53 = vld [vmem:[%s6225_s7 + $0x50] sm:$0xff] }
0x15cb   :  { %v3177_v52 = vsel %vm241_vm4, %v3166_v61, 0.0  ;;  %v3684_v61 = vld [vmem:[%s6225_s7 + $0x58] sm:$0xff] }
0x15cc   :  { %3178 = vadd.xlane.f32.xlu1 %v3177_v52  ;;  %v3464_v52 = vpack.c.bf16 %v3684_v61, %v3683_v53 }
0x15e7   :  { %v3118_v26 = vpop.f32.mrb[128].mxu0 }
0x15e8   :  { %v3128_v10 = vadd.f32 %v3118_v26, %v5519_v50  ;;  %v4233_v7 = vpop.f32.mrb[129].mxu0 }
0x15e9   :  { %v3121_v41 = vpop.f32.mrb[130].mxu0 }
0x15ea   :  { %v3137_v48 = vadd.f32 %v3132_v4, %v3128_v10  ;;  %v4234_v2 = vpop.f32.mrb[131].mxu0 }
0x15ec   :  { %v3150_v9 = vsel %vm254_vm6, %v3137_v48, 0.0 }
0x15ed   :  { %3151 = vadd.xlane.f32.xlu0 %v3150_v9 }
0x1646   :  { %v3170_v31 = vpop.xlane.xlu0 %3169 }
0x1647   :  { %v3183_v32 = vmul.f32 0.03125, %v3170_v31 }
0x1648   :  { %v3173_v42 = vpop.xlane.xlu1 %3172 }
0x1649   :  { %v3188_v63 = vadd.f32 1e-05, %v3183_v32  ;;  %v3184_v23 = vmul.f32 0.03125, %v3173_v42  ;;  %v6136_v32 = vld [vmem:[%s6224_s6 + $0x48] ss:$0 sm:$0xff] }
0x164b   :  { %4553 = vrsqrt.f32 %v3188_v63  ;;  %v3189_v0 = vadd.f32 1e-05, %v3184_v23 }
0x164d   :  { %4555 = vrsqrt.f32 %v3189_v0 }
0x1655   :  { %v4554_v50 = vpop.eup %4553 }
0x1656   :  { %v3198_v27 = vmul.f32 %v4554_v50, %v3158_v25 }
0x1657   :  { %v4556_v4 = vpop.eup %4555  ;;  %v3176_v57 = vpop.xlane.xlu0 %3175 }
0x1658   :  { %v3207_v20 = vmul.f32 %v6089_v19, %v3198_v27  ;;  %v3199_v47 = vmul.f32 %v4556_v4, %v3159_v46  ;;  %v3185_v37 = vmul.f32 0.03125, %v3176_v57 }
0x1659   :  { %v3179_v18 = vpop.xlane.xlu1 %3178 }
0x165a   :  { %v3208_v55 = vmul.f32 %v6089_v19, %v3199_v47  ;;  %v3190_v3 = vadd.f32 1e-05, %v3185_v37  ;;  %v3186_v35 = vmul.f32 0.03125, %v3179_v18  ;;  %v3216_v21 = vadd.f32 %v3215_v62, %v3207_v20 }
0x165c   :  { %v3217_v13 = vadd.f32 %v3215_v62, %v3208_v55  ;;  %4557 = vrsqrt.f32 %v3190_v3  ;;  %v3191_v56 = vadd.f32 1e-05, %v3186_v35 }
0x165e   :  { %4559 = vrsqrt.f32 %v3191_v56  ;;  %v3227_v15 = vpack.c.bf16 %v3217_v13, %v3216_v21 }
0x1660   :  { %4240 = vmatmul.mubr.msk.bf16.vlgmr.msra.gmra.mrb[136].mxu1 %vm241_vm4, %v3227_v15 }
0x1661   :  { %4243 = vmatprep.mubr.msk.bf16.mxu1 %vm4592_vm7, %v4591_v28 }
0x1666   :  { %v4558_v17 = vpop.eup %4557 }
0x1667   :  { %v3200_v51 = vmul.f32 %v4558_v17, %v3160_v38 }
0x1668   :  { %v4560_v33 = vpop.eup %4559 }
0x1669   :  { %v3201_v25 = vmul.f32 %v4560_v33, %v3161_v24  ;;  %v3209_v11 = vmul.f32 %v6089_v19, %v3200_v51  ;;  %v3682_v24 = vld [vmem:[%s6225_s7 + $0x48] sm:$0xff] }
0x166a   :  { %v3463_v12 = vpack.c.bf16 %v3682_v24, %v3681_v6 }
0x166b   :  { %v3210_v46 = vmul.f32 %v6089_v19, %v3201_v25  ;;  %v3218_v39 = vadd.f32 %v3215_v62, %v3209_v11 }
0x166c   :  { %4252 = vmatpush3.bf16.msra.mxu0 %v3463_v12 }
0x166d   :  { %v3219_v5 = vadd.f32 %v3215_v62, %v3210_v46  ;;  %4253 = vmatprep.subr.bf16.mxu0 %v4591_v28 }
0x166f   :  { %v3228_v44 = vpack.c.bf16 %v3219_v5, %v3218_v39 }
0x1670   :  { %4254 = vmatpush3.bf16.msra.mxu0 %v3464_v52 }
0x1671   :  { %4244 = vmatmul.mubr.msk.bf16.gmra.mrb[140].mxu1 %vm241_vm4, %v3228_v44  ;;  %4255 = vmatprep.subr.bf16.mxu0 %v4591_v28 }
0x1672   :  { %4247 = vmatprep.mubr.msk.bf16.mxu1 %vm4592_vm7, %v4591_v28 }
0x1674   :  { %4256 = vmatpush3.bf16.msra.mxu0 %v3465_v1 }
0x1675   :  { %4257 = vmatprep.subr.bf16.mxu0 %v4591_v28 }
0x1678   :  { %4258 = vmatpush3.bf16.msra.mxu0 %v3466_v36 }
0x167a   :  { %v3152_v40 = vpop.xlane.xlu0 %3151 }
0x167b   :  { %v3157_v58 = vmul.f32 0.03125, %v3152_v40 }
0x167d   :  { %v3162_v59 = vsub.f32 %v3137_v48, %v3157_v58 }
0x167f   :  { %v3167_v34 = vmul.f32 %v3162_v59, %v3162_v59 }
0x1681   :  { %v3180_v38 = vsel %vm254_vm6, %v3167_v34, 0.0 }
0x1682   :  { %3181 = vadd.xlane.f32.xlu1 %v3180_v38 }
0x170f   :  { %v3182_v26 = vpop.xlane.xlu1 %3181 }
0x1710   :  { %v3187_v10 = vmul.f32 0.03125, %v3182_v26 }
0x1712   :  { %v3192_v7 = vadd.f32 1e-05, %v3187_v10 }
0x1714   :  { %4561 = vrsqrt.f32 %v3192_v7 }
0x171e   :  { %v4562_v41 = vpop.eup %4561 }
0x171f   :  { %v3202_v48 = vmul.f32 %v4562_v41, %v3162_v59 }
0x1721   :  { %v3211_v2 = vmul.f32 %v6089_v19, %v3202_v48 }
0x1723   :  { %v3220_v9 = vadd.f32 %v3215_v62, %v3211_v2 }
0x1725   :  { %v3229_v31 = vpack.c.bf16 %v3220_v9, %v3220_v9 }
0x1727   :  { %4248 = vmatmul.mubr.msk.bf16.gmra.mrb[144].mxu1 %vm241_vm4, %v3229_v31 }
0x1733   :  { %v3279_v42 = vpop.f32.mrb[136].mxu1 }
0x1734   :  { %v6139_v63 = vadd.f32 %v6136_v32, %v3279_v42  ;;  %v4241_v23 = vpop.f32.mrb[137].mxu1 }
0x1735   :  { %v3282_v0 = vpop.f32.mrb[138].mxu1 }
0x1736   :  { %v3306_v50 = vmul.f32 0.70710677, %v6139_v63  ;;  %v6143_v27 = vadd.f32 %v6136_v32, %v3282_v0  ;;  %v4242_v19 = vpop.f32.mrb[139].mxu1 }
0x1738   :  { %v6145_v4 = vclamps-f32 %v3306_v50, 4.0  ;;  %v3307_v57 = vmul.f32 0.70710677, %v6143_v27 }
0x173a   :  { %v3321_v62 = vmul.f32 %v6145_v4, %v6145_v4  ;;  %v6150_v20 = vclamps-f32 %v3307_v57, 4.0 }
0x173c   :  { %v3326_v47 = vmul.f32 -2.7261424e-10, %v3321_v62  ;;  %v3391_v37 = vmul.f32 -1.45660715e-05, %v3321_v62  ;;  %v3322_v18 = vmul.f32 %v6150_v20, %v6150_v20 }
0x173e   :  { %v3331_v55 = vadd.f32 2.7706815e-08, %v3326_v47  ;;  %v3396_v3 = vadd.f32 -0.00021337405, %v3391_v37  ;;  %v3327_v35 = vmul.f32 -2.7261424e-10, %v3322_v18 }
0x173f   :  { %v3392_v21 = vmul.f32 -1.45660715e-05, %v3322_v18 }
0x1740   :  { %v3336_v13 = vmul.f32 %v3331_v55, %v3321_v62  ;;  %v3401_v56 = vmul.f32 %v3396_v3, %v3321_v62  ;;  %v3332_v15 = vadd.f32 2.7706815e-08, %v3327_v35 }
0x1741   :  { %v3397_v17 = vadd.f32 -0.00021337405, %v3392_v21 }
0x1742   :  { %v3341_v51 = vadd.f32 -2.101024e-06, %v3336_v13  ;;  %v3406_v33 = vadd.f32 -0.001682827, %v3401_v56  ;;  %v3337_v25 = vmul.f32 %v3332_v15, %v3322_v18 }
0x1743   :  { %v3402_v11 = vmul.f32 %v3397_v17, %v3322_v18 }
0x1744   :  { %v3346_v46 = vmul.f32 %v3341_v51, %v3321_v62  ;;  %v3411_v39 = vmul.f32 %v3406_v33, %v3321_v62  ;;  %v3342_v5 = vadd.f32 -2.101024e-06, %v3337_v25  ;;  %v3287_v44 = vpop.f32.mrb[140].mxu1 }
0x1745   :  { %v3407_v40 = vadd.f32 -0.001682827, %v3402_v11  ;;  %v6155_v58 = vadd.f32 %v6136_v32, %v3287_v44  ;;  %v4245_v59 = vpop.f32.mrb[141].mxu1 }
0x1746   :  { %v3351_v34 = vadd.f32 -5.6925062e-05, %v3346_v46  ;;  %v3416_v38 = vadd.f32 -0.0073733293, %v3411_v39  ;;  %v3347_v6 = vmul.f32 %v3342_v5, %v3322_v18  ;;  %v3290_v24 = vpop.f32.mrb[142].mxu1 }
0x1747   :  { %v3412_v12 = vmul.f32 %v3407_v40, %v3322_v18  ;;  %v3308_v53 = vmul.f32 0.70710677, %v6155_v58  ;;  %v6159_v61 = vadd.f32 %v6136_v32, %v3290_v24  ;;  %v4246_v52 = vpop.f32.mrb[143].mxu1 }
0x1748   :  { %v3356_v60 = vmul.f32 %v3351_v34, %v3321_v62  ;;  %v3421_v8 = vmul.f32 %v3416_v38, %v3321_v62  ;;  %v3352_v1 = vadd.f32 -5.6925062e-05, %v3347_v6 }
0x1749   :  { %v3417_v45 = vadd.f32 -0.0073733293, %v3412_v12  ;;  %v6161_v22 = vclamps-f32 %v3308_v53, 4.0  ;;  %v3309_v36 = vmul.f32 0.70710677, %v6159_v61 }
0x174a   :  { %v3361_v26 = vadd.f32 -0.00073499064, %v3356_v60  ;;  %v3426_v10 = vadd.f32 -0.014264739, %v3421_v8  ;;  %v3357_v7 = vmul.f32 %v3352_v1, %v3322_v18 }
0x174b   :  { %v3422_v41 = vmul.f32 %v3417_v45, %v3322_v18  ;;  %v6166_v48 = vmul.f32 %v6161_v22, %v6161_v22  ;;  %v6168_v2 = vclamps-f32 %v3309_v36, 4.0 }
0x174c   :  { %v3366_v9 = vmul.f32 %v3361_v26, %v3321_v62  ;;  %4563 = vrcp.f32 %v3426_v10  ;;  %v3362_v31 = vadd.f32 -0.00073499064, %v3357_v7 }
0x174d   :  { %v3427_v42 = vadd.f32 -0.014264739, %v3422_v41  ;;  %v3328_v23 = vmul.f32 -2.7261424e-10, %v6166_v48  ;;  %v3393_v0 = vmul.f32 -1.45660715e-05, %v6166_v48  ;;  %v3324_v50 = vmul.f32 %v6168_v2, %v6168_v2 }
0x174e   :  { %v3371_v19 = vadd.f32 -0.0029546, %v3366_v9  ;;  %v3367_v57 = vmul.f32 %v3362_v31, %v3322_v18  ;;  %v3302_v9 = vmul.f32 0.5, %v6143_v27 }
0x174f   :  { %4565 = vrcp.f32 %v3427_v42  ;;  %v3333_v47 = vadd.f32 2.7706815e-08, %v3328_v23  ;;  %v3398_v37 = vadd.f32 -0.00021337405, %v3393_v0  ;;  %v3329_v55 = vmul.f32 -2.7261424e-10, %v3324_v50 }
0x1750   :  { %v3376_v3 = vmul.f32 %v3371_v19, %v3321_v62  ;;  %v3372_v35 = vadd.f32 -0.0029546, %v3367_v57  ;;  %v3394_v21 = vmul.f32 -1.45660715e-05, %v3324_v50 }
0x1751   :  { %v3338_v13 = vmul.f32 %v3333_v47, %v6166_v48  ;;  %v3403_v56 = vmul.f32 %v3398_v37, %v6166_v48  ;;  %v3334_v15 = vadd.f32 2.7706815e-08, %v3329_v55 }
0x1752   :  { %v3381_v17 = vadd.f32 -0.016096033, %v3376_v3  ;;  %v3377_v51 = vmul.f32 %v3372_v35, %v3322_v18  ;;  %v3399_v33 = vadd.f32 -0.00021337405, %v3394_v21 }
0x1753   :  { %v3343_v25 = vadd.f32 -2.101024e-06, %v3338_v13  ;;  %v3408_v11 = vadd.f32 -0.001682827, %v3403_v56  ;;  %v3339_v46 = vmul.f32 %v3334_v15, %v3324_v50 }
0x1754   :  { %v3386_v39 = vmul.f32 %v6145_v4, %v3381_v17  ;;  %v3382_v5 = vadd.f32 -0.016096033, %v3377_v51  ;;  %v3404_v44 = vmul.f32 %v3399_v33, %v3324_v50 }
0x1755   :  { %v3348_v40 = vmul.f32 %v3343_v25, %v6166_v48  ;;  %v3413_v62 = vmul.f32 %v3408_v11, %v6166_v48  ;;  %v3344_v59 = vadd.f32 -2.101024e-06, %v3339_v46  ;;  %v3304_v46 = vmul.f32 0.5, %v6159_v61 }
0x1756   :  { %v4564_v34 = vpop.eup %4563  ;;  %v3387_v38 = vmul.f32 %v6150_v20, %v3382_v5  ;;  %v3409_v6 = vadd.f32 -0.001682827, %v3404_v44  ;;  %v3301_v20 = vmul.f32 0.5, %v6139_v63 }
0x1757   :  { %v3432_v24 = vmul.f32 %v4564_v34, %v3386_v39  ;;  %v3353_v12 = vadd.f32 -5.6925062e-05, %v3348_v40  ;;  %v3418_v18 = vadd.f32 -0.0073733293, %v3413_v62  ;;  %v3349_v53 = vmul.f32 %v3344_v59, %v3324_v50 }
0x1758   :  { %v3414_v52 = vmul.f32 %v3409_v6, %v3324_v50 }
0x1759   :  { %v4566_v60 = vpop.eup %4565  ;;  %v3358_v8 = vmul.f32 %v3353_v12, %v6166_v48  ;;  %v3423_v4 = vmul.f32 %v3418_v18, %v6166_v48  ;;  %v3354_v1 = vadd.f32 -5.6925062e-05, %v3349_v53  ;;  %v3441_v45 = vadd.f32 1.0, %v3432_v24 }
0x175a   :  { %v3434_v36 = vmul.f32 %v4566_v60, %v3387_v38  ;;  %v3419_v26 = vadd.f32 -0.0073733293, %v3414_v52 }
0x175b   :  { %v3363_v10 = vadd.f32 -0.00073499064, %v3358_v8  ;;  %v3428_v7 = vadd.f32 -0.014264739, %v3423_v4  ;;  %v3359_v41 = vmul.f32 %v3354_v1, %v3324_v50  ;;  %v3446_v19 = vmul.f32 %v3441_v45, %v3301_v20 }
0x175c   :  { %v3442_v31 = vadd.f32 1.0, %v3434_v36  ;;  %v3424_v42 = vmul.f32 %v3419_v26, %v3324_v50 }
0x175d   :  { %v3368_v23 = vmul.f32 %v3363_v10, %v6166_v48  ;;  %4567 = vrcp.f32 %v3428_v7  ;;  %v3364_v0 = vadd.f32 -0.00073499064, %v3359_v41 }
0x175e   :  { %v3447_v57 = vmul.f32 %v3442_v31, %v3302_v9  ;;  %v3429_v47 = vadd.f32 -0.014264739, %v3424_v42 }
0x175f   :  { %v3373_v37 = vadd.f32 -0.0029546, %v3368_v23  ;;  %v3369_v55 = vmul.f32 %v3364_v0, %v3324_v50 }
0x1760   :  { %v3451_v3 = vpack.c.bf16 %v3447_v57, %v3446_v19  ;;  %4569 = vrcp.f32 %v3429_v47 }
0x1761   :  { %v3378_v35 = vmul.f32 %v3373_v37, %v6166_v48  ;;  %v3374_v21 = vadd.f32 -0.0029546, %v3369_v55  ;;  %v3303_v48 = vmul.f32 0.5, %v6155_v58 }
0x1762   :  { %4260 = vmatmul.mubr.msk.bf16.vlgmr.msra.gmra.mrb[132].mxu0 %vm1816_vm9, %v3451_v3 }
0x1763   :  { %v3383_v63 = vadd.f32 -0.016096033, %v3378_v35  ;;  %v3379_v27 = vmul.f32 %v3374_v21, %v3324_v50  ;;  %4263 = vmatprep.mubr.msk.bf16.mxu0 %vm4592_vm7, %v4591_v28  ;;  %v3534_v21 = vrot.slane %v6046_v43, %v1556_v49 }
0x1765   :  { %v3388_v13 = vmul.f32 %v6161_v22, %v3383_v63  ;;  %v3384_v56 = vadd.f32 -0.016096033, %v3379_v27 }
0x1767   :  { %v4568_v15 = vpop.eup %4567  ;;  %v3389_v17 = vmul.f32 %v6168_v2, %v3384_v56 }
0x1768   :  { %v3436_v51 = vmul.f32 %v4568_v15, %v3388_v13 }
0x176a   :  { %v4570_v33 = vpop.eup %4569  ;;  %v3443_v25 = vadd.f32 1.0, %v3436_v51 }
0x176b   :  { %v3438_v11 = vmul.f32 %v4570_v33, %v3389_v17 }
0x176c   :  { %v3448_v5 = vmul.f32 %v3443_v25, %v3303_v48 }
0x176d   :  { %v3444_v39 = vadd.f32 1.0, %v3438_v11 }
0x176f   :  { %v3449_v50 = vmul.f32 %v3444_v39, %v3304_v46 }
0x1771   :  { %v3452_v44 = vpack.c.bf16 %v3449_v50, %v3448_v5 }
0x1773   :  { %4264 = vmatmul.mubr.msk.bf16.gmra.mrb[136].mxu0 %vm1816_vm9, %v3452_v44 }
0x1774   :  { %4267 = vmatprep.mubr.msk.bf16.mxu0 %vm4592_vm7, %v4591_v28 }
0x17fa   :  { %v3295_v22 = vpop.f32.mrb[144].mxu1 }
0x17fb   :  { %v3296_v2 = vadd.f32 %v6136_v32, %v3295_v22  ;;  %v4249_v40 = vpop.f32.mrb[145].mxu1 }
0x17fc   :  { %v3298_v62 = vpop.f32.mrb[146].mxu1 }
0x17fd   :  { %v3310_v59 = vmul.f32 0.70710677, %v3296_v2  ;;  %v4250_v34 = vpop.f32.mrb[147].mxu1  ;;  %v3305_v23 = vmul.f32 0.5, %v3296_v2 }
0x17ff   :  { %v3680_v38 = vclamps-f32 %v3310_v59, 4.0 }
0x1801   :  { %v3325_v58 = vmul.f32 %v3680_v38, %v3680_v38 }
0x1803   :  { %v3330_v6 = vmul.f32 -2.7261424e-10, %v3325_v58  ;;  %v3395_v61 = vmul.f32 -1.45660715e-05, %v3325_v58 }
0x1805   :  { %v3335_v24 = vadd.f32 2.7706815e-08, %v3330_v6  ;;  %v3400_v12 = vadd.f32 -0.00021337405, %v3395_v61  ;;  %v3566_v6 = vrot.slane %v6046_v43, %v1565_v54 }
0x1807   :  { %v3340_v18 = vmul.f32 %v3335_v24, %v3325_v58  ;;  %v3405_v53 = vmul.f32 %v3400_v12, %v3325_v58  ;;  %v3571_v24 = vrot.slane %v6046_v43, %v1889_v29 }
0x1809   :  { %v3345_v52 = vadd.f32 -2.101024e-06, %v3340_v18  ;;  %v3410_v60 = vadd.f32 -0.001682827, %v3405_v53 }
0x180b   :  { %v3350_v8 = vmul.f32 %v3345_v52, %v3325_v58  ;;  %v3415_v4 = vmul.f32 %v3410_v60, %v3325_v58 }
0x180d   :  { %v3355_v28 = vadd.f32 -5.6925062e-05, %v3350_v8  ;;  %v3420_v1 = vadd.f32 -0.0073733293, %v3415_v4 }
0x180f   :  { %v3360_v45 = vmul.f32 %v3355_v28, %v3325_v58  ;;  %v3425_v32 = vmul.f32 %v3420_v1, %v3325_v58 }
0x1811   :  { %v3365_v36 = vadd.f32 -0.00073499064, %v3360_v45  ;;  %v3430_v26 = vadd.f32 -0.014264739, %v3425_v32 }
0x1813   :  { %v3370_v10 = vmul.f32 %v3365_v36, %v3325_v58  ;;  %4571 = vrcp.f32 %v3430_v26 }
0x1815   :  { %v3375_v7 = vadd.f32 -0.0029546, %v3370_v10 }
0x1817   :  { %v3380_v41 = vmul.f32 %v3375_v7, %v3325_v58 }
0x1819   :  { %v3385_v20 = vadd.f32 -0.016096033, %v3380_v41 }
0x181b   :  { %v3390_v9 = vmul.f32 %v3680_v38, %v3385_v20 }
0x181d   :  { %v4572_v31 = vpop.eup %4571 }
0x181e   :  { %v3440_v42 = vmul.f32 %v4572_v31, %v3390_v9 }
0x1820   :  { %v3445_v0 = vadd.f32 1.0, %v3440_v42 }
0x1822   :  { %v3450_v19 = vmul.f32 %v3445_v0, %v3305_v23 }
0x1824   :  { %v3453_v57 = vpack.c.bf16 %v3450_v19, %v3450_v19 }
0x1826   :  { %4268 = vmatmul.mubr.msk.bf16.gmra.mrb[140].mxu0 %vm1816_vm9, %v3453_v57 }
0x1835   :  { %v3510_v47 = vpop.f32.mrb[132].mxu0 }
0x1836   :  { %v4261_v37 = vpop.f32.mrb[133].mxu0  ;;  %v3529_v35 = vadd.f32 %v3510_v47, %v6052_v30 }
0x1837   :  { %v3513_v55 = vpop.f32.mrb[134].mxu0 }
0x1838   :  { %v4262_v3 = vpop.f32.mrb[135].mxu0  ;;  %v3535_v27 = vadd.f32 %v3534_v21, %v3529_v35 }
0x183a   :  { %v3538_v33 = vrot.slane %v3535_v27, 1  ;;  %v3543_v11 = vrot.slane %v3535_v27, 6 }
0x1846   :  { %v3517_v63 = vpop.f32.mrb[136].mxu0 }
0x1847   :  { %v3530_v13 = vadd.f32 %v3517_v63, %v6059_v14  ;;  %v4265_v56 = vpop.f32.mrb[137].mxu0 }
0x1848   :  { %v3520_v15 = vpop.f32.mrb[138].mxu0 }
0x1849   :  { %v3536_v17 = vadd.f32 %v3534_v21, %v3530_v13  ;;  %v4266_v51 = vpop.f32.mrb[139].mxu0 }
0x184b   :  { %v3541_v25 = vrot.slane %v3536_v17, 2  ;;  %v3545_v48 = vrot.slane %v3536_v17, 7 }
0x184d   :  { %v3547_v46 = vsel %vm146_vm1, %v3538_v33, %v3541_v25 }
0x184e   :  { %v3548_v30 = vsel %vm127_vm2, %v3547_v46, %v3543_v11 }
0x184f   :  { %v3549_v39 = vsel %vm150_vm5, %v3548_v30, %v3545_v48 }
0x1850   :  { %v3550_v49 = vsel %vm254_vm6, %v3549_v39, 0.0 }
0x1851   :  { %3551 = vadd.xlane.f32.xlu0 %v3550_v49 }
0x18de   :  { %v3552_v5 = vpop.xlane.xlu0 %3551 }
0x18df   :  { %v3553_v50 = vmul.f32 0.03125, %v3552_v5 }
0x18e1   :  { %v3554_v14 = vsub.f32 %v3549_v39, %v3553_v50 }
0x18e3   :  { %v3555_v44 = vmul.f32 %v3554_v14, %v3554_v14 }
0x18e5   :  { %v3556_v22 = vsel %vm254_vm6, %v3555_v44, 0.0 }
0x18e6   :  { %3557 = vadd.xlane.f32.xlu1 %v3556_v22 }
0x18f9   :  { %v3524_v2 = vpop.f32.mrb[140].mxu0 }
0x18fa   :  { %v4269_v40 = vpop.f32.mrb[141].mxu0 }
0x18fb   :  { %v3526_v62 = vpop.f32.mrb[142].mxu0 }
0x18fc   :  { %v4270_v59 = vpop.f32.mrb[143].mxu0 }
0x1973   :  { %v3558_v34 = vpop.xlane.xlu1 %3557 }
0x1974   :  { %v3559_v38 = vmul.f32 0.03125, %v3558_v34 }
0x1976   :  { %v3560_v58 = vadd.f32 1e-05, %v3559_v38 }
0x1978   :  { %4573 = vrsqrt.f32 %v3560_v58 }
0x1982   :  { %v4574_v61 = vpop.eup %4573 }
0x1983   :  { %v3562_v12 = vmul.f32 %v4574_v61, %v3554_v14 }
0x1985   :  { %v3567_v18 = vmul.f32 %v3566_v6, %v3562_v12 }
0x1987   :  { %v3572_v53 = vadd.f32 %v3571_v24, %v3567_v18 }
0x1989   :  { %3573 = vst.msk [vmem:[%s6226_s8] sm:$0xf] %vm254_vm6, %v3572_v53 }

</bundles_post_ra>
